<compile_context>
chip_gen: v5e
topology: v5e:2x2
jax: 0.10.0
libtpu: 0.0.40
codegen_flags: <defaults>
</compile_context>

<pallas_src>
import functools
import math

import numpy as np
import jax
import jax.numpy as jnp
from jax.experimental import pallas as pl
from jax.experimental.pallas import tpu as pltpu

LN_EPS = 1e-5
BN_EPS = 1e-5


def _vmem_limit_bytes():
    # Generation-aware scoped-VMEM limit: ~3/4 of physical, capped at 96 MiB
    # (v5e/v6e: 128 MiB physical -> 96 MiB; v7x: 64 MiB -> 48 MiB).
    try:
        cap = int(pltpu.get_tpu_info().vmem_capacity_bytes)
        return max(32 << 20, min((cap * 3) // 4, 96 << 20))
    except Exception:  # no hw info available -> conservative value, safe on v7x
        return 48 << 20


_VMEM_LIMIT = _vmem_limit_bytes()


def _cp(*semantics):
    return pltpu.CompilerParams(dimension_semantics=semantics,
                                vmem_limit_bytes=_VMEM_LIMIT)


def _row_block(n, mult=8, max_rows=512):
    """Largest divisor of n that is a multiple of `mult`, preferring >=2 grid
    steps (v7x megacore) and capped at max_rows."""
    best_single = None
    for b in range(min(n, max_rows), mult - 1, -1):
        if n % b or b % mult:
            continue
        if n // b >= 2:
            return b
        if best_single is None:
            best_single = b
    return best_single if best_single is not None else n


# ----------------------------- in-kernel helpers -----------------------------

_ERF_P = 0.3275911
_ERF_A = (0.254829592, -0.284496736, 1.421413741, -1.453152027, 1.061405429)


def _gelu_erf(x):
    # TODO(synk): exact-erf GELU (torch nn.GELU default) via Abramowitz-Stegun
    # 7.1.26 (|err| < 1.5e-7).  exp + reciprocal go to the EUP (free slot),
    # the polynomial stays on the VPU.
    z = x * 0.7071067811865476
    a = jnp.abs(z)
    t = pl.reciprocal(1.0 + _ERF_P * a, approx=True)
    a1, a2, a3, a4, a5 = _ERF_A
    poly = ((((a5 * t + a4) * t + a3) * t + a2) * t + a1) * t
    e = 1.0 - poly * jnp.exp(-a * a)
    erf = jnp.where(z >= 0, e, -e)
    return 0.5 * x * (1.0 + erf)


# ----------------------------- Pallas kernels -----------------------------

def _ln_kernel(x_ref, a_ref, w_ref, b_ref, o_ref, *, eps):
    # x is lane-folded: each 128-lane row holds `fold` independent C-channel rows.
    # `a` is the block-diagonal (1/C) averaging matrix -> per-group mean/var on MXU.
    x = x_ref[...].astype(jnp.float32)
    a = a_ref[...]
    mu = jnp.dot(x, a, preferred_element_type=jnp.float32)
    xc = x - mu
    var = jnp.dot(xc * xc, a, preferred_element_type=jnp.float32)
    y = xc * jax.lax.rsqrt(var + eps) * w_ref[...] + b_ref[...]
    o_ref[...] = y.astype(o_ref.dtype)


def _bn_stats_kernel(x_ref, o_ref):
    # Per-block partial (sum, sum-of-squares) per lane; partials are reduced in
    # XLA.  Grid axis is "parallel" (no cross-step accumulation) and the store is
    # one full-block write.  Zero padding rows in the input do not perturb sums.
    x = x_ref[...].astype(jnp.float32)
    s = jnp.sum(x, axis=0, keepdims=True)
    q = jnp.sum(x * x, axis=0, keepdims=True)
    o_ref[...] = jnp.concatenate([s, q], axis=0)[None]


def _conv_mm_kernel(x_ref, w_ref, b_ref, o_ref):
    # Grouped conv (2d or 1d) as a single matmul: all taps folded into the K /
    # lane dimension, BN scale pre-folded into w, BN shift + conv bias in b.
    y = jnp.dot(x_ref[...], w_ref[...], preferred_element_type=jnp.float32)
    o_ref[...] = (y + b_ref[...]).astype(o_ref.dtype)


def _ff_kernel(x_ref, a_ref, lw_ref, lb_ref, w1_ref, b1_ref, w2_ref, b2_ref,
               o_ref, *, eps):
    # Fused: LayerNorm2 + Linear + GELU + Linear + GELU + residual add.
    # Lane-folded (fold tokens / 128-lane row) with block-diagonal expanded
    # (bf16) weights; LN math in f32, matmuls bf16 x bf16 -> f32.
    x = x_ref[...].astype(jnp.float32)
    a = a_ref[...]
    mu = jnp.dot(x, a, preferred_element_type=jnp.float32)
    xc = x - mu
    var = jnp.dot(xc * xc, a, preferred_element_type=jnp.float32)
    ln = xc * jax.lax.rsqrt(var + eps) * lw_ref[...] + lb_ref[...]
    h = jnp.dot(ln.astype(jnp.bfloat16), w1_ref[...],
                preferred_element_type=jnp.float32) + b1_ref[...]
    h = _gelu_erf(h)
    h = jnp.dot(h.astype(jnp.bfloat16), w2_ref[...],
                preferred_element_type=jnp.float32) + b2_ref[...]
    h = _gelu_erf(h)
    o_ref[...] = (x + h).astype(o_ref.dtype)


# ----------------------------- kernel wrappers -----------------------------

def layer_norm(rows, w_f, b_f, a):
    n, c = rows.shape
    cf = a.shape[0]
    fold = cf // c
    assert n % fold == 0
    nf = n // fold
    xf = rows.reshape(nf, cf)
    blk = _row_block(nf)
    out = pl.pallas_call(
        functools.partial(_ln_kernel, eps=LN_EPS),
        out_shape=jax.ShapeDtypeStruct((nf, cf), jnp.bfloat16),
        grid=(nf // blk,),
        in_specs=[
            pl.BlockSpec((blk, cf), lambda i: (i, 0)),
            pl.BlockSpec((cf, cf), lambda i: (0, 0)),
            pl.BlockSpec((1, cf), lambda i: (0, 0)),
            pl.BlockSpec((1, cf), lambda i: (0, 0)),
        ],
        out_specs=pl.BlockSpec((blk, cf), lambda i: (i, 0)),
        compiler_params=_cp("parallel"),
    )(xf, a, w_f, b_f)
    return out.reshape(n, c)


def bn_channel_stats(rows, c, count):
    """Per-channel mean / biased variance (training-mode BatchNorm) over rows.
    `rows` may contain zero padding rows; `count` is the true element count."""
    n = rows.shape[0]
    fold = 128 // c if (128 % c == 0 and n % (128 // c) == 0) else 1
    cf = c * fold
    nf = n // fold
    xf = rows.reshape(nf, cf)
    blk = _row_block(nf)
    g = nf // blk
    parts = pl.pallas_call(
        _bn_stats_kernel,
        out_shape=jax.ShapeDtypeStruct((g, 2, cf), jnp.float32),
        grid=(g,),
        in_specs=[pl.BlockSpec((blk, cf), lambda i: (i, 0))],
        out_specs=pl.BlockSpec((1, 2, cf), lambda i: (i, 0, 0)),
        compiler_params=_cp("parallel"),
    )(xf)
    sums = parts.sum(axis=0)                       # (2, cf) -- tiny XLA reduce
    s = sums[0].reshape(fold, c).sum(axis=0)
    q = sums[1].reshape(fold, c).sum(axis=0)
    mean = s / count
    # TODO(synk): single-pass E[x^2]-E[x]^2 in f32; switch to a centered/Welford
    # per-block accumulation if per-channel element counts grow large.
    var = q / count - mean * mean
    return mean, var


def conv_as_matmul(x, w, bias, *, row_mult, out_dtype):
    """Grouped conv folded into one matmul: x (rows, K) @ w (K, M) + bias."""
    n, k = x.shape
    m = w.shape[1]
    blk = _row_block(n, mult=row_mult)
    if bias.shape[0] == 1:
        bias_blk = bias
    else:
        # bias repeats with period bias.shape[0] (= H); blocks start on image
        # boundaries because blk is a multiple of lcm(8, H).
        assert blk % bias.shape[0] == 0
        bias_blk = jnp.tile(bias, (blk // bias.shape[0], 1))
    bb = bias_blk.shape[0]
    # TODO(synk): if K or M grows beyond a few thousand lanes, add a second grid
    # axis tiling the output-lane (M) dimension of the folded weight instead of
    # loading it whole (it grows quadratically with W*C / T*C).
    return pl.pallas_call(
        _conv_mm_kernel,
        out_shape=jax.ShapeDtypeStruct((n, m), out_dtype),
        grid=(n // blk,),
        in_specs=[
            pl.BlockSpec((blk, k), lambda i: (i, 0)),
            pl.BlockSpec((k, m), lambda i: (0, 0)),
            pl.BlockSpec((bb, m), lambda i: (0, 0)),
        ],
        out_specs=pl.BlockSpec((blk, m), lambda i: (i, 0)),
        compiler_params=_cp("parallel"),
    )(x, w, bias_blk)


def ff_block(rows, p):
    """Fused LN2 + Linear+GELU+Linear+GELU + residual, lane-folded to 128 lanes."""
    n, c = rows.shape
    a = p["A"]
    cf = a.shape[0]
    fold = cf // c
    assert n % fold == 0
    nf = n // fold
    hf = p["ff_w1e"].shape[1]
    xf = rows.reshape(nf, cf)
    blk = _row_block(nf)
    out = pl.pallas_call(
        functools.partial(_ff_kernel, eps=LN_EPS),
        out_shape=jax.ShapeDtypeStruct((nf, cf), rows.dtype),
        grid=(nf // blk,),
        in_specs=[
            pl.BlockSpec((blk, cf), lambda i: (i, 0)),
            pl.BlockSpec((cf, cf), lambda i: (0, 0)),
            pl.BlockSpec((1, cf), lambda i: (0, 0)),
            pl.BlockSpec((1, cf), lambda i: (0, 0)),
            pl.BlockSpec((cf, hf), lambda i: (0, 0)),
            pl.BlockSpec((1, hf), lambda i: (0, 0)),
            pl.BlockSpec((hf, cf), lambda i: (0, 0)),
            pl.BlockSpec((1, cf), lambda i: (0, 0)),
        ],
        out_specs=pl.BlockSpec((blk, cf), lambda i: (i, 0)),
        compiler_params=_cp("parallel"),
    )(xf, a, p["ln2_w"], p["ln2_b"], p["ff_w1e"], p["ff_b1e"],
      p["ff_w2e"], p["ff_b2e"])
    return out.reshape(n, c)


# ----------------------------- BN-shift bias maps -----------------------------

def _conv2d_bias_map(shift, taps9, bias, mask_h, mask_w):
    # bias_map[h, w, c] = conv_bias[c] + sum over in-bounds taps of (shift @ W_tap)[c]
    v = jnp.einsum("c,tcd->td", shift, taps9).reshape(3, 3, -1)
    bm = jnp.einsum("kh,lw,klc->hwc", mask_h, mask_w, v) + bias
    h, w, c = bm.shape
    return bm.reshape(h, w * c)


def _conv1d_bias_row(shift, taps3, bias, mask_t):
    v = jnp.einsum("c,tcd->td", shift, taps3)
    br = jnp.einsum("kt,kc->tc", mask_t, v) + bias
    t, c = br.shape
    return br.reshape(1, t * c)


# ----------------------------- model glue -----------------------------

def decoupled_forward(xl, p):
    B, T, H, W, C = xl.shape
    BT, BHW = B * T, B * H * W
    Hp, Wp, Tp = H + 2, W + 2, T + 2

    # torch: x.view(B*T, C, H, W) -> raw reinterpretation of contiguous memory,
    # then channels-last + zero spatial padding (the BN shift is applied through
    # the border-aware bias map, so zero padding stays exact).
    x2 = xl.reshape(BT, C, H, W)
    x2p = jnp.pad(jnp.transpose(x2, (0, 2, 3, 1)),
                  ((0, 0), (1, 1), (1, 1), (0, 0))).astype(jnp.bfloat16)

    # BatchNorm2d (training-mode batch stats); scale folded into the conv weight,
    # shift folded into the bias map.
    mean, var = bn_channel_stats(x2p.reshape(-1, C), C, count=BT * H * W)
    scale = p["bn2d_w"] * jax.lax.rsqrt(var + BN_EPS)
    shift = p["bn2d_b"] - mean * scale
    w2 = (p["w2d_fold"] * jnp.tile(scale, 3 * Wp)[:, None]).astype(jnp.bfloat16)
    bm2 = _conv2d_bias_map(shift, p["conv2d_taps"], p["conv2d_b"],
                           p["mask_h"], p["mask_w"])                 # (H, W*C)

    # Lane-stack the 3 vertical taps so the conv2d is a single big-M matmul.
    xp3 = x2p.reshape(BT, Hp, Wp * C)
    x_stack = jnp.concatenate([xp3[:, 0:H], xp3[:, 1:H + 1], xp3[:, 2:H + 2]],
                              axis=-1).reshape(BT * H, 3 * Wp * C)
    y = conv_as_matmul(x_stack, w2, bm2,
                       row_mult=8 * H // math.gcd(8, H),
                       out_dtype=jnp.bfloat16)                        # (BT*H, W*C)

    # torch: x.view(B*H*W, C, T) of the (contiguous NCHW) conv2d output.
    y = jnp.transpose(y.reshape(BT, H, W, C), (0, 3, 1, 2)).reshape(BHW, C, T)
    zp = jnp.pad(jnp.transpose(y, (0, 2, 1)),
                 ((0, 0), (1, 1), (0, 0))).astype(jnp.bfloat16)       # (BHW, Tp, C)

    # BatchNorm1d (training-mode batch stats) fused the same way.
    mean, var = bn_channel_stats(zp.reshape(-1, C), C, count=BHW * T)
    scale = p["bn1d_w"] * jax.lax.rsqrt(var + BN_EPS)
    shift = p["bn1d_b"] - mean * scale
    w1 = (p["w1d_fold"] * jnp.tile(scale, Tp)[:, None]).astype(jnp.bfloat16)
    br1 = _conv1d_bias_row(shift, p["conv1d_taps"], p["conv1d_b"], p["mask_t"])

    o = conv_as_matmul(zp.reshape(BHW, Tp * C), w1, br1,
                       row_mult=8, out_dtype=jnp.float32)             # (BHW, T*C)

    # torch: x.view(B, T, H, W, C) of the (contiguous) conv1d output.
    o = jnp.transpose(o.reshape(BHW, T, C), (0, 2, 1))
    return o.reshape(B, T, H, W, C)


def conv_block_forward(x, p):
    B, T, H, W, C = x.shape
    N = B * T * H * W
    h = layer_norm(x.reshape(N, C), p["ln1_w"], p["ln1_b"], p["A"])
    h = decoupled_forward(h.reshape(B, T, H, W, C), p)
    # Conv-branch residual stays in XLA: it fuses with the required un-scramble
    # transpose above, so it costs no extra HBM pass.
    xr = x + h
    # FF branch residual is fused inside the ff_block kernel epilogue.
    out = ff_block(xr.reshape(N, C), p)
    return out.reshape(B, T, H, W, C)


# ----------------------------- parameters -----------------------------

def _grouped_conv_to_dense(w, groups):
    """Torch grouped-conv weight (Cout, Cin/groups, *k) -> dense block-diagonal
    per-tap matrices (ntaps, Cin, Cout)."""
    w = np.asarray(w, np.float32)
    cout, cpg = w.shape[0], w.shape[1]
    ksz = int(np.prod(w.shape[2:]))
    wf = w.reshape(cout, cpg, ksz)
    opg = cout // groups
    dense = np.zeros((ksz, cout, cout), np.float32)
    for o in range(cout):
        g = o // opg
        dense[:, g * cpg:(g + 1) * cpg, o] = wf[o].T
    return dense


def _taps_valid_mask(k, length):
    m = np.zeros((k, length), np.float32)
    for d in range(k):
        for i in range(length):
            if 0 <= i + d - k // 2 < length:
                m[d, i] = 1.0
    return m


def init_params(key, dim, heads, ff_mult):
    cpg = dim // heads
    hidden = dim * ff_mult
    ks = jax.random.split(key, 16)

    def nrm(k, shape, s=0.1):
        return s * jax.random.normal(k, shape, jnp.float32)

    return dict(
        ln1_w=1.0 + nrm(ks[2], (dim,)), ln1_b=nrm(ks[3], (dim,)),
        ln2_w=1.0 + nrm(ks[4], (dim,)), ln2_b=nrm(ks[5], (dim,)),
        bn2d_w=1.0 + nrm(ks[6], (dim,)), bn2d_b=nrm(ks[7], (dim,)),
        bn1d_w=1.0 + nrm(ks[8], (dim,)), bn1d_b=nrm(ks[9], (dim,)),
        conv2d_w=nrm(ks[0], (dim, cpg, 3, 3), 0.2), conv2d_b=nrm(ks[10], (dim,)),
        conv1d_w=nrm(ks[1], (dim, cpg, 3), 0.2), conv1d_b=nrm(ks[11], (dim,)),
        ff_w1=nrm(ks[12], (dim, hidden)), ff_b1=nrm(ks[13], (hidden,)),
        ff_w2=nrm(ks[14], (hidden, dim)), ff_b2=nrm(ks[15], (dim,)),
    )


def prepare_params(raw, heads, H, W, T):
    """Precompute (numpy, once) the tap-folded conv matrices, lane-fold expanded
    FF/LN weights and the LN averaging matrix used by the Pallas kernels."""
    C = int(raw["ln1_w"].shape[0])
    # TODO(synk): the lane-fold / block-diagonal expansion is only a win for
    # C < 128; at C >= 128 fold becomes 1 and the true weights are used.
    fold = 128 // C if 128 % C == 0 else 1
    cf = C * fold
    Wp, Tp = W + 2, T + 2

    taps2 = _grouped_conv_to_dense(raw["conv2d_w"], heads)   # (9, C, C)
    taps1 = _grouped_conv_to_dense(raw["conv1d_w"], heads)   # (3, C, C)

    # conv2d: (ky, kx, ci) -> output lanes (w, co), flattened to a single
    # (3*Wp*C, W*C) matrix matching the lane-stacked input slab.
    w2fold = np.zeros((3, Wp * C, W * C), np.float32)
    for ky in range(3):
        for wo in range(W):
            for kx in range(3):
                wi = wo + kx
                w2fold[ky, wi * C:(wi + 1) * C, wo * C:(wo + 1) * C] = taps2[ky * 3 + kx]
    w2fold = w2fold.reshape(3 * Wp * C, W * C)

    # conv1d: single matrix folding (dt, ci) -> output lanes (t, co)
    w1fold = np.zeros((Tp * C, T * C), np.float32)
    for to in range(T):
        for dt in range(3):
            ti = to + dt
            w1fold[ti * C:(ti + 1) * C, to * C:(to + 1) * C] = taps1[dt]

    # block-diagonal averaging matrix for the lane-folded LayerNorm
    A = np.zeros((cf, cf), np.float32)
    for g in range(fold):
        A[g * C:(g + 1) * C, g * C:(g + 1) * C] = 1.0 / C

    def bdiag(m):
        a, b = m.shape
        out = np.zeros((a * fold, b * fold), np.float32)
        for g in range(fold):
            out[g * a:(g + 1) * a, g * b:(g + 1) * b] = m
        return out

    def tile_row(v, reps):
        return jnp.asarray(np.tile(np.asarray(v, np.float32), reps)[None, :])

    return dict(
        A=jnp.asarray(A),
        ln1_w=tile_row(raw["ln1_w"], fold), ln1_b=tile_row(raw["ln1_b"], fold),
        ln2_w=tile_row(raw["ln2_w"], fold), ln2_b=tile_row(raw["ln2_b"], fold),
        bn2d_w=jnp.asarray(raw["bn2d_w"]), bn2d_b=jnp.asarray(raw["bn2d_b"]),
        bn1d_w=jnp.asarray(raw["bn1d_w"]), bn1d_b=jnp.asarray(raw["bn1d_b"]),
        conv2d_taps=jnp.asarray(taps2), conv2d_b=jnp.asarray(raw["conv2d_b"]),
        conv1d_taps=jnp.asarray(taps1), conv1d_b=jnp.asarray(raw["conv1d_b"]),
        w2d_fold=jnp.asarray(w2fold), w1d_fold=jnp.asarray(w1fold),
        mask_h=jnp.asarray(_taps_valid_mask(3, H)),
        mask_w=jnp.asarray(_taps_valid_mask(3, W)),
        mask_t=jnp.asarray(_taps_valid_mask(3, T)),
        ff_w1e=jnp.asarray(bdiag(np.asarray(raw["ff_w1"], np.float32)),
                           dtype=jnp.bfloat16),
        ff_b1e=tile_row(raw["ff_b1"], fold),
        ff_w2e=jnp.asarray(bdiag(np.asarray(raw["ff_w2"], np.float32)),
                           dtype=jnp.bfloat16),
        ff_b2e=tile_row(raw["ff_b2"], fold),
    )


# ----------------------------- main -----------------------------

if __name__ == "__main__":
    B, T, H, W = 2, 4, 8, 8
    dim, heads, ff_mult = 32, 16, 2

    key = jax.random.PRNGKey(0)
    kx, kp = jax.random.split(key)
    x = jax.random.normal(kx, (B, T, H, W, dim), jnp.float32)

    raw = init_params(kp, dim, heads, ff_mult)
    params = prepare_params(raw, heads, H, W, T)

    fwd = jax.jit(conv_block_forward)
    y = jax.block_until_ready(fwd(x, params))

    assert y.shape == (B, T, H, W, dim)
    assert bool(jnp.isfinite(y).all())
    print("KERNEL_OK")
</pallas_src>

<mosaic_0001>
module attributes {stable_mosaic.version = 11 : i64} {
  func.func @_ln_kernel(%arg0: i32, %arg1: memref<64x128xf32, #tpu.memory_space<vmem>>, %arg2: memref<128x128xf32, #tpu.memory_space<vmem>>, %arg3: memref<1x128xf32, #tpu.memory_space<vmem>>, %arg4: memref<1x128xf32, #tpu.memory_space<vmem>>, %arg5: memref<64x128xbf16, #tpu.memory_space<vmem>>) attributes {dimension_semantics = [#tpu.dimension_semantics<parallel>], iteration_bounds = array<i64: 2>, scalar_prefetch = 0 : i64, scratch_operands = 0 : i64, tpu.core_type = #tpu.core_type<tc>, window_params = [{transform_indices = @transform_0, window_bounds = array<i64: 64, 128>}, {pipeline_mode = #tpu.pipeline_mode<synchronous>, transform_indices = @transform_1, window_bounds = array<i64: 128, 128>}, {pipeline_mode = #tpu.pipeline_mode<synchronous>, transform_indices = @transform_2, window_bounds = array<i64: 1, 128>}, {pipeline_mode = #tpu.pipeline_mode<synchronous>, transform_indices = @transform_3, window_bounds = array<i64: 1, 128>}, {transform_indices = @transform_4, window_bounds = array<i64: 64, 128>}]} {
    %c0 = arith.constant 0 : index
    %c0_0 = arith.constant 0 : index
    %0 = vector.load %arg1[%c0, %c0_0] : memref<64x128xf32, #tpu.memory_space<vmem>>, vector<64x128xf32>
    %c0_1 = arith.constant 0 : index
    %c0_2 = arith.constant 0 : index
    %1 = vector.load %arg2[%c0_1, %c0_2] : memref<128x128xf32, #tpu.memory_space<vmem>>, vector<128x128xf32>
    %cst = arith.constant dense<0.000000e+00> : vector<64x128xf32>
    %2 = tpu.matmul %0, %1, %cst {dimension_numbers = #tpu.dot_dimension_numbers<[1], [0], [0], [1], [0, 0, 1, 1], [], []>} : vector<64x128xf32>, vector<128x128xf32>, vector<64x128xf32> -> vector<64x128xf32>
    %3 = arith.subf %0, %2 : vector<64x128xf32>
    %4 = arith.mulf %3, %3 : vector<64x128xf32>
    %cst_3 = arith.constant dense<0.000000e+00> : vector<64x128xf32>
    %5 = tpu.matmul %4, %1, %cst_3 {dimension_numbers = #tpu.dot_dimension_numbers<[1], [0], [0], [1], [0, 0, 1, 1], [], []>} : vector<64x128xf32>, vector<128x128xf32>, vector<64x128xf32> -> vector<64x128xf32>
    %cst_4 = arith.constant 9.99999974E-6 : f32
    %6 = vector.broadcast %cst_4 : f32 to vector<64x128xf32>
    %7 = arith.addf %5, %6 : vector<64x128xf32>
    %8 = math.rsqrt %7 : vector<64x128xf32>
    %9 = arith.mulf %3, %8 : vector<64x128xf32>
    %c0_5 = arith.constant 0 : index
    %c0_6 = arith.constant 0 : index
    %10 = vector.load %arg3[%c0_5, %c0_6] : memref<1x128xf32, #tpu.memory_space<vmem>>, vector<1x128xf32>
    %11 = vector.broadcast %10 : vector<1x128xf32> to vector<64x128xf32>
    %12 = arith.mulf %9, %11 : vector<64x128xf32>
    %c0_7 = arith.constant 0 : index
    %c0_8 = arith.constant 0 : index
    %13 = vector.load %arg4[%c0_7, %c0_8] : memref<1x128xf32, #tpu.memory_space<vmem>>, vector<1x128xf32>
    %14 = vector.broadcast %13 : vector<1x128xf32> to vector<64x128xf32>
    %15 = arith.addf %12, %14 : vector<64x128xf32>
    %16 = arith.truncf %15 : vector<64x128xf32> to vector<64x128xbf16>
    %c0_9 = arith.constant 0 : index
    %c0_10 = arith.constant 0 : index
    %17 = vector.load %arg5[%c0_9, %c0_10] : memref<64x128xbf16, #tpu.memory_space<vmem>>, vector<64x128xbf16>
    tpu.vector_store %arg5[%c0_9, %c0_10], %16 {strides = array<i32>} : memref<64x128xbf16, #tpu.memory_space<vmem>>, vector<64x128xbf16>,
    return
  }
  func.func @transform_0(%arg0: i32) -> (i32, i32) {
    %c0_i32 = arith.constant 0 : i32
    %c0_i32_0 = arith.constant 0 : i32
    return %arg0, %c0_i32 : i32, i32
  }
  func.func @transform_1(%arg0: i32) -> (i32, i32) {
    %c0_i32 = arith.constant 0 : i32
    %c0_i32_0 = arith.constant 0 : i32
    %c0_i32_1 = arith.constant 0 : i32
    return %c0_i32, %c0_i32_0 : i32, i32
  }
  func.func @transform_2(%arg0: i32) -> (i32, i32) {
    %c0_i32 = arith.constant 0 : i32
    %c0_i32_0 = arith.constant 0 : i32
    %c0_i32_1 = arith.constant 0 : i32
    return %c0_i32, %c0_i32_0 : i32, i32
  }
  func.func @transform_3(%arg0: i32) -> (i32, i32) {
    %c0_i32 = arith.constant 0 : i32
    %c0_i32_0 = arith.constant 0 : i32
    %c0_i32_1 = arith.constant 0 : i32
    return %c0_i32, %c0_i32_0 : i32, i32
  }
  func.func @transform_4(%arg0: i32) -> (i32, i32) {
    %c0_i32 = arith.constant 0 : i32
    %c0_i32_0 = arith.constant 0 : i32
    return %arg0, %c0_i32 : i32, i32
  }
}

module attributes {stable_mosaic.version = 11 : i64} {
  func.func @_bn_stats_kernel(%arg0: i32, %arg1: memref<40x128xbf16, #tpu.memory_space<vmem>>, %arg2: memref<1x2x128xf32, #tpu.memory_space<vmem>>) attributes {dimension_semantics = [#tpu.dimension_semantics<parallel>], iteration_bounds = array<i64: 5>, scalar_prefetch = 0 : i64, scratch_operands = 0 : i64, tpu.core_type = #tpu.core_type<tc>, window_params = [{transform_indices = @transform_0, window_bounds = array<i64: 40, 128>}, {transform_indices = @transform_1, window_bounds = array<i64: 1, 2, 128>}]} {
    %c0 = arith.constant 0 : index
    %c0_0 = arith.constant 0 : index
    %0 = vector.load %arg1[%c0, %c0_0] : memref<40x128xbf16, #tpu.memory_space<vmem>>, vector<40x128xbf16>
    %1 = arith.extf %0 : vector<40x128xbf16> to vector<40x128xf32>
    %cst = arith.constant dense<0.000000e+00> : vector<128xf32>
    %2 = vector.multi_reduction <add>, %1, %cst [0] : vector<40x128xf32> to vector<128xf32>
    %3 = vector.shape_cast %2 : vector<128xf32> to vector<1x128xf32>
    %4 = arith.mulf %1, %1 : vector<40x128xf32>
    %cst_1 = arith.constant dense<0.000000e+00> : vector<128xf32>
    %5 = vector.multi_reduction <add>, %4, %cst_1 [0] : vector<40x128xf32> to vector<128xf32>
    %6 = vector.shape_cast %5 : vector<128xf32> to vector<1x128xf32>
    %7 = tpu.concatenate %3, %6 in 0 : vector<1x128xf32>, vector<1x128xf32> -> vector<2x128xf32>
    %8 = vector.shape_cast %7 : vector<2x128xf32> to vector<1x2x128xf32>
    %c0_2 = arith.constant 0 : index
    %c0_3 = arith.constant 0 : index
    %c0_4 = arith.constant 0 : index
    %9 = vector.load %arg2[%c0_2, %c0_3, %c0_4] : memref<1x2x128xf32, #tpu.memory_space<vmem>>, vector<1x2x128xf32>
    tpu.vector_store %arg2[%c0_2, %c0_3, %c0_4], %8 {strides = array<i32>} : memref<1x2x128xf32, #tpu.memory_space<vmem>>, vector<1x2x128xf32>,
    return
  }
  func.func @transform_0(%arg0: i32) -> (i32, i32) {
    %c0_i32 = arith.constant 0 : i32
    %c0_i32_0 = arith.constant 0 : i32
    return %arg0, %c0_i32 : i32, i32
  }
  func.func @transform_1(%arg0: i32) -> (i32, i32, i32) {
    %c0_i32 = arith.constant 0 : i32
    %c0_i32_0 = arith.constant 0 : i32
    %c0_i32_1 = arith.constant 0 : i32
    return %arg0, %c0_i32, %c0_i32_0 : i32, i32, i32
  }
}

module attributes {stable_mosaic.version = 11 : i64} {
  func.func @_conv_mm_kernel(%arg0: i32, %arg1: memref<32x960xbf16, #tpu.memory_space<vmem>>, %arg2: memref<960x256xbf16, #tpu.memory_space<vmem>>, %arg3: memref<32x256xf32, #tpu.memory_space<vmem>>, %arg4: memref<32x256xbf16, #tpu.memory_space<vmem>>) attributes {dimension_semantics = [#tpu.dimension_semantics<parallel>], iteration_bounds = array<i64: 2>, scalar_prefetch = 0 : i64, scratch_operands = 0 : i64, tpu.core_type = #tpu.core_type<tc>, window_params = [{transform_indices = @transform_0, window_bounds = array<i64: 32, 960>}, {pipeline_mode = #tpu.pipeline_mode<synchronous>, transform_indices = @transform_1, window_bounds = array<i64: 960, 256>}, {pipeline_mode = #tpu.pipeline_mode<synchronous>, transform_indices = @transform_2, window_bounds = array<i64: 32, 256>}, {transform_indices = @transform_3, window_bounds = array<i64: 32, 256>}]} {
    %c0 = arith.constant 0 : index
    %c0_0 = arith.constant 0 : index
    %0 = vector.load %arg1[%c0, %c0_0] : memref<32x960xbf16, #tpu.memory_space<vmem>>, vector<32x960xbf16>
    %c0_1 = arith.constant 0 : index
    %c0_2 = arith.constant 0 : index
    %1 = vector.load %arg2[%c0_1, %c0_2] : memref<960x256xbf16, #tpu.memory_space<vmem>>, vector<960x256xbf16>
    %cst = arith.constant dense<0.000000e+00> : vector<32x256xf32>
    %2 = tpu.matmul %0, %1, %cst {dimension_numbers = #tpu.dot_dimension_numbers<[1], [0], [0], [1], [0, 0, 1, 1], [], []>} : vector<32x960xbf16>, vector<960x256xbf16>, vector<32x256xf32> -> vector<32x256xf32>
    %c0_3 = arith.constant 0 : index
    %c0_4 = arith.constant 0 : index
    %3 = vector.load %arg3[%c0_3, %c0_4] : memref<32x256xf32, #tpu.memory_space<vmem>>, vector<32x256xf32>
    %4 = arith.addf %2, %3 : vector<32x256xf32>
    %5 = arith.truncf %4 : vector<32x256xf32> to vector<32x256xbf16>
    %c0_5 = arith.constant 0 : index
    %c0_6 = arith.constant 0 : index
    %6 = vector.load %arg4[%c0_5, %c0_6] : memref<32x256xbf16, #tpu.memory_space<vmem>>, vector<32x256xbf16>
    tpu.vector_store %arg4[%c0_5, %c0_6], %5 {strides = array<i32>} : memref<32x256xbf16, #tpu.memory_space<vmem>>, vector<32x256xbf16>,
    return
  }
  func.func @transform_0(%arg0: i32) -> (i32, i32) {
    %c0_i32 = arith.constant 0 : i32
    %c0_i32_0 = arith.constant 0 : i32
    return %arg0, %c0_i32 : i32, i32
  }
  func.func @transform_1(%arg0: i32) -> (i32, i32) {
    %c0_i32 = arith.constant 0 : i32
    %c0_i32_0 = arith.constant 0 : i32
    %c0_i32_1 = arith.constant 0 : i32
    return %c0_i32, %c0_i32_0 : i32, i32
  }
  func.func @transform_2(%arg0: i32) -> (i32, i32) {
    %c0_i32 = arith.constant 0 : i32
    %c0_i32_0 = arith.constant 0 : i32
    %c0_i32_1 = arith.constant 0 : i32
    return %c0_i32, %c0_i32_0 : i32, i32
  }
  func.func @transform_3(%arg0: i32) -> (i32, i32) {
    %c0_i32 = arith.constant 0 : i32
    %c0_i32_0 = arith.constant 0 : i32
    return %arg0, %c0_i32 : i32, i32
  }
}

module attributes {stable_mosaic.version = 11 : i64} {
  func.func @_bn_stats_kernel(%arg0: i32, %arg1: memref<96x128xbf16, #tpu.memory_space<vmem>>, %arg2: memref<1x2x128xf32, #tpu.memory_space<vmem>>) attributes {dimension_semantics = [#tpu.dimension_semantics<parallel>], iteration_bounds = array<i64: 2>, scalar_prefetch = 0 : i64, scratch_operands = 0 : i64, tpu.core_type = #tpu.core_type<tc>, window_params = [{transform_indices = @transform_0, window_bounds = array<i64: 96, 128>}, {transform_indices = @transform_1, window_bounds = array<i64: 1, 2, 128>}]} {
    %c0 = arith.constant 0 : index
    %c0_0 = arith.constant 0 : index
    %0 = vector.load %arg1[%c0, %c0_0] : memref<96x128xbf16, #tpu.memory_space<vmem>>, vector<96x128xbf16>
    %1 = arith.extf %0 : vector<96x128xbf16> to vector<96x128xf32>
    %cst = arith.constant dense<0.000000e+00> : vector<128xf32>
    %2 = vector.multi_reduction <add>, %1, %cst [0] : vector<96x128xf32> to vector<128xf32>
    %3 = vector.shape_cast %2 : vector<128xf32> to vector<1x128xf32>
    %4 = arith.mulf %1, %1 : vector<96x128xf32>
    %cst_1 = arith.constant dense<0.000000e+00> : vector<128xf32>
    %5 = vector.multi_reduction <add>, %4, %cst_1 [0] : vector<96x128xf32> to vector<128xf32>
    %6 = vector.shape_cast %5 : vector<128xf32> to vector<1x128xf32>
    %7 = tpu.concatenate %3, %6 in 0 : vector<1x128xf32>, vector<1x128xf32> -> vector<2x128xf32>
    %8 = vector.shape_cast %7 : vector<2x128xf32> to vector<1x2x128xf32>
    %c0_2 = arith.constant 0 : index
    %c0_3 = arith.constant 0 : index
    %c0_4 = arith.constant 0 : index
    %9 = vector.load %arg2[%c0_2, %c0_3, %c0_4] : memref<1x2x128xf32, #tpu.memory_space<vmem>>, vector<1x2x128xf32>
    tpu.vector_store %arg2[%c0_2, %c0_3, %c0_4], %8 {strides = array<i32>} : memref<1x2x128xf32, #tpu.memory_space<vmem>>, vector<1x2x128xf32>,
    return
  }
  func.func @transform_0(%arg0: i32) -> (i32, i32) {
    %c0_i32 = arith.constant 0 : i32
    %c0_i32_0 = arith.constant 0 : i32
    return %arg0, %c0_i32 : i32, i32
  }
  func.func @transform_1(%arg0: i32) -> (i32, i32, i32) {
    %c0_i32 = arith.constant 0 : i32
    %c0_i32_0 = arith.constant 0 : i32
    %c0_i32_1 = arith.constant 0 : i32
    return %arg0, %c0_i32, %c0_i32_0 : i32, i32, i32
  }
}

module attributes {stable_mosaic.version = 11 : i64} {
  func.func @_conv_mm_kernel(%arg0: i32, %arg1: memref<64x192xbf16, #tpu.memory_space<vmem>>, %arg2: memref<192x128xbf16, #tpu.memory_space<vmem>>, %arg3: memref<1x128xf32, #tpu.memory_space<vmem>>, %arg4: memref<64x128xf32, #tpu.memory_space<vmem>>) attributes {dimension_semantics = [#tpu.dimension_semantics<parallel>], iteration_bounds = array<i64: 2>, scalar_prefetch = 0 : i64, scratch_operands = 0 : i64, tpu.core_type = #tpu.core_type<tc>, window_params = [{transform_indices = @transform_0, window_bounds = array<i64: 64, 192>}, {pipeline_mode = #tpu.pipeline_mode<synchronous>, transform_indices = @transform_1, window_bounds = array<i64: 192, 128>}, {pipeline_mode = #tpu.pipeline_mode<synchronous>, transform_indices = @transform_2, window_bounds = array<i64: 1, 128>}, {transform_indices = @transform_3, window_bounds = array<i64: 64, 128>}]} {
    %c0 = arith.constant 0 : index
    %c0_0 = arith.constant 0 : index
    %0 = vector.load %arg1[%c0, %c0_0] : memref<64x192xbf16, #tpu.memory_space<vmem>>, vector<64x192xbf16>
    %c0_1 = arith.constant 0 : index
    %c0_2 = arith.constant 0 : index
    %1 = vector.load %arg2[%c0_1, %c0_2] : memref<192x128xbf16, #tpu.memory_space<vmem>>, vector<192x128xbf16>
    %cst = arith.constant dense<0.000000e+00> : vector<64x128xf32>
    %2 = tpu.matmul %0, %1, %cst {dimension_numbers = #tpu.dot_dimension_numbers<[1], [0], [0], [1], [0, 0, 1, 1], [], []>} : vector<64x192xbf16>, vector<192x128xbf16>, vector<64x128xf32> -> vector<64x128xf32>
    %c0_3 = arith.constant 0 : index
    %c0_4 = arith.constant 0 : index
    %3 = vector.load %arg3[%c0_3, %c0_4] : memref<1x128xf32, #tpu.memory_space<vmem>>, vector<1x128xf32>
    %4 = vector.broadcast %3 : vector<1x128xf32> to vector<64x128xf32>
    %5 = arith.addf %2, %4 : vector<64x128xf32>
    %c0_5 = arith.constant 0 : index
    %c0_6 = arith.constant 0 : index
    %6 = vector.load %arg4[%c0_5, %c0_6] : memref<64x128xf32, #tpu.memory_space<vmem>>, vector<64x128xf32>
    tpu.vector_store %arg4[%c0_5, %c0_6], %5 {strides = array<i32>} : memref<64x128xf32, #tpu.memory_space<vmem>>, vector<64x128xf32>,
    return
  }
  func.func @transform_0(%arg0: i32) -> (i32, i32) {
    %c0_i32 = arith.constant 0 : i32
    %c0_i32_0 = arith.constant 0 : i32
    return %arg0, %c0_i32 : i32, i32
  }
  func.func @transform_1(%arg0: i32) -> (i32, i32) {
    %c0_i32 = arith.constant 0 : i32
    %c0_i32_0 = arith.constant 0 : i32
    %c0_i32_1 = arith.constant 0 : i32
    return %c0_i32, %c0_i32_0 : i32, i32
  }
  func.func @transform_2(%arg0: i32) -> (i32, i32) {
    %c0_i32 = arith.constant 0 : i32
    %c0_i32_0 = arith.constant 0 : i32
    %c0_i32_1 = arith.constant 0 : i32
    return %c0_i32, %c0_i32_0 : i32, i32
  }
  func.func @transform_3(%arg0: i32) -> (i32, i32) {
    %c0_i32 = arith.constant 0 : i32
    %c0_i32_0 = arith.constant 0 : i32
    return %arg0, %c0_i32 : i32, i32
  }
}

module attributes {stable_mosaic.version = 11 : i64} {
  func.func @_ff_kernel(%arg0: i32, %arg1: memref<64x128xf32, #tpu.memory_space<vmem>>, %arg2: memref<128x128xf32, #tpu.memory_space<vmem>>, %arg3: memref<1x128xf32, #tpu.memory_space<vmem>>, %arg4: memref<1x128xf32, #tpu.memory_space<vmem>>, %arg5: memref<128x256xbf16, #tpu.memory_space<vmem>>, %arg6: memref<1x256xf32, #tpu.memory_space<vmem>>, %arg7: memref<256x128xbf16, #tpu.memory_space<vmem>>, %arg8: memref<1x128xf32, #tpu.memory_space<vmem>>, %arg9: memref<64x128xf32, #tpu.memory_space<vmem>>) attributes {dimension_semantics = [#tpu.dimension_semantics<parallel>], iteration_bounds = array<i64: 2>, scalar_prefetch = 0 : i64, scratch_operands = 0 : i64, tpu.core_type = #tpu.core_type<tc>, window_params = [{transform_indices = @transform_0, window_bounds = array<i64: 64, 128>}, {pipeline_mode = #tpu.pipeline_mode<synchronous>, transform_indices = @transform_1, window_bounds = array<i64: 128, 128>}, {pipeline_mode = #tpu.pipeline_mode<synchronous>, transform_indices = @transform_2, window_bounds = array<i64: 1, 128>}, {pipeline_mode = #tpu.pipeline_mode<synchronous>, transform_indices = @transform_3, window_bounds = array<i64: 1, 128>}, {pipeline_mode = #tpu.pipeline_mode<synchronous>, transform_indices = @transform_4, window_bounds = array<i64: 128, 256>}, {pipeline_mode = #tpu.pipeline_mode<synchronous>, transform_indices = @transform_5, window_bounds = array<i64: 1, 256>}, {pipeline_mode = #tpu.pipeline_mode<synchronous>, transform_indices = @transform_6, window_bounds = array<i64: 256, 128>}, {pipeline_mode = #tpu.pipeline_mode<synchronous>, transform_indices = @transform_7, window_bounds = array<i64: 1, 128>}, {transform_indices = @transform_8, window_bounds = array<i64: 64, 128>}]} {
    %c0 = arith.constant 0 : index
    %c0_0 = arith.constant 0 : index
    %0 = vector.load %arg1[%c0, %c0_0] : memref<64x128xf32, #tpu.memory_space<vmem>>, vector<64x128xf32>
    %c0_1 = arith.constant 0 : index
    %c0_2 = arith.constant 0 : index
    %1 = vector.load %arg2[%c0_1, %c0_2] : memref<128x128xf32, #tpu.memory_space<vmem>>, vector<128x128xf32>
    %cst = arith.constant dense<0.000000e+00> : vector<64x128xf32>
    %2 = tpu.matmul %0, %1, %cst {dimension_numbers = #tpu.dot_dimension_numbers<[1], [0], [0], [1], [0, 0, 1, 1], [], []>} : vector<64x128xf32>, vector<128x128xf32>, vector<64x128xf32> -> vector<64x128xf32>
    %3 = arith.subf %0, %2 : vector<64x128xf32>
    %4 = arith.mulf %3, %3 : vector<64x128xf32>
    %cst_3 = arith.constant dense<0.000000e+00> : vector<64x128xf32>
    %5 = tpu.matmul %4, %1, %cst_3 {dimension_numbers = #tpu.dot_dimension_numbers<[1], [0], [0], [1], [0, 0, 1, 1], [], []>} : vector<64x128xf32>, vector<128x128xf32>, vector<64x128xf32> -> vector<64x128xf32>
    %cst_4 = arith.constant 9.99999974E-6 : f32
    %6 = vector.broadcast %cst_4 : f32 to vector<64x128xf32>
    %7 = arith.addf %5, %6 : vector<64x128xf32>
    %8 = math.rsqrt %7 : vector<64x128xf32>
    %9 = arith.mulf %3, %8 : vector<64x128xf32>
    %c0_5 = arith.constant 0 : index
    %c0_6 = arith.constant 0 : index
    %10 = vector.load %arg3[%c0_5, %c0_6] : memref<1x128xf32, #tpu.memory_space<vmem>>, vector<1x128xf32>
    %11 = vector.broadcast %10 : vector<1x128xf32> to vector<64x128xf32>
    %12 = arith.mulf %9, %11 : vector<64x128xf32>
    %c0_7 = arith.constant 0 : index
    %c0_8 = arith.constant 0 : index
    %13 = vector.load %arg4[%c0_7, %c0_8] : memref<1x128xf32, #tpu.memory_space<vmem>>, vector<1x128xf32>
    %14 = vector.broadcast %13 : vector<1x128xf32> to vector<64x128xf32>
    %15 = arith.addf %12, %14 : vector<64x128xf32>
    %16 = arith.truncf %15 : vector<64x128xf32> to vector<64x128xbf16>
    %c0_9 = arith.constant 0 : index
    %c0_10 = arith.constant 0 : index
    %17 = vector.load %arg5[%c0_9, %c0_10] : memref<128x256xbf16, #tpu.memory_space<vmem>>, vector<128x256xbf16>
    %cst_11 = arith.constant dense<0.000000e+00> : vector<64x256xf32>
    %18 = tpu.matmul %16, %17, %cst_11 {dimension_numbers = #tpu.dot_dimension_numbers<[1], [0], [0], [1], [0, 0, 1, 1], [], []>} : vector<64x128xbf16>, vector<128x256xbf16>, vector<64x256xf32> -> vector<64x256xf32>
    %c0_12 = arith.constant 0 : index
    %c0_13 = arith.constant 0 : index
    %19 = vector.load %arg6[%c0_12, %c0_13] : memref<1x256xf32, #tpu.memory_space<vmem>>, vector<1x256xf32>
    %20 = vector.broadcast %19 : vector<1x256xf32> to vector<64x256xf32>
    %21 = arith.addf %18, %20 : vector<64x256xf32>
    %cst_14 = arith.constant 0.707106769 : f32
    %22 = vector.broadcast %cst_14 : f32 to vector<64x256xf32>
    %23 = arith.mulf %21, %22 : vector<64x256xf32>
    %24 = math.absf %23 : vector<64x256xf32>
    %cst_15 = arith.constant 0.327591091 : f32
    %25 = vector.broadcast %cst_15 : f32 to vector<64x256xf32>
    %26 = arith.mulf %25, %24 : vector<64x256xf32>
    %cst_16 = arith.constant 1.000000e+00 : f32
    %27 = vector.broadcast %cst_16 : f32 to vector<64x256xf32>
    %28 = arith.addf %27, %26 : vector<64x256xf32>
    %29 = tpu.reciprocal %28 {approx = true} : vector<64x256xf32> -> vector<64x256xf32>
    %cst_17 = arith.constant 1.06140542 : f32
    %30 = vector.broadcast %cst_17 : f32 to vector<64x256xf32>
    %31 = arith.mulf %30, %29 : vector<64x256xf32>
    %cst_18 = arith.constant -1.45315206 : f32
    %32 = vector.broadcast %cst_18 : f32 to vector<64x256xf32>
    %33 = arith.addf %31, %32 : vector<64x256xf32>
    %34 = arith.mulf %33, %29 : vector<64x256xf32>
    %cst_19 = arith.constant 1.42141378 : f32
    %35 = vector.broadcast %cst_19 : f32 to vector<64x256xf32>
    %36 = arith.addf %34, %35 : vector<64x256xf32>
    %37 = arith.mulf %36, %29 : vector<64x256xf32>
    %cst_20 = arith.constant -0.284496725 : f32
    %38 = vector.broadcast %cst_20 : f32 to vector<64x256xf32>
    %39 = arith.addf %37, %38 : vector<64x256xf32>
    %40 = arith.mulf %39, %29 : vector<64x256xf32>
    %cst_21 = arith.constant 0.254829586 : f32
    %41 = vector.broadcast %cst_21 : f32 to vector<64x256xf32>
    %42 = arith.addf %40, %41 : vector<64x256xf32>
    %43 = arith.mulf %42, %29 : vector<64x256xf32>
    %cst_22 = arith.constant 0.000000e+00 : f32
    %44 = vector.broadcast %cst_22 : f32 to vector<64x256xf32>
    %45 = arith.subf %44, %24 : vector<64x256xf32>
    %46 = arith.mulf %45, %24 : vector<64x256xf32>
    %47 = math.exp %46 : vector<64x256xf32>
    %48 = arith.mulf %43, %47 : vector<64x256xf32>
    %cst_23 = arith.constant 1.000000e+00 : f32
    %49 = vector.broadcast %cst_23 : f32 to vector<64x256xf32>
    %50 = arith.subf %49, %48 : vector<64x256xf32>
    %cst_24 = arith.constant 0.000000e+00 : f32
    %51 = vector.broadcast %cst_24 : f32 to vector<64x256xf32>
    %52 = arith.cmpf oge, %23, %51 : vector<64x256xf32>
    %cst_25 = arith.constant 0.000000e+00 : f32
    %53 = vector.broadcast %cst_25 : f32 to vector<64x256xf32>
    %54 = arith.subf %53, %50 : vector<64x256xf32>
    %55 = arith.select %52, %50, %54 : vector<64x256xi1>, vector<64x256xf32>
    %cst_26 = arith.constant 5.000000e-01 : f32
    %56 = vector.broadcast %cst_26 : f32 to vector<64x256xf32>
    %57 = arith.mulf %56, %21 : vector<64x256xf32>
    %cst_27 = arith.constant 1.000000e+00 : f32
    %58 = vector.broadcast %cst_27 : f32 to vector<64x256xf32>
    %59 = arith.addf %58, %55 : vector<64x256xf32>
    %60 = arith.mulf %57, %59 : vector<64x256xf32>
    %61 = arith.truncf %60 : vector<64x256xf32> to vector<64x256xbf16>
    %c0_28 = arith.constant 0 : index
    %c0_29 = arith.constant 0 : index
    %62 = vector.load %arg7[%c0_28, %c0_29] : memref<256x128xbf16, #tpu.memory_space<vmem>>, vector<256x128xbf16>
    %cst_30 = arith.constant dense<0.000000e+00> : vector<64x128xf32>
    %63 = tpu.matmul %61, %62, %cst_30 {dimension_numbers = #tpu.dot_dimension_numbers<[1], [0], [0], [1], [0, 0, 1, 1], [], []>} : vector<64x256xbf16>, vector<256x128xbf16>, vector<64x128xf32> -> vector<64x128xf32>
    %c0_31 = arith.constant 0 : index
    %c0_32 = arith.constant 0 : index
    %64 = vector.load %arg8[%c0_31, %c0_32] : memref<1x128xf32, #tpu.memory_space<vmem>>, vector<1x128xf32>
    %65 = vector.broadcast %64 : vector<1x128xf32> to vector<64x128xf32>
    %66 = arith.addf %63, %65 : vector<64x128xf32>
    %cst_33 = arith.constant 0.707106769 : f32
    %67 = vector.broadcast %cst_33 : f32 to vector<64x128xf32>
    %68 = arith.mulf %66, %67 : vector<64x128xf32>
    %69 = math.absf %68 : vector<64x128xf32>
    %cst_34 = arith.constant 0.327591091 : f32
    %70 = vector.broadcast %cst_34 : f32 to vector<64x128xf32>
    %71 = arith.mulf %70, %69 : vector<64x128xf32>
    %cst_35 = arith.constant 1.000000e+00 : f32
    %72 = vector.broadcast %cst_35 : f32 to vector<64x128xf32>
    %73 = arith.addf %72, %71 : vector<64x128xf32>
    %74 = tpu.reciprocal %73 {approx = true} : vector<64x128xf32> -> vector<64x128xf32>
    %cst_36 = arith.constant 1.06140542 : f32
    %75 = vector.broadcast %cst_36 : f32 to vector<64x128xf32>
    %76 = arith.mulf %75, %74 : vector<64x128xf32>
    %cst_37 = arith.constant -1.45315206 : f32
    %77 = vector.broadcast %cst_37 : f32 to vector<64x128xf32>
    %78 = arith.addf %76, %77 : vector<64x128xf32>
    %79 = arith.mulf %78, %74 : vector<64x128xf32>
    %cst_38 = arith.constant 1.42141378 : f32
    %80 = vector.broadcast %cst_38 : f32 to vector<64x128xf32>
    %81 = arith.addf %79, %80 : vector<64x128xf32>
    %82 = arith.mulf %81, %74 : vector<64x128xf32>
    %cst_39 = arith.constant -0.284496725 : f32
    %83 = vector.broadcast %cst_39 : f32 to vector<64x128xf32>
    %84 = arith.addf %82, %83 : vector<64x128xf32>
    %85 = arith.mulf %84, %74 : vector<64x128xf32>
    %cst_40 = arith.constant 0.254829586 : f32
    %86 = vector.broadcast %cst_40 : f32 to vector<64x128xf32>
    %87 = arith.addf %85, %86 : vector<64x128xf32>
    %88 = arith.mulf %87, %74 : vector<64x128xf32>
    %cst_41 = arith.constant 0.000000e+00 : f32
    %89 = vector.broadcast %cst_41 : f32 to vector<64x128xf32>
    %90 = arith.subf %89, %69 : vector<64x128xf32>
    %91 = arith.mulf %90, %69 : vector<64x128xf32>
    %92 = math.exp %91 : vector<64x128xf32>
    %93 = arith.mulf %88, %92 : vector<64x128xf32>
    %cst_42 = arith.constant 1.000000e+00 : f32
    %94 = vector.broadcast %cst_42 : f32 to vector<64x128xf32>
    %95 = arith.subf %94, %93 : vector<64x128xf32>
    %cst_43 = arith.constant 0.000000e+00 : f32
    %96 = vector.broadcast %cst_43 : f32 to vector<64x128xf32>
    %97 = arith.cmpf oge, %68, %96 : vector<64x128xf32>
    %cst_44 = arith.constant 0.000000e+00 : f32
    %98 = vector.broadcast %cst_44 : f32 to vector<64x128xf32>
    %99 = arith.subf %98, %95 : vector<64x128xf32>
    %100 = arith.select %97, %95, %99 : vector<64x128xi1>, vector<64x128xf32>
    %cst_45 = arith.constant 5.000000e-01 : f32
    %101 = vector.broadcast %cst_45 : f32 to vector<64x128xf32>
    %102 = arith.mulf %101, %66 : vector<64x128xf32>
    %cst_46 = arith.constant 1.000000e+00 : f32
    %103 = vector.broadcast %cst_46 : f32 to vector<64x128xf32>
    %104 = arith.addf %103, %100 : vector<64x128xf32>
    %105 = arith.mulf %102, %104 : vector<64x128xf32>
    %106 = arith.addf %0, %105 : vector<64x128xf32>
    %c0_47 = arith.constant 0 : index
    %c0_48 = arith.constant 0 : index
    %107 = vector.load %arg9[%c0_47, %c0_48] : memref<64x128xf32, #tpu.memory_space<vmem>>, vector<64x128xf32>
    tpu.vector_store %arg9[%c0_47, %c0_48], %106 {strides = array<i32>} : memref<64x128xf32, #tpu.memory_space<vmem>>, vector<64x128xf32>,
    return
  }
  func.func @transform_0(%arg0: i32) -> (i32, i32) {
    %c0_i32 = arith.constant 0 : i32
    %c0_i32_0 = arith.constant 0 : i32
    return %arg0, %c0_i32 : i32, i32
  }
  func.func @transform_1(%arg0: i32) -> (i32, i32) {
    %c0_i32 = arith.constant 0 : i32
    %c0_i32_0 = arith.constant 0 : i32
    %c0_i32_1 = arith.constant 0 : i32
    return %c0_i32, %c0_i32_0 : i32, i32
  }
  func.func @transform_2(%arg0: i32) -> (i32, i32) {
    %c0_i32 = arith.constant 0 : i32
    %c0_i32_0 = arith.constant 0 : i32
    %c0_i32_1 = arith.constant 0 : i32
    return %c0_i32, %c0_i32_0 : i32, i32
  }
  func.func @transform_3(%arg0: i32) -> (i32, i32) {
    %c0_i32 = arith.constant 0 : i32
    %c0_i32_0 = arith.constant 0 : i32
    %c0_i32_1 = arith.constant 0 : i32
    return %c0_i32, %c0_i32_0 : i32, i32
  }
  func.func @transform_4(%arg0: i32) -> (i32, i32) {
    %c0_i32 = arith.constant 0 : i32
    %c0_i32_0 = arith.constant 0 : i32
    %c0_i32_1 = arith.constant 0 : i32
    return %c0_i32, %c0_i32_0 : i32, i32
  }
  func.func @transform_5(%arg0: i32) -> (i32, i32) {
    %c0_i32 = arith.constant 0 : i32
    %c0_i32_0 = arith.constant 0 : i32
    %c0_i32_1 = arith.constant 0 : i32
    return %c0_i32, %c0_i32_0 : i32, i32
  }
  func.func @transform_6(%arg0: i32) -> (i32, i32) {
    %c0_i32 = arith.constant 0 : i32
    %c0_i32_0 = arith.constant 0 : i32
    %c0_i32_1 = arith.constant 0 : i32
    return %c0_i32, %c0_i32_0 : i32, i32
  }
  func.func @transform_7(%arg0: i32) -> (i32, i32) {
    %c0_i32 = arith.constant 0 : i32
    %c0_i32_0 = arith.constant 0 : i32
    %c0_i32_1 = arith.constant 0 : i32
    return %c0_i32, %c0_i32_0 : i32, i32
  }
  func.func @transform_8(%arg0: i32) -> (i32, i32) {
    %c0_i32 = arith.constant 0 : i32
    %c0_i32_0 = arith.constant 0 : i32
    return %arg0, %c0_i32 : i32, i32
  }
}

</mosaic_0001>

<bundles_post_ra>
// kernel: conv_block_forward.6
= control target key start
LH: loop header
LB: loop body
LE: loop exit
PB: predicated region body
PF: predicated region fallthrough
CT: control target
= control target key end

     0   :  { %9 = vsyncpa [#allocation3], 0  ;;  %s1002_s0 = inlined_call_operand.vmem [shape: f32[128,128], index: 0, kind: input, shape index: {}]   ;;  %s1003_s1 = inlined_call_operand.hbm [shape: f32[128,128], index: 1, kind: input, shape index: {}]   ;;  %s1004_s2 = inlined_call_operand.hbm [shape: f32[1,128], index: 2, kind: input, shape index: {}]   ;;  %s1005_s3 = inlined_call_operand.hbm [shape: f32[1,128], index: 3, kind: input, shape index: {}]   ;;  %s1006_s4 = inlined_call_operand.vmem [shape: bf16[128,128], index: 4, kind: output, shape index: {}]  }
   0x1   :  { %10 = vsyncpa [#allocation5], 0  ;;  %s851_s15 = smov 0  }
   0x2 LB: > { %s162_s18 = sshll.u32 %s1004_s2, 4  ;;  %s584_s19 = sadd.s32 4294967295, %s819_s15   ;;  %s819_s15 = sphi %s851_s15, %s16_s15   ;;  %s163_s18 = int_to_ptr.hbm [resolvable:$true] %s162_s18 }
   0x3   : > { %p586_p0 = scmp.ge.s32.totalorder %s819_s15, 1  ;;  %p136_p1 = scmp.lt.s32.totalorder %s819_s15, 3 }
   0x4   : > { %p864_p2 = scmp.eq.s32.totalorder %s584_s19, 0  ;;  %s821_s22 = smov [#allocation4]  }
   0x5   : > { %p868_p3 = pnand %p586_p0, %p136_p1  ;;  %s164_s23 = sshll.u32 %s821_s22, 4  ;;  %s165_s23 = int_to_ptr.vmem [resolvable:$true] %s164_s23 }
   0x6   : > { %s147_s26 = sshll.u32 %s1003_s1, 4  ;;  %s822_s27 = smov [#allocation2]   ;;  %s148_s26 = int_to_ptr.hbm [resolvable:$true] %s147_s26 }
   0x7   : > { %p668_p4 = pneg %p868_p3  ;;  %s149_s28 = sshll.u32 %s822_s27, 4  ;;  %s150_s28 = int_to_ptr.vmem [resolvable:$true] %s149_s28 }
   0x8   : > { %s174_s5 = sshll.u32 %s1005_s3, 4  ;;  %s823_s6 = smov 128   ;;  %s175_s5 = int_to_ptr.hbm [resolvable:$true] %s174_s5 }
   0x9   : > { %p669_p5 = pnand %p864_p2, %p668_p4  ;;  %s824_s7 = smov 8  }
   0xa   : > { %s825_s8 = smov [#allocation6]   ;;  %198 = sbr.rel (%p868_p3) target bundleno = 371 (0x173), region = 36 }
   0xb   : > { %674 = dma.hbm_to_vmem [thread:$0]  (!%p669_p5), %s163_s18, 16, %s165_s23, [#allocation5]  }
   0xc   : > { %671 = dma.hbm_to_vmem [thread:$0]  (!%p669_p5), %s148_s26, 2048, %s150_s28, [#allocation3], %s823_s6, %s823_s6, %s824_s7  }
   0xd   : > { %s176_s9 = sshll.u32 %s825_s8, 4  ;;  %s177_s9 = int_to_ptr.vmem [resolvable:$true] %s176_s9 }
   0xe   : > { %677 = dma.hbm_to_vmem [thread:$0]  (!%p669_p5), %s175_s5, 16, %s177_s9, [#allocation5]  }
   0xf   : > { %810 = dma.done.wait (%p864_p2), [#allocation3], 2048  }
  0x10   : > { %812 = vsyncadd (%p864_p2), [#allocation3], 4294965248 }
  0x11   : > { %814 = dma.done.wait (%p864_p2), [#allocation5], 32  }
  0x12   : > { %816 = vsyncadd (%p864_p2), [#allocation5], 4294967264  ;;  %v270_v0 = vld [vmem:[#allocation2 + $0x78] sm:$0xff]  ;;  %v269_v1 = vld [vmem:[#allocation2 + $0x70] sm:$0xff]  ;;  %s595_s10 = sshll.u32 %s584_s19, 3 }
  0x13   : > { %271 = vmatpush.msra.mxu0 %v270_v0  ;;  %624 = vmatpush.msra.mxu2 %v270_v0  ;;  %v268_v2 = vld [vmem:[#allocation2 + $0x68] sm:$0xff]  ;;  %v267_v3 = vld [vmem:[#allocation2 + $0x60] sm:$0xff]  ;;  %v266_v4 = vld [vmem:[#allocation2 + $0x58] sm:$0xff]  ;;  %p236_p6 = scmp.lt.s32.totalorder %s595_s10, 15 }
  0x14   : > { %328 = vmatpush.msra.mxu1 %v270_v0  ;;  %640 = vmatpush.msra.mxu3 %v270_v0  ;;  %v265_v5 = vld [vmem:[#allocation2 + $0x50] sm:$0xff]  ;;  %v264_v6 = vld [vmem:[#allocation2 + $0x48] sm:$0xff]  ;;  %v263_v7 = vld [vmem:[#allocation2 + $0x40] sm:$0xff] }
  0x15   : > { %272 = vmatpush.msra.mxu0 %v269_v1  ;;  %625 = vmatpush.msra.mxu2 %v269_v1  ;;  %v262_v8 = vld [vmem:[#allocation2 + $0x38] sm:$0xff]  ;;  %v261_v9 = vld [vmem:[#allocation2 + $0x30] sm:$0xff]  ;;  %v260_v10 = vld [vmem:[#allocation2 + $0x28] sm:$0xff]  ;;  %s1010_s10 = smov (!%p236_p6, %s595_s10), 15 }
  0x16   : > { %329 = vmatpush.msra.mxu1 %v269_v1  ;;  %641 = vmatpush.msra.mxu3 %v269_v1  ;;  %v259_v11 = vld [vmem:[#allocation2 + $0x20] sm:$0xff]  ;;  %v258_v12 = vld [vmem:[#allocation2 + $0x18] sm:$0xff]  ;;  %s596_s11 = sshll.u32 %s1010_s10, 3  ;;  %v257_v13 = vld [vmem:[#allocation2 + $0x10] sm:$0xff]  ;;  %s598_s16 = sshll.u32 %s1010_s10, 2 }
  0x17   : > { %273 = vmatpush.msra.mxu0 %v268_v2  ;;  %626 = vmatpush.msra.mxu2 %v268_v2  ;;  %v256_v14 = vld [vmem:[#allocation2 + $0x8] sm:$0xff]  ;;  %s239_s14 = scalar_lea.vmem %s1002_s0, %s596_s11  ;;  %v255_v15 = vld [vmem:[#allocation2] sm:$0xff]  ;;  %s966_s19 = scalar_lea.vmem %s1006_s4, %s598_s16 }
  0x18   : > { %330 = vmatpush.msra.mxu1 %v268_v2  ;;  %642 = vmatpush.msra.mxu3 %v268_v2  ;;  %v247_v16 = vld [vmem:[%s239_s14] sm:$0xff]  ;;  %v248_v18 = vld [vmem:[%s239_s14 + $0x8] sm:$0xff]  ;;  %v249_v20 = vld [vmem:[%s239_s14 + $0x10] sm:$0xff] }
  0x19   : > { %274 = vmatpush.msra.mxu0 %v267_v3  ;;  %627 = vmatpush.msra.mxu2 %v267_v3  ;;  %v251_v17 = vld [vmem:[%s239_s14 + $0x20] sm:$0xff]  ;;  %v252_v19 = vld [vmem:[%s239_s14 + $0x28] sm:$0xff]  ;;  %v253_v21 = vld [vmem:[%s239_s14 + $0x30] sm:$0xff] }
  0x1a   : > { %331 = vmatpush.msra.mxu1 %v267_v3  ;;  %643 = vmatpush.msra.mxu3 %v267_v3  ;;  %v250_v22 = vld [vmem:[%s239_s14 + $0x18] sm:$0xff] }
  0x1b   : > { %275 = vmatpush.msra.mxu0 %v266_v4  ;;  %628 = vmatpush.msra.mxu2 %v266_v4  ;;  %v254_v23 = vld [vmem:[%s239_s14 + $0x38] sm:$0xff] }
  0x1c   : > { %332 = vmatpush.msra.mxu1 %v266_v4  ;;  %644 = vmatpush.msra.mxu3 %v266_v4 }
  0x1d   : > { %276 = vmatpush.msra.mxu0 %v265_v5  ;;  %629 = vmatpush.msra.mxu2 %v265_v5 }
  0x1e   : > { %333 = vmatpush.msra.mxu1 %v265_v5  ;;  %645 = vmatpush.msra.mxu3 %v265_v5 }
  0x1f   : > { %277 = vmatpush.msra.mxu0 %v264_v6  ;;  %630 = vmatpush.msra.mxu2 %v264_v6 }
  0x20   : > { %334 = vmatpush.msra.mxu1 %v264_v6  ;;  %646 = vmatpush.msra.mxu3 %v264_v6 }
  0x21   : > { %278 = vmatpush.msra.mxu0 %v263_v7  ;;  %631 = vmatpush.msra.mxu2 %v263_v7 }
  0x22   : > { %335 = vmatpush.msra.mxu1 %v263_v7  ;;  %647 = vmatpush.msra.mxu3 %v263_v7 }
  0x23   : > { %279 = vmatpush.msra.mxu0 %v262_v8  ;;  %632 = vmatpush.msra.mxu2 %v262_v8 }
  0x24   : > { %336 = vmatpush.msra.mxu1 %v262_v8  ;;  %648 = vmatpush.msra.mxu3 %v262_v8 }
  0x25   : > { %280 = vmatpush.msra.mxu0 %v261_v9  ;;  %633 = vmatpush.msra.mxu2 %v261_v9 }
  0x26   : > { %337 = vmatpush.msra.mxu1 %v261_v9  ;;  %649 = vmatpush.msra.mxu3 %v261_v9 }
  0x27   : > { %281 = vmatpush.msra.mxu0 %v260_v10  ;;  %634 = vmatpush.msra.mxu2 %v260_v10 }
  0x28   : > { %338 = vmatpush.msra.mxu1 %v260_v10  ;;  %650 = vmatpush.msra.mxu3 %v260_v10 }
  0x29   : > { %282 = vmatpush.msra.mxu0 %v259_v11  ;;  %635 = vmatpush.msra.mxu2 %v259_v11 }
  0x2a   : > { %339 = vmatpush.msra.mxu1 %v259_v11  ;;  %651 = vmatpush.msra.mxu3 %v259_v11 }
  0x2b   : > { %283 = vmatpush.msra.mxu0 %v258_v12  ;;  %636 = vmatpush.msra.mxu2 %v258_v12 }
  0x2c   : > { %340 = vmatpush.msra.mxu1 %v258_v12  ;;  %652 = vmatpush.msra.mxu3 %v258_v12  ;;  %v941_v12 = vld [vmem:[#allocation4] ss:$0 sm:$0xff] }
  0x2d   : > { %284 = vmatpush.msra.mxu0 %v257_v13  ;;  %637 = vmatpush.msra.mxu2 %v257_v13 }
  0x2e   : > { %341 = vmatpush.msra.mxu1 %v257_v13  ;;  %653 = vmatpush.msra.mxu3 %v257_v13 }
  0x2f   : > { %285 = vmatpush.msra.mxu0 %v256_v14  ;;  %638 = vmatpush.msra.mxu2 %v256_v14 }
  0x30   : > { %342 = vmatpush.msra.mxu1 %v256_v14  ;;  %654 = vmatpush.msra.mxu3 %v256_v14 }
  0x31   : > { %286 = vmatpush.msra.mxu0 %v255_v15  ;;  %639 = vmatpush.msra.mxu2 %v255_v15 }
  0x32   : > { %287 = vmatmul.f32.vlgmr.msra.gmra.mxu0 %v247_v16  ;;  %299 = vmatmul.f32.vlgmr.msra.gmra.mxu2 %v251_v17 }
  0x33   : > { %343 = vmatpush.msra.mxu1 %v255_v15  ;;  %655 = vmatpush.msra.mxu3 %v255_v15 }
  0x3a   : > { %290 = vmatmul.f32.gmra.mxu0 %v248_v18  ;;  %302 = vmatmul.f32.gmra.mxu2 %v252_v19 }
  0x42   : > { %293 = vmatmul.f32.gmra.mxu0 %v249_v20  ;;  %305 = vmatmul.f32.gmra.mxu2 %v253_v21 }
  0x4a   : > { %296 = vmatmul.f32.gmra.mxu0 %v250_v22  ;;  %308 = vmatmul.f32.gmra.mxu2 %v254_v23 }
  0xaf   : > { %v288_v24 = vpop.f32.mrf.mxu0 }
  0xb0   : > { %v900_v25 = vsub.f32 %v247_v16, %v288_v24 }
  0xb2   : > { %v320_v26 = vmul.f32 %v900_v25, %v900_v25 }
  0xb4   : > { %344 = vmatmul.f32.vlgmr.msra.gmra.mxu1 %v320_v26 }
  0xb5   : > { %v300_v27 = vpop.f32.mrf.mxu2 }
  0xb6   : > { %v904_v28 = vsub.f32 %v251_v17, %v300_v27 }
  0xb7   : > { %v291_v29 = vpop.f32.mrf.mxu0 }
  0xb8   : > { %v906_v30 = vsub.f32 %v248_v18, %v291_v29  ;;  %v324_v31 = vmul.f32 %v904_v28, %v904_v28 }
  0xba   : > { %356 = vmatmul.f32.vlgmr.msra.gmra.mxu3 %v324_v31  ;;  %v321_v32 = vmul.f32 %v906_v30, %v906_v30 }
  0xbc   : > { %347 = vmatmul.f32.gmra.mxu1 %v321_v32 }
  0xbd   : > { %v303_v33 = vpop.f32.mrf.mxu2 }
  0xbe   : > { %v912_v34 = vsub.f32 %v252_v19, %v303_v33 }
  0xbf   : > { %v294_v35 = vpop.f32.mrf.mxu0 }
  0xc0   : > { %v914_v36 = vsub.f32 %v249_v20, %v294_v35  ;;  %v325_v37 = vmul.f32 %v912_v34, %v912_v34 }
  0xc2   : > { %359 = vmatmul.f32.gmra.mxu3 %v325_v37  ;;  %v322_v38 = vmul.f32 %v914_v36, %v914_v36 }
  0xc4   : > { %350 = vmatmul.f32.gmra.mxu1 %v322_v38 }
  0xc5   : > { %v306_v39 = vpop.f32.mrf.mxu2 }
  0xc6   : > { %v920_v40 = vsub.f32 %v253_v21, %v306_v39 }
  0xc7   : > { %v297_v41 = vpop.f32.mrf.mxu0 }
  0xc8   : > { %v922_v42 = vsub.f32 %v250_v22, %v297_v41  ;;  %v326_v43 = vmul.f32 %v920_v40, %v920_v40 }
  0xca   : > { %362 = vmatmul.f32.gmra.mxu3 %v326_v43  ;;  %v323_v44 = vmul.f32 %v922_v42, %v922_v42 }
  0xcc   : > { %353 = vmatmul.f32.gmra.mxu1 %v323_v44 }
  0xcd   : > { %v309_v45 = vpop.f32.mrf.mxu2 }
  0xce   : > { %v928_v46 = vsub.f32 %v254_v23, %v309_v45  ;;  %v950_v23 = vld [vmem:[#allocation6] ss:$0 sm:$0xff] }
  0xd0   : > { %v327_v47 = vmul.f32 %v928_v46, %v928_v46 }
  0xd2   : > { %365 = vmatmul.f32.gmra.mxu3 %v327_v47 }
 0x131   : > { %v345_v48 = vpop.f32.mrf.mxu1 }
 0x132   : > { %v346_v49 = vadd.f32 1e-05, %v345_v48 }
 0x134   : > { %699 = vrsqrt.f32 %v346_v49  ;;  %vm375_vm0 = vweird.f32 %v346_v49 }
 0x139   : > { %v348_v50 = vpop.f32.mrf.mxu1 }
 0x13a   : > { %v700_v51 = vpop.eup %699  ;;  %v349_v52 = vadd.f32 1e-05, %v348_v50 }
 0x13b   : > { %v370_v53 = vmul.f32 %v700_v51, %v346_v49  ;;  %vm376_vm1 = vweird.f32 %v700_v51 }
 0x13c   : > { %701 = vrsqrt.f32 %v349_v52  ;;  %vm377_vm2 = vmor %vm375_vm0, %vm376_vm1  ;;  %vm385_vm3 = vweird.f32 %v349_v52 }
 0x13d   : > { %v371_v54 = vmul.f32 %v700_v51, %v370_v53  ;;  %v357_v55 = vpop.f32.mrf.mxu3 }
 0x13e   : > { %v358_v56 = vadd.f32 1e-05, %v357_v55 }
 0x13f   : > { %v372_v57 = vmul.f32 0.5, %v371_v54 }
 0x140   : > { %703 = vrsqrt.f32 %v358_v56  ;;  %vm415_vm7 = vweird.f32 %v358_v56 }
 0x141   : > { %v373_v58 = vsub.f32 1.5, %v372_v57  ;;  %v351_v59 = vpop.f32.mrf.mxu1 }
 0x142   : > { %v702_v60 = vpop.eup %701  ;;  %v932_v61 = vadd.f32 1e-05, %v351_v59 }
 0x143   : > { %v374_v62 = vmul.f32 %v700_v51, %v373_v58  ;;  %v380_v63 = vmul.f32 %v702_v60, %v349_v52  ;;  %vm386_vm4 = vweird.f32 %v702_v60 }
 0x144   : > { %705 = vrsqrt.f32 %v932_v61  ;;  %vm387_vm5 = vmor %vm385_vm3, %vm386_vm4  ;;  %vm395_vm9 = vweird.f32 %v932_v61 }
 0x145   : > { %v381_v0 = vmul.f32 %v702_v60, %v380_v63  ;;  %v360_v1 = vpop.f32.mrf.mxu3  ;;  %v378_v4 = vsel %vm377_vm2, %v700_v51, %v374_v62 }
 0x146   : > { %v704_v2 = vpop.eup %703  ;;  %v935_v3 = vadd.f32 1e-05, %v360_v1  ;;  %v449_v11 = vmul.f32 %v378_v4, %v900_v25 }
 0x147   : > { %v382_v5 = vmul.f32 0.5, %v381_v0  ;;  %v410_v6 = vmul.f32 %v704_v2, %v358_v56  ;;  %vm416_vm6 = vweird.f32 %v704_v2 }
 0x148   : > { %707 = vrsqrt.f32 %v935_v3  ;;  %v461_v22 = vmul.f32 %v941_v12, %v449_v11  ;;  %vm417_vm8 = vmor %vm415_vm7, %vm416_vm6  ;;  %vm425_vm13 = vweird.f32 %v935_v3 }
 0x149   : > { %v383_v7 = vsub.f32 1.5, %v382_v5  ;;  %v411_v8 = vmul.f32 %v704_v2, %v410_v6  ;;  %v354_v9 = vpop.f32.mrf.mxu1 }
 0x14a   : > { %v938_v10 = vpop.eup %705  ;;  %v943_v13 = vadd.f32 1e-05, %v354_v9  ;;  %v473_v37 = vadd.f32 %v950_v23, %v461_v22 }
 0x14b   : > { %v384_v14 = vmul.f32 %v702_v60, %v383_v7  ;;  %v412_v15 = vmul.f32 0.5, %v411_v8  ;;  %v390_v16 = vmul.f32 %v938_v10, %v932_v61  ;;  %vm396_vm10 = vweird.f32 %v938_v10 }
 0x14c   : > { %709 = vrsqrt.f32 %v943_v13  ;;  %vm397_vm12 = vmor %vm395_vm9, %vm396_vm10  ;;  %vm405_vm15 = vweird.f32 %v943_v13 }
 0x14d   : > { %v388_v17 = vsel %vm387_vm5, %v702_v60, %v384_v14  ;;  %v413_v18 = vsub.f32 1.5, %v412_v15  ;;  %v391_v19 = vmul.f32 %v938_v10, %v390_v16  ;;  %v363_v20 = vpop.f32.mrf.mxu3 }
 0x14e   : > { %v708_v21 = vpop.eup %707  ;;  %v450_v24 = vmul.f32 %v388_v17, %v906_v30  ;;  %v953_v25 = vadd.f32 1e-05, %v363_v20 }
 0x14f   : > { %v414_v26 = vmul.f32 %v704_v2, %v413_v18  ;;  %v392_v27 = vmul.f32 0.5, %v391_v19  ;;  %v420_v29 = vmul.f32 %v708_v21, %v935_v3  ;;  %vm426_vm11 = vweird.f32 %v708_v21 }
 0x150   : > { %v462_v31 = vmul.f32 %v941_v12, %v450_v24  ;;  %711 = vrsqrt.f32 %v953_v25  ;;  %vm427_vm14 = vmor %vm425_vm13, %vm426_vm11  ;;  %vm435_vm3 = vweird.f32 %v953_v25 }
 0x151   : > { %v393_v32 = vsub.f32 1.5, %v392_v27  ;;  %v421_v33 = vmul.f32 %v708_v21, %v420_v29  ;;  %v418_v38 = vsel %vm417_vm8, %v704_v2, %v414_v26 }
 0x152   : > { %v710_v35 = vpop.eup %709  ;;  %v474_v30 = vadd.f32 %v950_v23, %v462_v31  ;;  %v453_v50 = vmul.f32 %v418_v38, %v904_v28 }
 0x153   : > { %v394_v39 = vmul.f32 %v938_v10, %v393_v32  ;;  %v422_v41 = vmul.f32 0.5, %v421_v33  ;;  %v400_v43 = vmul.f32 %v710_v35, %v943_v13  ;;  %vm406_vm0 = vweird.f32 %v710_v35 }
 0x154   : > { %v604_v44 = vpack.c.bf16 %v474_v30, %v473_v37  ;;  %v465_v58 = vmul.f32 %v941_v12, %v453_v50  ;;  %vm407_vm1 = vmor %vm405_vm15, %vm406_vm0 }
 0x155   : > { %v423_v45 = vsub.f32 1.5, %v422_v41  ;;  %v401_v47 = vmul.f32 %v710_v35, %v400_v43  ;;  %v366_v48 = vpop.f32.mrf.mxu3  ;;  %v398_v52 = vsel %vm397_vm12, %v938_v10, %v394_v39 }
 0x156   : > { %v712_v49 = vpop.eup %711  ;;  %605 = vst [vmem:[%s966_s19] sm:$0xff] %v604_v44   ;;  %v367_v51 = vadd.f32 1e-05, %v366_v48  ;;  %v451_v59 = vmul.f32 %v398_v52, %v914_v36  ;;  %v477_v3 = vadd.f32 %v950_v23, %v465_v58 }
 0x157   : > { %v424_v53 = vmul.f32 %v708_v21, %v423_v45  ;;  %v402_v54 = vmul.f32 0.5, %v401_v47  ;;  %v430_v55 = vmul.f32 %v712_v49, %v953_v25  ;;  %vm436_vm2 = vweird.f32 %v712_v49 }
 0x158   : > { %713 = vrsqrt.f32 %v367_v51  ;;  %v463_v4 = vmul.f32 %v941_v12, %v451_v59  ;;  %vm437_vm4 = vmor %vm435_vm3, %vm436_vm2  ;;  %vm445_vm6 = vweird.f32 %v367_v51 }
 0x159   : > { %v428_v56 = vsel %vm427_vm14, %v708_v21, %v424_v53  ;;  %v403_v57 = vsub.f32 1.5, %v402_v54  ;;  %v431_v28 = vmul.f32 %v712_v49, %v430_v55 }
 0x15a   : > { %v454_v60 = vmul.f32 %v428_v56, %v912_v34  ;;  %v475_v10 = vadd.f32 %v950_v23, %v463_v4 }
 0x15b   : > { %v404_v61 = vmul.f32 %v710_v35, %v403_v57  ;;  %v432_v62 = vmul.f32 0.5, %v431_v28 }
 0x15c   : > { %v466_v63 = vmul.f32 %v941_v12, %v454_v60 }
 0x15d   : > { %v408_v0 = vsel %vm407_vm1, %v710_v35, %v404_v61  ;;  %v433_v1 = vsub.f32 1.5, %v432_v62 }
 0x15e   : > { %v714_v2 = vpop.eup %713  ;;  %v478_v5 = vadd.f32 %v950_v23, %v466_v63  ;;  %v452_v6 = vmul.f32 %v408_v0, %v922_v42 }
 0x15f   : > { %v434_v36 = vmul.f32 %v712_v49, %v433_v1  ;;  %v440_v34 = vmul.f32 %v714_v2, %v367_v51  ;;  %vm446_vm5 = vweird.f32 %v714_v2 }
 0x160   : > { %v614_v7 = vpack.c.bf16 %v478_v5, %v477_v3  ;;  %v464_v8 = vmul.f32 %v941_v12, %v452_v6  ;;  %vm447_vm7 = vmor %vm445_vm6, %vm446_vm5 }
 0x161   : > { %v441_v9 = vmul.f32 %v714_v2, %v440_v34  ;;  %v438_v13 = vsel %vm437_vm4, %v712_v49, %v434_v36 }
 0x162   : > { %622 = vst [vmem:[%s966_s19 + $0x10] sm:$0xff] %v614_v7   ;;  %v476_v11 = vadd.f32 %v950_v23, %v464_v8  ;;  %v455_v16 = vmul.f32 %v438_v13, %v920_v40 }
 0x163   : > { %v442_v14 = vmul.f32 0.5, %v441_v9 }
 0x164   : > { %v609_v42 = vpack.c.bf16 %v476_v11, %v475_v10  ;;  %v467_v19 = vmul.f32 %v941_v12, %v455_v16 }
 0x165   : > { %v443_v15 = vsub.f32 1.5, %v442_v14 }
 0x166   : > { %621 = vst [vmem:[%s966_s19 + $0x8] sm:$0xff] %v609_v42   ;;  %v479_v22 = vadd.f32 %v950_v23, %v467_v19 }
 0x167   : > { %v444_v17 = vmul.f32 %v714_v2, %v443_v15 }
 0x169   : > { %v448_v18 = vsel %vm447_vm7, %v714_v2, %v444_v17 }
 0x16a   : > { %v456_v20 = vmul.f32 %v448_v18, %v928_v46 }
 0x16c   : > { %v468_v21 = vmul.f32 %v941_v12, %v456_v20 }
 0x16e   : > { %v480_v24 = vadd.f32 %v950_v23, %v468_v21 }
 0x170   : > { %v619_v25 = vpack.c.bf16 %v480_v24, %v479_v22 }
 0x172   : > { %623 = vst [vmem:[%s966_s19 + $0x18] sm:$0xff] %v619_v25  }
 0x173 PF: > { %s16_s15 = sadd.s32 1, %s819_s15  }
 0x174   : > { %p13_p7 = scmp.ge.s32.totalorder %s16_s15, 4  }
 0x176   :  { %15 = sbr.rel (!%p13_p7) target bundleno = 2 (0x2), region = 79 }
 0x17b   :  { %519 = vsyncpa [#allocation3], 1 }
 0x17c   :  { %521 = vsyncpa [#allocation3 + $0x1], 1 }
 0x17d   :  { %522 = vsyncpa [#allocation5], 1 }

// kernel: conv_block_forward.7
= control target key start
LH: loop header
LB: loop body
LE: loop exit
PB: predicated region body
PF: predicated region fallthrough
CT: control target
= control target key end

     0   :  { %s252_s6 = smov 0   ;;  %s274_s0 = inlined_call_operand.vmem [shape: bf16[200,128], index: 0, kind: input, shape index: {}]   ;;  %s275_s1 = inlined_call_operand.vmem [shape: f32[5,2,128], index: 1, kind: output, shape index: {}]  }
   0x1 LB: > { %s258_s7 = sadd.s32 4294967295, %s240_s6   ;;  %p212_p0 = scmp.ge.s32.totalorder %s240_s6, 1  ;;  %s240_s6 = sphi %s252_s6, %s11_s6  }
   0x2   : > { %p88_p1 = scmp.lt.s32.totalorder %s240_s6, 6 }
   0x4   : > { %p89_p2 = pnand %p212_p0, %p88_p1 }
   0x5   : > { %s107_s8 = smul.u32 (!%p89_p2), 5, %s258_s7  ;;  %p113_p4 = scmp.lt.s32.totalorder (!%p89_p2), %s258_s7, 4 }
   0x6   : > { %92 = sbr.rel (%p89_p2) target bundleno = 41 (0x29), region = 24 }
   0x7   : > { %p108_p3 = scmp.lt.s32.totalorder (!%p89_p2), %s107_s8, 24 }
   0xb   : > { %s277_s8 = smov (!%p108_p3, %s107_s8), 24  ;;  %s279_s7 = smov (!%p113_p4, %s258_s7), 4  ;;  %vm152_vm0 = vcmask 1040384  }
   0xc   : > { %s213_s9 = sshll.u32 %s277_s8, 2  ;;  %s214_s13 = sshll.u32 %s279_s7, 1 }
   0xd   : > { %s111_s12 = scalar_lea.vmem %s274_s0, %s213_s9  ;;  %s116_s16 = scalar_lea.vmem %s275_s1, %s214_s13 }
   0xe   : > { %v218_v0 = vld [vmem:[%s111_s12] sm:$0xff]   ;;  %v225_v1 = vld [vmem:[%s111_s12 + $0x8] sm:$0xff]   ;;  %v121_v2 = vld [vmem:[%s111_s12 + $0x10] sm:$0xf] }
   0xf   : > { %v219_v3 = vunpack.c.l.bf16 %v218_v0  ;;  %v220_v4 = vunpack.c.h.bf16 %v218_v0  ;;  %v223_v5 = vunpack.c.l.bf16 %v225_v1  ;;  %v224_v6 = vunpack.c.h.bf16 %v225_v1 }
  0x10   : > { %v126_v7 = vunpack.c.l.bf16 %v121_v2 }
  0x11   : > { %v127_v8 = vadd.f32 %v220_v4, %v219_v3  ;;  %v137_v9 = vmul.f32 %v219_v3, %v219_v3  ;;  %v138_v10 = vmul.f32 %v220_v4, %v220_v4  ;;  %v139_v11 = vmul.f32 %v223_v5, %v223_v5 }
  0x12   : > { %v140_v13 = vmul.f32 %v224_v6, %v224_v6  ;;  %v141_v16 = vmul.f32 %v126_v7, %v126_v7 }
  0x13   : > { %v128_v12 = vadd.f32 %v223_v5, %v127_v8  ;;  %v142_v14 = vadd.f32 %v138_v10, %v137_v9 }
  0x15   : > { %v129_v15 = vadd.f32 %v224_v6, %v128_v12  ;;  %v143_v17 = vadd.f32 %v142_v14, %v139_v11 }
  0x17   : > { %v130_v18 = vadd.f32 %v129_v15, %v126_v7  ;;  %v144_v19 = vadd.f32 %v143_v17, %v140_v13 }
  0x19   : > { %v131_v20 = vrot.slane %v130_v18, 4  ;;  %v145_v21 = vadd.f32 %v144_v19, %v141_v16 }
  0x1b   : > { %v132_v22 = vadd.f32 %v131_v20, %v130_v18  ;;  %v146_v23 = vrot.slane %v145_v21, 4 }
  0x1d   : > { %v133_v24 = vrot.slane %v132_v22, 2  ;;  %v147_v25 = vadd.f32 %v146_v23, %v145_v21 }
  0x1f   : > { %v134_v26 = vadd.f32 %v133_v24, %v132_v22  ;;  %v148_v27 = vrot.slane %v147_v25, 2 }
  0x21   : > { %v135_v28 = vrot.slane %v134_v26, 1  ;;  %v149_v29 = vadd.f32 %v148_v27, %v147_v25 }
  0x23   : > { %v136_v30 = vadd.f32 %v135_v28, %v134_v26  ;;  %v150_v31 = vrot.slane %v149_v29, 1 }
  0x25   : > { %v151_v32 = vadd.f32 %v150_v31, %v149_v29 }
  0x27   : > { %v153_v33 = vsel %vm152_vm0, %v136_v30, %v151_v32 }
  0x28   : > { %154 = vst [vmem:[%s116_s16] sm:$0x3] %v153_v33 }
  0x29 PF: > { %s11_s6 = sadd.s32 1, %s240_s6  }
  0x2a   : > { %p8_p5 = scmp.ge.s32.totalorder %s11_s6, 7  }
  0x2c   :  { %10 = sbr.rel (!%p8_p5) target bundleno = 1 (0x1), region = 54 }

// kernel: squeeze.4
= control target key start
LH: loop header
LB: loop body
LE: loop exit
PB: predicated region body
PF: predicated region fallthrough
CT: control target
= control target key end

     0   :  { %s37_s8 = smov 32   ;;  %s38_s9 = smov 64   ;;  %vm7_vm0 = vcmask 261120   ;;  %s55_s0 = inlined_call_operand.vmem [shape: f32[128], index: 0, kind: input, shape index: {}]   ;;  %s56_s1 = inlined_call_operand.vmem [shape: f32[4,32], index: 1, kind: output, shape index: {}]  }
   0x1   :  { %v4_v0 = vld [vmem:[%s55_s0] sm:$0x1]  ;;  %s36_s0 = smov 96  }
   0x2   :  { %5 = vst [vmem:[#allocation1] sm:$0x1] %v4_v0 }
   0x9   :  { %v9_v1 = vld [vmem:[#allocation1] sm:$0x1]  }
   0xa   :  { %v21_v2 = vld [vmem:[#allocation1] sm:$0x1]   ;;  %10 = vrot.lane.b32.xlu0 %v9_v1, %s36_s0 }
   0xb   :  { %22 = vrot.lane.b32.xlu1 %v21_v2, %s37_s8  ;;  %v15_v3 = vld [vmem:[#allocation1] sm:$0x1]  }
   0xc   :  { %v6_v4 = vld [vmem:[#allocation1] sm:$0x1]  }
   0xd   :  { %8 = vst.msk [vmem:[#allocation0] sm:$0x1] %vm7_vm0, %v6_v4  }
  0x12   :  { %16 = vrot.lane.b32.xlu0 %v15_v3, %s38_s9 }
  0x7c   :  { %v11_v5 = vpop.permute.xlu0 %10  }
  0x7d   :  { %v23_v6 = vpop.permute.xlu1 %22   ;;  %14 = vst.msk [vmem:[#allocation0 + $0x1] sm:$0x1] %vm7_vm0, %v11_v5  }
  0x7e   :  { %26 = vst.msk [vmem:[#allocation0 + $0x3] sm:$0x1] %vm7_vm0, %v23_v6  }
  0x84   :  { %v17_v7 = vpop.permute.xlu0 %16  }
  0x85   :  { %20 = vst.msk [vmem:[#allocation0 + $0x2] sm:$0x1] %vm7_vm0, %v17_v7  }
  0x8c   :  { %v29_v8 = vld [vmem:[#allocation0] sm:$0xf] }
  0x8d   :  { %32 = vst [vmem:[%s56_s1] sm:$0xf] %v29_v8 }

// kernel: tile.17
= control target key start
LH: loop header
LB: loop body
LE: loop exit
PB: predicated region body
PF: predicated region fallthrough
CT: control target
= control target key end

     0   :  { %s40_s0 = inlined_call_operand.vmem [shape: f32[32], index: 0, kind: input, shape index: {}]   ;;  %s41_s1 = inlined_call_operand.vmem [shape: f32[30,32], index: 1, kind: output, shape index: {}]  }
   0x1   :  { %v4_v0 = vld [vmem:[%s40_s0] ss:$0 sm:$0xff] }
   0x2   :  { %5 = vst [vmem:[%s41_s1] sm:$0xff] %v4_v0 }
   0x3   :  { %12 = vst [vmem:[%s41_s1 + $0x8] sm:$0xff] %v4_v0 }
   0x4   :  { %13 = vst [vmem:[%s41_s1 + $0x10] sm:$0xff] %v4_v0 }
   0x5   :  { %14 = vst [vmem:[%s41_s1 + $0x18] sm:$0xff] %v4_v0 }

// kernel: mul.18
= control target key start
LH: loop header
LB: loop body
LE: loop exit
PB: predicated region body
PF: predicated region fallthrough
CT: control target
= control target key end

     0   :  { %vm3_vm0 = vcmask 261120   ;;  %s29_s8 = smov 96   ;;  %s30_s13 = smov 32   ;;  %vm9_vm1 = vcmask 1048320   ;;  %vm15_vm2 = vcmask 785920   ;;  %vm21_vm3 = vcmask 523520   ;;  %s66_s0 = inlined_call_operand.vmem [shape: f32[30,32], index: 0, kind: input, shape index: {}]   ;;  %s67_s1 = inlined_call_operand.vmem [shape: f32[960], index: 1, kind: output, shape index: {}]  }
   0x1   :  { %v23_v0 = vld [vmem:[%s66_s0 + $0x3] ss:$4 sm:$0x7f]   ;;  %v25_v1 = vld [vmem:[%s66_s0 + $0x1] ss:$4 sm:$0xff]  }
   0x2   :  { %7 = vrot.lane.b32.xlu0 %v23_v0, %s29_s8  ;;  %v2_v2 = vld [vmem:[%s66_s0] ss:$4 sm:$0xff]   ;;  %19 = vrot.lane.b32.xlu1 %v25_v1, %s30_s13  ;;  %v24_v3 = vld [vmem:[%s66_s0 + $0x2] ss:$4 sm:$0x7f]   ;;  %s31_s0 = smov 64  }
   0x3   :  { %4 = vst.msk [vmem:[%s67_s1] sm:$0xff] %vm3_vm0, %v2_v2  }
   0xa   :  { %13 = vrot.lane.b32.xlu0 %v24_v3, %s31_s0 }
  0x74   :  { %v8_v4 = vpop.permute.xlu0 %7   ;;  %v20_v5 = vpop.permute.xlu1 %19  }
  0x75   :  { %10 = vst.msk [vmem:[%s67_s1] sm:$0x7f] %vm9_vm1, %v8_v4  }
  0x7c   :  { %v14_v6 = vpop.permute.xlu0 %13  }
  0x7d   :  { %16 = vst.msk [vmem:[%s67_s1] sm:$0x7f] %vm15_vm2, %v14_v6  }
  0x7e   :  { %22 = vst.msk [vmem:[%s67_s1] sm:$0xff] %vm21_vm3, %v20_v5  }

// kernel: conv_block_forward.8
= control target key start
LH: loop header
LB: loop body
LE: loop exit
PB: predicated region body
PF: predicated region fallthrough
CT: control target
= control target key end

     0   :  { %s2114_s12 = smov 0   ;;  %s3001_s0 = inlined_call_operand.vmem [shape: bf16[64,960], index: 0, kind: input, shape index: {}]   ;;  %s3002_s1 = inlined_call_operand.vmem [shape: bf16[960,256], index: 1, kind: input, shape index: {}]   ;;  %s3003_s2 = inlined_call_operand.vmem [shape: f32[32,256], index: 2, kind: input, shape index: {}]   ;;  %s3004_s3 = inlined_call_operand.vmem [shape: bf16[64,256], index: 3, kind: output, shape index: {}]  }
   0x1 LB: > { %s1379_s13 = sadd.s32 4294967295, %s2092_s12   ;;  %p1383_p0 = scmp.ge.s32.totalorder %s2092_s12, 1  ;;  %s2092_s12 = sphi %s2114_s12, %s13_s12  }
   0x2   : > { %p139_p1 = scmp.lt.s32.totalorder %s2092_s12, 3 }
   0x4   : > { %p140_p2 = pnand %p1383_p0, %p139_p1 }
   0x5   : > { %s1384_s22 = sshll.u32 (!%p140_p2), %s1379_s13, 2 }
   0x6   : > { %143 = sbr.rel (%p140_p2) target bundleno = 306 (0x132), region = 32  ;;  %p166_p3 = scmp.lt.s32.totalorder (!%p140_p2), %s1384_s22, 7 }
   0xb   : > { %v1512_v0 = vld [vmem:[%s3002_s1 + $0x70] sm:$0xf]  ;;  %v1973_v1 = vld [vmem:[%s3002_s1 + $0x74] sm:$0xf0]  ;;  %v1504_v11 = vld [vmem:[%s3002_s1 + $0x60] sm:$0xf] }
   0xc   : > { %v1576_v2 = vld [vmem:[%s3002_s1 + $0xf0] sm:$0xf]  ;;  %v1513_v3 = vor.u32 %v1973_v1, %v1512_v0  ;;  %v1989_v4 = vld [vmem:[%s3002_s1 + $0xf4] sm:$0xf0]  ;;  %v1971_v13 = vld [vmem:[%s3002_s1 + $0x64] sm:$0xf0] }
   0xd   : > { %v1640_v5 = vld [vmem:[%s3002_s1 + $0x170] sm:$0xf]  ;;  %v2005_v6 = vld [vmem:[%s3002_s1 + $0x174] sm:$0xf0]  ;;  %v1577_v7 = vor.u32 %v1989_v4, %v1576_v2  ;;  %v1568_v14 = vld [vmem:[%s3002_s1 + $0xe0] sm:$0xf]  ;;  %v1505_v16 = vor.u32 %v1971_v13, %v1504_v11 }
   0xe   : > { %v1641_v8 = vor.u32 %v2005_v6, %v1640_v5  ;;  %v1704_v9 = vld [vmem:[%s3002_s1 + $0x1f0] sm:$0xf]  ;;  %v2021_v10 = vld [vmem:[%s3002_s1 + $0x1f4] sm:$0xf0]  ;;  %1009 = vmatpush.bf16.msra.mxu0 %v1513_v3  ;;  %v1987_v15 = vld [vmem:[%s3002_s1 + $0xe4] sm:$0xf0] }
   0xf   : > { %v1705_v12 = vor.u32 %v2021_v10, %v1704_v9  ;;  %1028 = vmatpush.bf16.msra.mxu1 %v1577_v7  ;;  %v1569_v17 = vor.u32 %v1987_v15, %v1568_v14  ;;  %v1632_v18 = vld [vmem:[%s3002_s1 + $0x160] sm:$0xf]  ;;  %v2003_v19 = vld [vmem:[%s3002_s1 + $0x164] sm:$0xf0]  ;;  %v1496_v23 = vld [vmem:[%s3002_s1 + $0x50] sm:$0xf] }
  0x10   : > { %1047 = vmatpush.bf16.msra.mxu2 %v1641_v8  ;;  %v1696_v20 = vld [vmem:[%s3002_s1 + $0x1e0] sm:$0xf]  ;;  %v1633_v21 = vor.u32 %v2003_v19, %v1632_v18  ;;  %v2019_v22 = vld [vmem:[%s3002_s1 + $0x1e4] sm:$0xf0]  ;;  %v1969_v24 = vld [vmem:[%s3002_s1 + $0x54] sm:$0xf0] }
  0x11   : > { %1066 = vmatpush.bf16.msra.mxu3 %v1705_v12  ;;  %v1697_v25 = vor.u32 %v2019_v22, %v1696_v20  ;;  %v1560_v26 = vld [vmem:[%s3002_s1 + $0xd0] sm:$0xf]  ;;  %v1985_v27 = vld [vmem:[%s3002_s1 + $0xd4] sm:$0xf0]  ;;  %v1497_v29 = vor.u32 %v1969_v24, %v1496_v23  ;;  %v1488_v35 = vld [vmem:[%s3002_s1 + $0x40] sm:$0xf] }
  0x12   : > { %v1624_v28 = vld [vmem:[%s3002_s1 + $0x150] sm:$0xf]  ;;  %1010 = vmatpush.bf16.msra.mxu0 %v1505_v16  ;;  %v2001_v30 = vld [vmem:[%s3002_s1 + $0x154] sm:$0xf0]  ;;  %v1561_v33 = vor.u32 %v1985_v27, %v1560_v26  ;;  %v1967_v36 = vld [vmem:[%s3002_s1 + $0x44] sm:$0xf0] }
  0x13   : > { %v1688_v31 = vld [vmem:[%s3002_s1 + $0x1d0] sm:$0xf]  ;;  %v2017_v32 = vld [vmem:[%s3002_s1 + $0x1d4] sm:$0xf0]  ;;  %1029 = vmatpush.bf16.msra.mxu1 %v1569_v17  ;;  %v1625_v34 = vor.u32 %v2001_v30, %v1624_v28  ;;  %v1552_v37 = vld [vmem:[%s3002_s1 + $0xc0] sm:$0xf]  ;;  %v1489_v44 = vor.u32 %v1967_v36, %v1488_v35 }
  0x14   : > { %1048 = vmatpush.bf16.msra.mxu2 %v1633_v21  ;;  %v1689_v38 = vor.u32 %v2017_v32, %v1688_v31  ;;  %v1983_v39 = vld [vmem:[%s3002_s1 + $0xc4] sm:$0xf0]  ;;  %v1616_v40 = vld [vmem:[%s3002_s1 + $0x140] sm:$0xf]  ;;  %v1480_v47 = vld [vmem:[%s3002_s1 + $0x30] sm:$0xf] }
  0x15   : > { %1067 = vmatpush.bf16.msra.mxu3 %v1697_v25  ;;  %v1999_v41 = vld [vmem:[%s3002_s1 + $0x144] sm:$0xf0]  ;;  %v1680_v42 = vld [vmem:[%s3002_s1 + $0x1c0] sm:$0xf]  ;;  %v1553_v45 = vor.u32 %v1983_v39, %v1552_v37  ;;  %v1965_v48 = vld [vmem:[%s3002_s1 + $0x34] sm:$0xf0] }
  0x16   : > { %v2015_v43 = vld [vmem:[%s3002_s1 + $0x1c4] sm:$0xf0]  ;;  %1011 = vmatpush.bf16.msra.mxu0 %v1497_v29  ;;  %v1617_v46 = vor.u32 %v1999_v41, %v1616_v40  ;;  %v1544_v49 = vld [vmem:[%s3002_s1 + $0xb0] sm:$0xf]  ;;  %v1981_v51 = vld [vmem:[%s3002_s1 + $0xb4] sm:$0xf0]  ;;  %v1481_v56 = vor.u32 %v1965_v48, %v1480_v47 }
  0x17   : > { %1030 = vmatpush.bf16.msra.mxu1 %v1561_v33  ;;  %v1681_v50 = vor.u32 %v2015_v43, %v1680_v42  ;;  %v1608_v52 = vld [vmem:[%s3002_s1 + $0x130] sm:$0xf]  ;;  %v1997_v53 = vld [vmem:[%s3002_s1 + $0x134] sm:$0xf0]  ;;  %v1545_v57 = vor.u32 %v1981_v51, %v1544_v49  ;;  %v1472_v59 = vld [vmem:[%s3002_s1 + $0x20] sm:$0xf] }
  0x18   : > { %1049 = vmatpush.bf16.msra.mxu2 %v1625_v34  ;;  %v1672_v54 = vld [vmem:[%s3002_s1 + $0x1b0] sm:$0xf]  ;;  %v2013_v55 = vld [vmem:[%s3002_s1 + $0x1b4] sm:$0xf0]  ;;  %v1609_v58 = vor.u32 %v1997_v53, %v1608_v52  ;;  %v1963_v60 = vld [vmem:[%s3002_s1 + $0x24] sm:$0xf0] }
  0x19   : > { %1068 = vmatpush.bf16.msra.mxu3 %v1689_v38  ;;  %v1536_v61 = vld [vmem:[%s3002_s1 + $0xa0] sm:$0xf]  ;;  %v1673_v62 = vor.u32 %v2013_v55, %v1672_v54  ;;  %v1979_v63 = vld [vmem:[%s3002_s1 + $0xa4] sm:$0xf0]  ;;  %v1473_v4 = vor.u32 %v1963_v60, %v1472_v59  ;;  %v1464_v5 = vld [vmem:[%s3002_s1 + $0x10] sm:$0xf] }
  0x1a   : > { %1012 = vmatpush.bf16.msra.mxu0 %v1489_v44  ;;  %v1600_v0 = vld [vmem:[%s3002_s1 + $0x120] sm:$0xf]  ;;  %v1995_v1 = vld [vmem:[%s3002_s1 + $0x124] sm:$0xf0]  ;;  %v1537_v6 = vor.u32 %v1979_v63, %v1536_v61  ;;  %v1961_v8 = vld [vmem:[%s3002_s1 + $0x14] sm:$0xf0] }
  0x1b   : > { %1031 = vmatpush.bf16.msra.mxu1 %v1553_v45  ;;  %v1664_v2 = vld [vmem:[%s3002_s1 + $0x1a0] sm:$0xf]  ;;  %v2011_v3 = vld [vmem:[%s3002_s1 + $0x1a4] sm:$0xf0]  ;;  %v1601_v7 = vor.u32 %v1995_v1, %v1600_v0  ;;  %v1528_v9 = vld [vmem:[%s3002_s1 + $0x90] sm:$0xf]  ;;  %v1465_v16 = vor.u32 %v1961_v8, %v1464_v5 }
  0x1c   : > { %1050 = vmatpush.bf16.msra.mxu2 %v1617_v46  ;;  %v1977_v10 = vld [vmem:[%s3002_s1 + $0x94] sm:$0xf0]  ;;  %v1665_v11 = vor.u32 %v2011_v3, %v1664_v2  ;;  %v1592_v12 = vld [vmem:[%s3002_s1 + $0x110] sm:$0xf]  ;;  %v1456_v17 = vld [vmem:[%s3002_s1] sm:$0xf] }
  0x1d   : > { %1069 = vmatpush.bf16.msra.mxu3 %v1681_v50  ;;  %v1993_v13 = vld [vmem:[%s3002_s1 + $0x114] sm:$0xf0]  ;;  %v1656_v14 = vld [vmem:[%s3002_s1 + $0x190] sm:$0xf]  ;;  %v1959_v18 = vld [vmem:[%s3002_s1 + $0x4] sm:$0xf0]  ;;  %v1529_v20 = vor.u32 %v1977_v10, %v1528_v9 }
  0x1e   : > { %1013 = vmatpush.bf16.msra.mxu0 %v1481_v56  ;;  %v2009_v15 = vld [vmem:[%s3002_s1 + $0x194] sm:$0xf0]  ;;  %v1520_v19 = vld [vmem:[%s3002_s1 + $0x80] sm:$0xf]  ;;  %v1593_v21 = vor.u32 %v1993_v13, %v1592_v12  ;;  %v1975_v22 = vld [vmem:[%s3002_s1 + $0x84] sm:$0xf0]  ;;  %v1457_v30 = vor.u32 %v1959_v18, %v1456_v17 }
  0x1f   : > { %1032 = vmatpush.bf16.msra.mxu1 %v1545_v57  ;;  %v1584_v23 = vld [vmem:[%s3002_s1 + $0x100] sm:$0xf]  ;;  %s3006_s22 = smov (!%p166_p3, %s1384_s22), 7  ;;  %v1657_v24 = vor.u32 %v2009_v15, %v1656_v14  ;;  %v1991_v25 = vld [vmem:[%s3002_s1 + $0x104] sm:$0xf0]  ;;  %v1521_v35 = vor.u32 %v1975_v22, %v1520_v19  ;;  %vm1002_vm0 = vcmask 523264  }
  0x20   : > { %1051 = vmatpush.bf16.msra.mxu2 %v1609_v58  ;;  %v1648_v26 = vld [vmem:[%s3002_s1 + $0x180] sm:$0xf]  ;;  %v2007_v27 = vld [vmem:[%s3002_s1 + $0x184] sm:$0xf0]  ;;  %s1940_s17 = sshll.u32 %s3006_s22, 5  ;;  %v1585_v36 = vor.u32 %v1991_v25, %v1584_v23  ;;  %s1941_s19 = sshll.u32 %s3006_s22, 3 }
  0x21   : > { %1070 = vmatpush.bf16.msra.mxu3 %v1673_v62  ;;  %v1896_v28 = vld [vmem:[%s3002_s1 + $0x370] sm:$0xf]  ;;  %v2069_v29 = vld [vmem:[%s3002_s1 + $0x374] sm:$0xf0]  ;;  %s2328_s25 = scalar_lea.vmem %s3001_s0, %s1940_s17  ;;  %v1888_v42 = vld [vmem:[%s3002_s1 + $0x360] sm:$0xf]  ;;  %v1649_v43 = vor.u32 %v2007_v27, %v1648_v26  ;;  %s2988_s26 = scalar_lea.vmem %s3004_s3, %s1941_s19 }
  0x22   : > { %1014 = vmatpush.bf16.msra.mxu0 %v1473_v4  ;;  %v1768_v31 = vld [vmem:[%s3002_s1 + $0x270] sm:$0xf]  ;;  %v2037_v32 = vld [vmem:[%s3002_s1 + $0x274] sm:$0xf0]  ;;  %v1392_v37 = vld [vmem:[%s2328_s25] sm:$0xf]  ;;  %v1897_v47 = vor.u32 %v2069_v29, %v1896_v28 }
  0x23   : > { %1033 = vmatpush.bf16.msra.mxu1 %v1537_v6  ;;  %v1832_v33 = vld [vmem:[%s3002_s1 + $0x2f0] sm:$0xf]  ;;  %v2053_v34 = vld [vmem:[%s3002_s1 + $0x2f4] sm:$0xf0]  ;;  %v1946_v38 = vld [vmem:[%s2328_s25 + $0x1c] sm:$0xf0]  ;;  %v1769_v58 = vor.u32 %v2037_v32, %v1768_v31 }
  0x24   : > { %1052 = vmatpush.bf16.msra.mxu2 %v1601_v7  ;;  %v1942_v39 = vld [vmem:[%s2328_s25 + $0x4] sm:$0xf]  ;;  %v1928_v40 = vld [vmem:[%s3002_s1 + $0x3b0] sm:$0xf]  ;;  %v2077_v41 = vld [vmem:[%s3002_s1 + $0x3b4] sm:$0xf0]  ;;  %v2357_v48 = vor.u32 %v1946_v38, %v1392_v37  ;;  %v1833_v51 = vor.u32 %v2053_v34, %v1832_v33 }
  0x25   : > { %1071 = vmatpush.bf16.msra.mxu3 %v1665_v11  ;;  %v1394_v44 = vld [vmem:[%s2328_s25 + $0x20] sm:$0xf0]  ;;  %v1400_v45 = vld [vmem:[%s2328_s25 + $0x8] sm:$0xf]  ;;  %v1943_v49 = vld [vmem:[%s2328_s25 + $0xc] sm:$0xf]  ;;  %v1929_v59 = vor.u32 %v2077_v41, %v1928_v40 }
  0x26   : > { %1015 = vmatpush.bf16.msra.mxu0 %v1465_v16  ;;  %v1947_v46 = vld [vmem:[%s2328_s25 + $0x24] sm:$0xf0]  ;;  %v1402_v50 = vld [vmem:[%s2328_s25 + $0x28] sm:$0xf0]  ;;  %v2364_v53 = vor.u32 %v1942_v39, %v1394_v44  ;;  %v1824_v55 = vld [vmem:[%s3002_s1 + $0x2e0] sm:$0xf] }
  0x27   : > { %1034 = vmatpush.bf16.msra.mxu1 %v1529_v20  ;;  %v2067_v52 = vld [vmem:[%s3002_s1 + $0x364] sm:$0xf0]  ;;  %v2366_v54 = vor.u32 %v1947_v46, %v1400_v45  ;;  %v2374_v57 = vor.u32 %v1943_v49, %v1402_v50  ;;  %v1760_v61 = vld [vmem:[%s3002_s1 + $0x260] sm:$0xf]  ;;  %v1880_v63 = vld [vmem:[%s3002_s1 + $0x350] sm:$0xf] }
  0x28   : > { %1053 = vmatpush.bf16.msra.mxu2 %v1593_v21  ;;  %v2051_v56 = vld [vmem:[%s3002_s1 + $0x2e4] sm:$0xf0]  ;;  %v1889_v60 = vor.u32 %v2067_v52, %v1888_v42  ;;  %v2065_v1 = vld [vmem:[%s3002_s1 + $0x354] sm:$0xf0]  ;;  %v1920_v2 = vld [vmem:[%s3002_s1 + $0x3a0] sm:$0xf] }
  0x29   : > { %1072 = vmatpush.bf16.msra.mxu3 %v1657_v24  ;;  %v2035_v62 = vld [vmem:[%s3002_s1 + $0x264] sm:$0xf0]  ;;  %v1825_v0 = vor.u32 %v2051_v56, %v1824_v55  ;;  %v1816_v4 = vld [vmem:[%s3002_s1 + $0x2d0] sm:$0xf]  ;;  %v2049_v5 = vld [vmem:[%s3002_s1 + $0x2d4] sm:$0xf0]  ;;  %v1881_v7 = vor.u32 %v2065_v1, %v1880_v63 }
  0x2a   : > { %1016 = vmatpush.bf16.msra.mxu0 %v1457_v30  ;;  %v2075_v3 = vld [vmem:[%s3002_s1 + $0x3a4] sm:$0xf0]  ;;  %v1761_v6 = vor.u32 %v2035_v62, %v1760_v61  ;;  %v1752_v8 = vld [vmem:[%s3002_s1 + $0x250] sm:$0xf]  ;;  %v2033_v9 = vld [vmem:[%s3002_s1 + $0x254] sm:$0xf0]  ;;  %v1817_v11 = vor.u32 %v2049_v5, %v1816_v4 }
  0x2b   : > { %1035 = vmatpush.bf16.msra.mxu1 %v1521_v35  ;;  %v1921_v10 = vor.u32 %v2075_v3, %v1920_v2  ;;  %v1872_v12 = vld [vmem:[%s3002_s1 + $0x340] sm:$0xf]  ;;  %v2063_v13 = vld [vmem:[%s3002_s1 + $0x344] sm:$0xf0]  ;;  %v1912_v16 = vld [vmem:[%s3002_s1 + $0x390] sm:$0xf]  ;;  %v1753_v18 = vor.u32 %v2033_v9, %v1752_v8 }
  0x2c   : > { %1054 = vmatpush.bf16.msra.mxu2 %v1585_v36  ;;  %v1808_v14 = vld [vmem:[%s3002_s1 + $0x2c0] sm:$0xf]  ;;  %v2047_v15 = vld [vmem:[%s3002_s1 + $0x2c4] sm:$0xf0]  ;;  %v2073_v17 = vld [vmem:[%s3002_s1 + $0x394] sm:$0xf0]  ;;  %v1873_v20 = vor.u32 %v2063_v13, %v1872_v12 }
  0x2d   : > { %1073 = vmatpush.bf16.msra.mxu3 %v1649_v43  ;;  %1017 = vmatmul.bf16.vlgmr.msra.gmra.mxu0 %v2357_v48  ;;  %v1744_v19 = vld [vmem:[%s3002_s1 + $0x240] sm:$0xf]  ;;  %v2031_v21 = vld [vmem:[%s3002_s1 + $0x244] sm:$0xf0]  ;;  %v1913_v24 = vor.u32 %v2073_v17, %v1912_v16  ;;  %v1809_v25 = vor.u32 %v2047_v15, %v1808_v14  ;;  %v1950_v26 = vld [vmem:[%s2328_s25 + $0x44] sm:$0xf] }
  0x2e   : > { %1036 = vmatmul.bf16.vlgmr.msra.gmra.mxu1 %v2364_v53  ;;  %1085 = vmatpush.bf16.msrb.mxu0 %v1769_v58  ;;  %v1424_v22 = vld [vmem:[%s2328_s25 + $0x40] sm:$0xf]  ;;  %v1426_v27 = vld [vmem:[%s2328_s25 + $0x60] sm:$0xf0]  ;;  %v1432_v28 = vld [vmem:[%s2328_s25 + $0x48] sm:$0xf]  ;;  %v1745_v34 = vor.u32 %v2031_v21, %v1744_v19 }
  0x2f   : > { %1104 = vmatpush.bf16.msrb.mxu1 %v1833_v51  ;;  %1055 = vmatmul.bf16.vlgmr.msra.gmra.mxu2 %v2366_v54  ;;  %v1954_v23 = vld [vmem:[%s2328_s25 + $0x5c] sm:$0xf0]  ;;  %v1864_v29 = vld [vmem:[%s3002_s1 + $0x330] sm:$0xf]  ;;  %v2061_v30 = vld [vmem:[%s3002_s1 + $0x334] sm:$0xf0] }
  0x30   : > { %1123 = vmatpush.bf16.msrb.mxu2 %v1897_v47  ;;  %1074 = vmatmul.bf16.vlgmr.msra.gmra.mxu3 %v2374_v57  ;;  %v1955_v31 = vld [vmem:[%s2328_s25 + $0x64] sm:$0xf0]  ;;  %v1800_v32 = vld [vmem:[%s3002_s1 + $0x2b0] sm:$0xf]  ;;  %v2045_v33 = vld [vmem:[%s3002_s1 + $0x2b4] sm:$0xf0]  ;;  %v1865_v39 = vor.u32 %v2061_v30, %v1864_v29  ;;  %v2466_v43 = vor.u32 %v1954_v23, %v1424_v22  ;;  %v2474_v47 = vor.u32 %v1950_v26, %v1426_v27 }
  0x31   : > { %1146 = vmatpush.bf16.msrb.mxu3 %v1929_v59  ;;  %v1951_v35 = vld [vmem:[%s2328_s25 + $0x4c] sm:$0xf]  ;;  %v1904_v36 = vld [vmem:[%s3002_s1 + $0x380] sm:$0xf]  ;;  %v2071_v37 = vld [vmem:[%s3002_s1 + $0x384] sm:$0xf0]  ;;  %v1801_v44 = vor.u32 %v2045_v33, %v1800_v32  ;;  %v2476_v49 = vor.u32 %v1955_v31, %v1432_v28 }
  0x32   : > { %1086 = vmatpush.bf16.msrb.mxu0 %v1761_v6  ;;  %v1434_v38 = vld [vmem:[%s2328_s25 + $0x68] sm:$0xf0]  ;;  %v1736_v40 = vld [vmem:[%s3002_s1 + $0x230] sm:$0xf]  ;;  %v2029_v41 = vld [vmem:[%s3002_s1 + $0x234] sm:$0xf0]  ;;  %v1905_v42 = vor.u32 %v2071_v37, %v1904_v36 }
  0x33   : > { %1105 = vmatpush.bf16.msrb.mxu1 %v1825_v0  ;;  %v1856_v45 = vld [vmem:[%s3002_s1 + $0x320] sm:$0xf]  ;;  %v2059_v46 = vld [vmem:[%s3002_s1 + $0x324] sm:$0xf0]  ;;  %v2484_v52 = vor.u32 %v1951_v35, %v1434_v38  ;;  %v1737_v55 = vor.u32 %v2029_v41, %v1736_v40  ;;  %v1848_v61 = vld [vmem:[%s3002_s1 + $0x310] sm:$0xf] }
  0x34   : > { %1124 = vmatpush.bf16.msrb.mxu2 %v1889_v60  ;;  %v1792_v50 = vld [vmem:[%s3002_s1 + $0x2a0] sm:$0xf]  ;;  %v2043_v51 = vld [vmem:[%s3002_s1 + $0x2a4] sm:$0xf0]  ;;  %v1857_v56 = vor.u32 %v2059_v46, %v1856_v45  ;;  %v2057_v62 = vld [vmem:[%s3002_s1 + $0x314] sm:$0xf0] }
  0x35   : > { %1147 = vmatpush.bf16.msrb.mxu3 %v1921_v10  ;;  %v1728_v58 = vld [vmem:[%s3002_s1 + $0x220] sm:$0xf]  ;;  %v2027_v59 = vld [vmem:[%s3002_s1 + $0x224] sm:$0xf0]  ;;  %v1793_v60 = vor.u32 %v2043_v51, %v1792_v50  ;;  %v1784_v63 = vld [vmem:[%s3002_s1 + $0x290] sm:$0xf]  ;;  %v1849_v5 = vor.u32 %v2057_v62, %v1848_v61 }
  0x36   : > { %1087 = vmatpush.bf16.msrb.mxu0 %v1753_v18  ;;  %v2041_v0 = vld [vmem:[%s3002_s1 + $0x294] sm:$0xf0]  ;;  %v2020_v1 = vld [vmem:[%s3002_s1 + $0x1f4] sm:$0xf]  ;;  %v1729_v2 = vor.u32 %v2027_v59, %v1728_v58  ;;  %v1720_v3 = vld [vmem:[%s3002_s1 + $0x210] sm:$0xf] }
  0x37   : > { %1106 = vmatpush.bf16.msrb.mxu1 %v1817_v11  ;;  %v1706_v4 = vld [vmem:[%s3002_s1 + $0x1f8] sm:$0xf0]  ;;  %v2025_v6 = vld [vmem:[%s3002_s1 + $0x214] sm:$0xf0]  ;;  %v2055_v8 = vld [vmem:[%s3002_s1 + $0x304] sm:$0xf0]  ;;  %v1785_v10 = vor.u32 %v2041_v0, %v1784_v63 }
  0x38   : > { %1125 = vmatpush.bf16.msrb.mxu2 %v1881_v7  ;;  %v1840_v7 = vld [vmem:[%s3002_s1 + $0x300] sm:$0xf]  ;;  %v1709_v9 = vor.u32 %v2020_v1, %v1706_v4  ;;  %v2018_v12 = vld [vmem:[%s3002_s1 + $0x1e4] sm:$0xf]  ;;  %v1698_v13 = vld [vmem:[%s3002_s1 + $0x1e8] sm:$0xf0]  ;;  %v1721_v18 = vor.u32 %v2025_v6, %v1720_v3 }
  0x39   : > { %1148 = vmatpush.bf16.msrb.mxu3 %v1913_v24  ;;  %v1776_v11 = vld [vmem:[%s3002_s1 + $0x280] sm:$0xf]  ;;  %v2039_v14 = vld [vmem:[%s3002_s1 + $0x284] sm:$0xf0]  ;;  %v2004_v15 = vld [vmem:[%s3002_s1 + $0x174] sm:$0xf]  ;;  %v1701_v17 = vor.u32 %v2018_v12, %v1698_v13  ;;  %v1841_v22 = vor.u32 %v2055_v8, %v1840_v7 }
  0x3a   : > { %1088 = vmatpush.bf16.msrb.mxu0 %v1745_v34  ;;  %v1642_v16 = vld [vmem:[%s3002_s1 + $0x178] sm:$0xf0]  ;;  %v1712_v19 = vld [vmem:[%s3002_s1 + $0x200] sm:$0xf]  ;;  %v2023_v23 = vld [vmem:[%s3002_s1 + $0x204] sm:$0xf0]  ;;  %v1777_v26 = vor.u32 %v2039_v14, %v1776_v11 }
  0x3b   : > { %1107 = vmatpush.bf16.msrb.mxu1 %v1809_v25  ;;  %v1578_v21 = vld [vmem:[%s3002_s1 + $0xf8] sm:$0xf0]  ;;  %v2016_v24 = vld [vmem:[%s3002_s1 + $0x1d4] sm:$0xf]  ;;  %v1408_v27 = vld [vmem:[%s2328_s25 + $0x10] sm:$0xf]  ;;  %v1645_v30 = vor.u32 %v2004_v15, %v1642_v16  ;;  %v1713_v38 = vor.u32 %v2023_v23, %v1712_v19 }
  0x3c   : > { %1126 = vmatpush.bf16.msrb.mxu2 %v1873_v20  ;;  %v1988_v20 = vld [vmem:[%s3002_s1 + $0xf4] sm:$0xf]  ;;  %v1690_v25 = vld [vmem:[%s3002_s1 + $0x1d8] sm:$0xf0]  ;;  %v1948_v28 = vld [vmem:[%s2328_s25 + $0x2c] sm:$0xf0] }
  0x3d   : > { %1149 = vmatpush.bf16.msrb.mxu3 %v1905_v42  ;;  %1022 = vmatmul.bf16.gmra.mxu0 %v2466_v43  ;;  %v1944_v29 = vld [vmem:[%s2328_s25 + $0x14] sm:$0xf]  ;;  %v1514_v32 = vld [vmem:[%s3002_s1 + $0x78] sm:$0xf0]  ;;  %v1581_v34 = vor.u32 %v1988_v20, %v1578_v21  ;;  %v2002_v35 = vld [vmem:[%s3002_s1 + $0x164] sm:$0xf]  ;;  %v1693_v37 = vor.u32 %v2016_v24, %v1690_v25  ;;  %v2597_v58 = vor.u32 %v1948_v28, %v1408_v27 }
  0x3e   : > { %1041 = vmatmul.bf16.gmra.mxu1 %v2474_v47  ;;  %1089 = vmatpush.bf16.msrb.mxu0 %v1737_v55  ;;  %v1972_v31 = vld [vmem:[%s3002_s1 + $0x74] sm:$0xf]  ;;  %v1634_v36 = vld [vmem:[%s3002_s1 + $0x168] sm:$0xf0]  ;;  %v1949_v40 = vld [vmem:[%s2328_s25 + $0x34] sm:$0xf0] }
  0x3f   : > { %1108 = vmatpush.bf16.msrb.mxu1 %v1801_v44  ;;  %1060 = vmatmul.bf16.gmra.mxu2 %v2476_v49  ;;  %v1410_v33 = vld [vmem:[%s2328_s25 + $0x30] sm:$0xf0]  ;;  %v1945_v41 = vld [vmem:[%s2328_s25 + $0x1c] sm:$0xf]  ;;  %v1517_v44 = vor.u32 %v1972_v31, %v1514_v32  ;;  %v1970_v45 = vld [vmem:[%s3002_s1 + $0x64] sm:$0xf]  ;;  %v1637_v50 = vor.u32 %v2002_v35, %v1634_v36 }
  0x40   : > { %1127 = vmatpush.bf16.msrb.mxu2 %v1865_v39  ;;  %1079 = vmatmul.bf16.gmra.mxu3 %v2484_v52  ;;  %v1416_v39 = vld [vmem:[%s2328_s25 + $0x18] sm:$0xf]  ;;  %v1418_v42 = vld [vmem:[%s2328_s25 + $0x38] sm:$0xf0]  ;;  %v1506_v46 = vld [vmem:[%s3002_s1 + $0x68] sm:$0xf0]  ;;  %v2599_v59 = vor.u32 %v1944_v29, %v1410_v33 }
  0x41   : > { %1218 = vmatpush.bf16.msra.mxu3 %v1709_v9  ;;  %v1986_v51 = vld [vmem:[%s3002_s1 + $0xe4] sm:$0xf]  ;;  %v1570_v55 = vld [vmem:[%s3002_s1 + $0xe8] sm:$0xf0]  ;;  %v2610_v63 = vor.u32 %v1949_v40, %v1416_v39  ;;  %v2612_v0 = vor.u32 %v1945_v41, %v1418_v42  ;;  %v1509_v1 = vor.u32 %v1970_v45, %v1506_v46  ;;  %v1968_v3 = vld [vmem:[%s3002_s1 + $0x54] sm:$0xf] }
  0x42   : > { %1090 = vmatpush.bf16.msrb.mxu0 %v1729_v2  ;;  %v2014_v61 = vld [vmem:[%s3002_s1 + $0x1c4] sm:$0xf]  ;;  %v1682_v62 = vld [vmem:[%s3002_s1 + $0x1c8] sm:$0xf0]  ;;  %v1573_v2 = vor.u32 %v1986_v51, %v1570_v55  ;;  %v1498_v4 = vld [vmem:[%s3002_s1 + $0x58] sm:$0xf0] }
  0x43   : > { %1109 = vmatpush.bf16.msrb.mxu1 %v1793_v60  ;;  %v1626_v60 = vld [vmem:[%s3002_s1 + $0x158] sm:$0xf0]  ;;  %v1984_v6 = vld [vmem:[%s3002_s1 + $0xd4] sm:$0xf]  ;;  %v1998_v8 = vld [vmem:[%s3002_s1 + $0x144] sm:$0xf]  ;;  %v1685_v9 = vor.u32 %v2014_v61, %v1682_v62  ;;  %v1501_v13 = vor.u32 %v1968_v3, %v1498_v4 }
  0x44   : > { %1128 = vmatpush.bf16.msrb.mxu2 %v1857_v56  ;;  %v2000_v56 = vld [vmem:[%s3002_s1 + $0x154] sm:$0xf]  ;;  %v1562_v7 = vld [vmem:[%s3002_s1 + $0xd8] sm:$0xf0]  ;;  %v1966_v15 = vld [vmem:[%s3002_s1 + $0x44] sm:$0xf] }
  0x45   : > { %1219 = vmatpush.bf16.msra.mxu3 %v1701_v17  ;;  %v2012_v11 = vld [vmem:[%s3002_s1 + $0x1b4] sm:$0xf]  ;;  %v1674_v12 = vld [vmem:[%s3002_s1 + $0x1b8] sm:$0xf0]  ;;  %v1565_v14 = vor.u32 %v1984_v6, %v1562_v7  ;;  %v1490_v16 = vld [vmem:[%s3002_s1 + $0x48] sm:$0xf0] }
  0x46   : > { %1091 = vmatpush.bf16.msrb.mxu0 %v1721_v18  ;;  %v1982_v18 = vld [vmem:[%s3002_s1 + $0xc4] sm:$0xf]  ;;  %v1554_v19 = vld [vmem:[%s3002_s1 + $0xc8] sm:$0xf0]  ;;  %v1996_v20 = vld [vmem:[%s3002_s1 + $0x134] sm:$0xf]  ;;  %v1677_v21 = vor.u32 %v2012_v11, %v1674_v12  ;;  %v1493_v25 = vor.u32 %v1966_v15, %v1490_v16 }
  0x47   : > { %1110 = vmatpush.bf16.msrb.mxu1 %v1785_v10  ;;  %v1618_v10 = vld [vmem:[%s3002_s1 + $0x148] sm:$0xf0]  ;;  %v2010_v23 = vld [vmem:[%s3002_s1 + $0x1a4] sm:$0xf]  ;;  %v1964_v27 = vld [vmem:[%s3002_s1 + $0x34] sm:$0xf] }
  0x48   : > { %1129 = vmatpush.bf16.msrb.mxu2 %v1849_v5  ;;  %v1629_v5 = vor.u32 %v2000_v56, %v1626_v60  ;;  %v1621_v17 = vor.u32 %v1998_v8, %v1618_v10  ;;  %v1666_v24 = vld [vmem:[%s3002_s1 + $0x1a8] sm:$0xf0]  ;;  %v1482_v28 = vld [vmem:[%s3002_s1 + $0x38] sm:$0xf0]  ;;  %v1440_v29 = vld [vmem:[%s2328_s25 + $0x50] sm:$0xf] }
  0x49   : > { %1220 = vmatpush.bf16.msra.mxu3 %v1693_v37  ;;  %v1952_v31 = vld [vmem:[%s2328_s25 + $0x54] sm:$0xf]  ;;  %v1546_v35 = vld [vmem:[%s3002_s1 + $0xb8] sm:$0xf0]  ;;  %v1994_v36 = vld [vmem:[%s3002_s1 + $0x124] sm:$0xf]  ;;  %v1669_v37 = vor.u32 %v2010_v23, %v1666_v24  ;;  %v1485_v46 = vor.u32 %v1964_v27, %v1482_v28 }
  0x4a   : > { %1092 = vmatpush.bf16.msrb.mxu0 %v1713_v38  ;;  %v1442_v32 = vld [vmem:[%s2328_s25 + $0x70] sm:$0xf0]  ;;  %v1602_v38 = vld [vmem:[%s3002_s1 + $0x128] sm:$0xf0]  ;;  %v1658_v40 = vld [vmem:[%s3002_s1 + $0x198] sm:$0xf0] }
  0x4b   : > { %1111 = vmatpush.bf16.msrb.mxu1 %v1777_v26  ;;  %v1557_v26 = vor.u32 %v1982_v18, %v1554_v19  ;;  %v2008_v39 = vld [vmem:[%s3002_s1 + $0x194] sm:$0xf]  ;;  %v1448_v41 = vld [vmem:[%s2328_s25 + $0x58] sm:$0xf]  ;;  %v1450_v45 = vld [vmem:[%s2328_s25 + $0x78] sm:$0xf0]  ;;  %v1605_v56 = vor.u32 %v1994_v36, %v1602_v38  ;;  %v2716_v3 = vor.u32 %v1952_v31, %v1442_v32 }
  0x4c   : > { %1130 = vmatpush.bf16.msrb.mxu2 %v1841_v22  ;;  %v1610_v22 = vld [vmem:[%s3002_s1 + $0x138] sm:$0xf0]  ;;  %v1957_v42 = vld [vmem:[%s2328_s25 + $0x74] sm:$0xf0]  ;;  %v1962_v51 = vld [vmem:[%s3002_s1 + $0x24] sm:$0xf] }
  0x4d   : > { %1093 = vmatmul.bf16.vlgmr.msrb.gmra.mxu0 %v2597_v58  ;;  %1221 = vmatpush.bf16.msra.mxu3 %v1685_v9  ;;  %v1613_v33 = vor.u32 %v1996_v20, %v1610_v22  ;;  %v1474_v55 = vld [vmem:[%s3002_s1 + $0x28] sm:$0xf0]  ;;  %v1978_v60 = vld [vmem:[%s3002_s1 + $0xa4] sm:$0xf]  ;;  %v1992_v62 = vld [vmem:[%s3002_s1 + $0x114] sm:$0xf]  ;;  %v2727_v7 = vor.u32 %v1957_v42, %v1448_v41 }
  0x4e   : > { %1161 = vmatpush.bf16.msra.mxu0 %v1517_v44  ;;  %1112 = vmatmul.bf16.vlgmr.msrb.gmra.mxu1 %v2599_v59  ;;  %v1953_v44 = vld [vmem:[%s2328_s25 + $0x5c] sm:$0xf]  ;;  %v1538_v61 = vld [vmem:[%s3002_s1 + $0xa8] sm:$0xf0]  ;;  %v2076_v9 = vld [vmem:[%s3002_s1 + $0x3b4] sm:$0xf]  ;;  %v1477_v11 = vor.u32 %v1962_v51, %v1474_v55 }
  0x4f   : > { %1180 = vmatpush.bf16.msra.mxu1 %v1581_v34  ;;  %1131 = vmatmul.bf16.vlgmr.msrb.gmra.mxu2 %v2610_v63  ;;  %v1980_v34 = vld [vmem:[%s3002_s1 + $0xb4] sm:$0xf]  ;;  %v1594_v4 = vld [vmem:[%s3002_s1 + $0x118] sm:$0xf0]  ;;  %v1650_v6 = vld [vmem:[%s3002_s1 + $0x188] sm:$0xf0]  ;;  %v2729_v8 = vor.u32 %v1953_v44, %v1450_v45  ;;  %v1541_v12 = vor.u32 %v1978_v60, %v1538_v61 }
  0x50   : > { %1199 = vmatpush.bf16.msra.mxu2 %v1645_v30  ;;  %1934 = vmatmul.msk.bf16.vlgmr.msrb.gmra.mxu3 %vm1002_vm0, %v2612_v0  ;;  %v1956_v30 = vld [vmem:[%s2328_s25 + $0x6c] sm:$0xf0]  ;;  %v1930_v10 = vld [vmem:[%s3002_s1 + $0x3b8] sm:$0xf0]  ;;  %v1976_v16 = vld [vmem:[%s3002_s1 + $0x94] sm:$0xf] }
  0x51   : > { %1222 = vmatpush.bf16.msra.mxu3 %v1677_v21  ;;  %v1466_v15 = vld [vmem:[%s3002_s1 + $0x18] sm:$0xf0]  ;;  %v1990_v19 = vld [vmem:[%s3002_s1 + $0x104] sm:$0xf]  ;;  %v1586_v20 = vld [vmem:[%s3002_s1 + $0x108] sm:$0xf0]  ;;  %v1933_v22 = vor.u32 %v2076_v9, %v1930_v10 }
  0x52   : > { %1162 = vmatpush.bf16.msra.mxu0 %v1509_v1  ;;  %v1661_v1 = vor.u32 %v2008_v39, %v1658_v40  ;;  %v2068_v21 = vld [vmem:[%s3002_s1 + $0x374] sm:$0xf]  ;;  %v1898_v23 = vld [vmem:[%s3002_s1 + $0x378] sm:$0xf0]  ;;  %v2074_v24 = vld [vmem:[%s3002_s1 + $0x3a4] sm:$0xf]  ;;  %v1589_v31 = vor.u32 %v1990_v19, %v1586_v20 }
  0x53   : > { %1181 = vmatpush.bf16.msra.mxu1 %v1573_v2  ;;  %v2714_v2 = vor.u32 %v1956_v30, %v1440_v29  ;;  %v1958_v28 = vld [vmem:[%s3002_s1 + $0x4] sm:$0xf]  ;;  %v1458_v29 = vld [vmem:[%s3002_s1 + $0x8] sm:$0xf0]  ;;  %v2052_v36 = vld [vmem:[%s3002_s1 + $0x2f4] sm:$0xf] }
  0x54   : > { %1200 = vmatpush.bf16.msra.mxu2 %v1637_v50  ;;  %v1549_v50 = vor.u32 %v1980_v34, %v1546_v35  ;;  %v1974_v30 = vld [vmem:[%s3002_s1 + $0x84] sm:$0xf]  ;;  %v1522_v32 = vld [vmem:[%s3002_s1 + $0x88] sm:$0xf0]  ;;  %v1770_v34 = vld [vmem:[%s3002_s1 + $0x278] sm:$0xf0]  ;;  %v1901_v35 = vor.u32 %v2068_v21, %v1898_v23  ;;  %v1461_v44 = vor.u32 %v1958_v28, %v1458_v29 }
  0x55   : > { %1223 = vmatpush.bf16.msra.mxu3 %v1669_v37  ;;  %v1834_v37 = vld [vmem:[%s3002_s1 + $0x2f8] sm:$0xf0]  ;;  %v2066_v38 = vld [vmem:[%s3002_s1 + $0x364] sm:$0xf]  ;;  %v1890_v40 = vld [vmem:[%s3002_s1 + $0x368] sm:$0xf0]  ;;  %v1525_v45 = vor.u32 %v1974_v30, %v1522_v32 }
  0x56   : > { %1163 = vmatpush.bf16.msra.mxu0 %v1501_v13  ;;  %v1960_v13 = vld [vmem:[%s3002_s1 + $0x14] sm:$0xf]  ;;  %v1914_v42 = vld [vmem:[%s3002_s1 + $0x398] sm:$0xf0]  ;;  %v2034_v51 = vld [vmem:[%s3002_s1 + $0x264] sm:$0xf]  ;;  %v1893_v55 = vor.u32 %v2066_v38, %v1890_v40 }
  0x57   : > { %1182 = vmatpush.bf16.msra.mxu1 %v1565_v14  ;;  %v1597_v14 = vor.u32 %v1992_v62, %v1594_v4  ;;  %v2072_v41 = vld [vmem:[%s3002_s1 + $0x394] sm:$0xf]  ;;  %v2050_v60 = vld [vmem:[%s3002_s1 + $0x2e4] sm:$0xf]  ;;  %v1826_v61 = vld [vmem:[%s3002_s1 + $0x2e8] sm:$0xf0] }
  0x58   : > { %1201 = vmatpush.bf16.msra.mxu2 %v1629_v5  ;;  %v2006_v5 = vld [vmem:[%s3002_s1 + $0x184] sm:$0xf]  ;;  %v1917_v62 = vor.u32 %v2072_v41, %v1914_v42  ;;  %v1882_v4 = vld [vmem:[%s3002_s1 + $0x358] sm:$0xf0]  ;;  %v2032_v9 = vld [vmem:[%s3002_s1 + $0x254] sm:$0xf] }
  0x59   : > { %1224 = vmatpush.bf16.msra.mxu3 %v1661_v1  ;;  %v1653_v18 = vor.u32 %v2006_v5, %v1650_v6  ;;  %v2064_v1 = vld [vmem:[%s3002_s1 + $0x354] sm:$0xf]  ;;  %v1829_v6 = vor.u32 %v2050_v60, %v1826_v61  ;;  %v2070_v10 = vld [vmem:[%s3002_s1 + $0x384] sm:$0xf]  ;;  %v1874_v20 = vld [vmem:[%s3002_s1 + $0x348] sm:$0xf0] }
  0x5a   : > { %1164 = vmatpush.bf16.msra.mxu0 %v1493_v25  ;;  %v1922_v25 = vld [vmem:[%s3002_s1 + $0x3a8] sm:$0xf0]  ;;  %v2062_v19 = vld [vmem:[%s3002_s1 + $0x344] sm:$0xf]  ;;  %v2044_v28 = vld [vmem:[%s3002_s1 + $0x2b4] sm:$0xf] }
  0x5b   : > { %1183 = vmatpush.bf16.msra.mxu1 %v1557_v26  ;;  %v1469_v26 = vor.u32 %v1960_v13, %v1466_v15  ;;  %v1925_v39 = vor.u32 %v2074_v24, %v1922_v25  ;;  %v2048_v13 = vld [vmem:[%s3002_s1 + $0x2d4] sm:$0xf]  ;;  %v1885_v15 = vor.u32 %v2064_v1, %v1882_v4  ;;  %v2030_v21 = vld [vmem:[%s3002_s1 + $0x244] sm:$0xf]  ;;  %v1810_v24 = vld [vmem:[%s3002_s1 + $0x2c8] sm:$0xf0] }
  0x5c   : > { %1202 = vmatpush.bf16.msra.mxu2 %v1621_v17  ;;  %v1530_v17 = vld [vmem:[%s3002_s1 + $0x98] sm:$0xf0]  ;;  %v2046_v23 = vld [vmem:[%s3002_s1 + $0x2c4] sm:$0xf]  ;;  %v1794_v38 = vld [vmem:[%s3002_s1 + $0x2a8] sm:$0xf0] }
  0x5d   : > { %1098 = vmatmul.bf16.gmra.mxu0 %v2714_v2  ;;  %v1533_v27 = vor.u32 %v1976_v16, %v1530_v17  ;;  %1225 = vmatpush.bf16.msra.mxu3 %v1653_v18  ;;  %v1813_v25 = vor.u32 %v2046_v23, %v1810_v24  ;;  %v1802_v29 = vld [vmem:[%s3002_s1 + $0x2b8] sm:$0xf0]  ;;  %v2056_v42 = vld [vmem:[%s3002_s1 + $0x314] sm:$0xf]  ;;  %v2054_v61 = vld [vmem:[%s3002_s1 + $0x304] sm:$0xf] }
  0x5e   : > { %1165 = vmatpush.bf16.msra.mxu0 %v1485_v46  ;;  %1117 = vmatmul.bf16.gmra.mxu1 %v2716_v3  ;;  %v1805_v32 = vor.u32 %v2044_v28, %v1802_v29  ;;  %v2022_v1 = vld [vmem:[%s3002_s1 + $0x204] sm:$0xf]  ;;  %v1714_v4 = vld [vmem:[%s3002_s1 + $0x208] sm:$0xf0]  ;;  %v322_v23 = vld [vmem:[%s3003_s2 + $0x30] sm:$0xff] }
  0x5f   : > { %1184 = vmatpush.bf16.msra.mxu1 %v1549_v50  ;;  %1136 = vmatmul.bf16.gmra.mxu2 %v2727_v7  ;;  %v1837_v50 = vor.u32 %v2052_v36, %v1834_v37  ;;  %v1730_v36 = vld [vmem:[%s3002_s1 + $0x228] sm:$0xf0]  ;;  %v2042_v37 = vld [vmem:[%s3002_s1 + $0x2a4] sm:$0xf] }
  0x60   : > { %1203 = vmatpush.bf16.msra.mxu2 %v1613_v33  ;;  %1935 = vmatmul.msk.bf16.gmra.mxu3 %vm1002_vm0, %v2729_v8  ;;  %v2036_v33 = vld [vmem:[%s3002_s1 + $0x274] sm:$0xf]  ;;  %v1797_v41 = vor.u32 %v2042_v37, %v1794_v38 }
  0x61   : > { %1298 = vmatpush.bf16.msrb.mxu3 %v1933_v22  ;;  %v1773_v46 = vor.u32 %v2036_v33, %v1770_v34  ;;  %v1746_v22 = vld [vmem:[%s3002_s1 + $0x248] sm:$0xf0]  ;;  %v2058_v33 = vld [vmem:[%s3002_s1 + $0x324] sm:$0xf] }
  0x62   : > { %1166 = vmatpush.bf16.msra.mxu0 %v1477_v11  ;;  %v1906_v11 = vld [vmem:[%s3002_s1 + $0x388] sm:$0xf0] }
  0x63   : > { %1185 = vmatpush.bf16.msra.mxu1 %v1541_v12  ;;  %v1754_v12 = vld [vmem:[%s3002_s1 + $0x258] sm:$0xf0]  ;;  %v1909_v16 = vor.u32 %v2070_v10, %v1906_v11  ;;  %v1858_v34 = vld [vmem:[%s3002_s1 + $0x328] sm:$0xf0] }
  0x64   : > { %1204 = vmatpush.bf16.msra.mxu2 %v1605_v56  ;;  %v1762_v56 = vld [vmem:[%s3002_s1 + $0x268] sm:$0xf0]  ;;  %v1757_v17 = vor.u32 %v2032_v9, %v1754_v12 }
  0x65   : > { %1299 = vmatpush.bf16.msrb.mxu3 %v1925_v39  ;;  %v1765_v5 = vor.u32 %v2034_v51, %v1762_v56  ;;  %v1861_v39 = vor.u32 %v2058_v33, %v1858_v34  ;;  %v1786_v51 = vld [vmem:[%s3002_s1 + $0x298] sm:$0xf0] }
  0x66   : > { %1167 = vmatpush.bf16.msra.mxu0 %v1469_v26  ;;  %v2060_v26 = vld [vmem:[%s3002_s1 + $0x334] sm:$0xf] }
  0x67   : > { %1186 = vmatpush.bf16.msra.mxu1 %v1533_v27  ;;  %v1866_v27 = vld [vmem:[%s3002_s1 + $0x338] sm:$0xf0] }
  0x68   : > { %1205 = vmatpush.bf16.msra.mxu2 %v1597_v14  ;;  %v1818_v14 = vld [vmem:[%s3002_s1 + $0x2d8] sm:$0xf0]  ;;  %v1869_v30 = vor.u32 %v2060_v26, %v1866_v27 }
  0x69   : > { %1300 = vmatpush.bf16.msrb.mxu3 %v1917_v62  ;;  %v1821_v18 = vor.u32 %v2048_v13, %v1818_v14  ;;  %v1842_v62 = vld [vmem:[%s3002_s1 + $0x308] sm:$0xf0]  ;;  %v320_v14 = vld [vmem:[%s3003_s2 + $0x20] sm:$0xff] }
  0x6a   : > { %1168 = vmatpush.bf16.msra.mxu0 %v1461_v44  ;;  %v1850_v44 = vld [vmem:[%s3002_s1 + $0x318] sm:$0xf0] }
  0x6b   : > { %1187 = vmatpush.bf16.msra.mxu1 %v1525_v45  ;;  %v2024_v45 = vld [vmem:[%s3002_s1 + $0x214] sm:$0xf] }
  0x6c   : > { %1206 = vmatpush.bf16.msra.mxu2 %v1589_v31 }
  0x6d   : > { %1169 = vmatmul.bf16.vlgmr.msra.gmra.mxu0 %v2357_v48  ;;  %v1877_v48 = vor.u32 %v2062_v19, %v1874_v20  ;;  %1301 = vmatpush.bf16.msrb.mxu3 %v1909_v16 }
  0x6e   : > { %1237 = vmatpush.bf16.msrb.mxu0 %v1773_v46  ;;  %1188 = vmatmul.bf16.vlgmr.msra.gmra.mxu1 %v2364_v53  ;;  %v1749_v53 = vor.u32 %v2030_v21, %v1746_v22  ;;  %v1722_v46 = vld [vmem:[%s3002_s1 + $0x218] sm:$0xf0] }
  0x6f   : > { %1256 = vmatpush.bf16.msrb.mxu1 %v1837_v50  ;;  %1207 = vmatmul.bf16.vlgmr.msra.gmra.mxu2 %v2366_v54  ;;  %v2028_v54 = vld [vmem:[%s3002_s1 + $0x234] sm:$0xf]  ;;  %v1725_v56 = vor.u32 %v2024_v45, %v1722_v46 }
  0x70   : > { %1275 = vmatpush.bf16.msrb.mxu2 %v1901_v35  ;;  %1226 = vmatmul.bf16.vlgmr.msra.gmra.mxu3 %v2374_v57  ;;  %v1738_v57 = vld [vmem:[%s3002_s1 + $0x238] sm:$0xf0]  ;;  %v2026_v35 = vld [vmem:[%s3002_s1 + $0x224] sm:$0xf]  ;;  %v2040_v50 = vld [vmem:[%s3002_s1 + $0x294] sm:$0xf] }
  0x71   : > { %v1741_v31 = vor.u32 %v2028_v54, %v1738_v57  ;;  %v1733_v40 = vor.u32 %v2026_v35, %v1730_v36  ;;  %v1789_v60 = vor.u32 %v2040_v50, %v1786_v51 }
  0x72   : > { %1238 = vmatpush.bf16.msrb.mxu0 %v1765_v5  ;;  %v2038_v5 = vld [vmem:[%s3002_s1 + $0x284] sm:$0xf] }
  0x73   : > { %1257 = vmatpush.bf16.msrb.mxu1 %v1829_v6  ;;  %v1778_v6 = vld [vmem:[%s3002_s1 + $0x288] sm:$0xf0] }
  0x74   : > { %1276 = vmatpush.bf16.msrb.mxu2 %v1893_v55  ;;  %v1853_v55 = vor.u32 %v2056_v42, %v1850_v44  ;;  %v1781_v9 = vor.u32 %v2038_v5, %v1778_v6 }
  0x76   : > { %1239 = vmatpush.bf16.msrb.mxu0 %v1757_v17 }
  0x77   : > { %1258 = vmatpush.bf16.msrb.mxu1 %v1821_v18 }
  0x78   : > { %1277 = vmatpush.bf16.msrb.mxu2 %v1885_v15 }
  0x7a   : > { %1240 = vmatpush.bf16.msrb.mxu0 %v1749_v53 }
  0x7b   : > { %1259 = vmatpush.bf16.msrb.mxu1 %v1813_v25 }
  0x7c   : > { %1278 = vmatpush.bf16.msrb.mxu2 %v1877_v48 }
  0x7d   : > { %1174 = vmatmul.bf16.gmra.mxu0 %v2466_v43  ;;  %v1845_v43 = vor.u32 %v2054_v61, %v1842_v62 }
  0x7e   : > { %1241 = vmatpush.bf16.msrb.mxu0 %v1741_v31  ;;  %1193 = vmatmul.bf16.gmra.mxu1 %v2474_v47  ;;  %v1717_v47 = vor.u32 %v2022_v1, %v1714_v4 }
  0x7f   : > { %1260 = vmatpush.bf16.msrb.mxu1 %v1805_v32  ;;  %1212 = vmatmul.bf16.gmra.mxu2 %v2476_v49  ;;  %v316_v49 = vld [vmem:[%s3003_s2] sm:$0xff] }
  0x80   : > { %1279 = vmatpush.bf16.msrb.mxu2 %v1869_v30  ;;  %1231 = vmatmul.bf16.gmra.mxu3 %v2484_v52 }
  0x82   : > { %1242 = vmatpush.bf16.msrb.mxu0 %v1733_v40 }
  0x83   : > { %1261 = vmatpush.bf16.msrb.mxu1 %v1797_v41 }
  0x84   : > { %1280 = vmatpush.bf16.msrb.mxu2 %v1861_v39 }
  0x86   : > { %1243 = vmatpush.bf16.msrb.mxu0 %v1725_v56 }
  0x87   : > { %1262 = vmatpush.bf16.msrb.mxu1 %v1789_v60 }
  0x88   : > { %1281 = vmatpush.bf16.msrb.mxu2 %v1853_v55 }
  0x8a   : > { %1244 = vmatpush.bf16.msrb.mxu0 %v1717_v47 }
  0x8b   : > { %1263 = vmatpush.bf16.msrb.mxu1 %v1781_v9 }
  0x8c   : > { %1282 = vmatpush.bf16.msrb.mxu2 %v1845_v43 }
  0x8d   : > { %1245 = vmatmul.bf16.vlgmr.msrb.gmra.mxu0 %v2597_v58 }
  0x8e   : > { %1264 = vmatmul.bf16.vlgmr.msrb.gmra.mxu1 %v2599_v59 }
  0x8f   : > { %1283 = vmatmul.bf16.vlgmr.msrb.gmra.mxu2 %v2610_v63 }
  0x90   : > { %1936 = vmatmul.msk.bf16.vlgmr.msrb.gmra.mxu3 %vm1002_vm0, %v2612_v0  ;;  %v318_v0 = vld [vmem:[%s3003_s2 + $0x10] sm:$0xff] }
  0x9d   : > { %1250 = vmatmul.bf16.gmra.mxu0 %v2714_v2 }
  0x9e   : > { %1269 = vmatmul.bf16.gmra.mxu1 %v2716_v3 }
  0x9f   : > { %1288 = vmatmul.bf16.gmra.mxu2 %v2727_v7 }
  0xa0   : > { %1937 = vmatmul.msk.bf16.gmra.mxu3 %vm1002_vm0, %v2729_v8 }
  0xaa   : > { %v1018_v52 = vpop.f32.mrf.mxu0 }
  0xab   : > { %v1019_v58 = vadd.f32 %v1018_v52, %v316_v49  ;;  %v1037_v59 = vpop.f32.mrf.mxu1 }
  0xad   : > { %v1038_v63 = vadd.f32 %v1037_v59, %v1019_v58 }
  0xb2   : > { %v1056_v2 = vpop.f32.mrf.mxu2  ;;  %v1020_v11 = vpop.f32.mrf.mxu0 }
  0xb3   : > { %v1057_v10 = vadd.f32 %v1056_v2, %v1038_v63  ;;  %v1075_v3 = vpop.f32.mrf.mxu3  ;;  %v1021_v7 = vadd.f32 %v1020_v11, %v318_v0  ;;  %v1039_v12 = vpop.f32.mrf.mxu1 }
  0xb5   : > { %v1076_v13 = vadd.f32 %v1075_v3, %v1057_v10  ;;  %v1040_v8 = vadd.f32 %v1039_v12, %v1021_v7 }
  0xba   : > { %v1058_v15 = vpop.f32.mrf.mxu2  ;;  %v1023_v18 = vpop.f32.mrf.mxu0 }
  0xbb   : > { %v1059_v16 = vadd.f32 %v1058_v15, %v1040_v8  ;;  %v1077_v17 = vpop.f32.mrf.mxu3  ;;  %v1024_v19 = vadd.f32 %v1023_v18, %v320_v14  ;;  %v1042_v20 = vpop.f32.mrf.mxu1  ;;  %v317_v14 = vld [vmem:[%s3003_s2 + $0x8] sm:$0xff] }
  0xbd   : > { %v1078_v21 = vadd.f32 %v1077_v17, %v1059_v16  ;;  %v1043_v22 = vadd.f32 %v1042_v20, %v1024_v19 }
  0xc2   : > { %v1061_v24 = vpop.f32.mrf.mxu2  ;;  %v1025_v25 = vpop.f32.mrf.mxu0 }
  0xc3   : > { %v1062_v48 = vadd.f32 %v1061_v24, %v1043_v22  ;;  %v1080_v53 = vpop.f32.mrf.mxu3  ;;  %v1026_v26 = vadd.f32 %v1025_v25, %v322_v23  ;;  %v1044_v27 = vpop.f32.mrf.mxu1 }
  0xc5   : > { %v1081_v54 = vadd.f32 %v1080_v53, %v1062_v48  ;;  %v1045_v57 = vadd.f32 %v1044_v27, %v1026_v26  ;;  %v321_v27 = vld [vmem:[%s3003_s2 + $0x28] sm:$0xff] }
  0xca   : > { %v1063_v28 = vpop.f32.mrf.mxu2  ;;  %v1094_v31 = vpop.f32.mrf.mxu0 }
  0xcb   : > { %v1064_v29 = vadd.f32 %v1063_v28, %v1045_v57  ;;  %v1082_v30 = vpop.f32.mrf.mxu3  ;;  %v1113_v32 = vpop.f32.mrf.mxu1  ;;  %v1095_v34 = vadd.f32 %v1094_v31, %v1076_v13 }
  0xcd   : > { %v1083_v33 = vadd.f32 %v1082_v30, %v1064_v29  ;;  %v1114_v35 = vadd.f32 %v1113_v32, %v1095_v34 }
  0xd2   : > { %v1132_v36 = vpop.f32.mrf.mxu2  ;;  %v1096_v39 = vpop.f32.mrf.mxu0 }
  0xd3   : > { %v1151_v37 = vpop.f32.mrf.mxu3  ;;  %v1133_v38 = vadd.f32 %v1132_v36, %v1114_v35  ;;  %v1115_v40 = vpop.f32.mrf.mxu1  ;;  %v1097_v41 = vadd.f32 %v1096_v39, %v1078_v21  ;;  %v319_v21 = vld [vmem:[%s3003_s2 + $0x18] sm:$0xff] }
  0xd5   : > { %v2964_v42 = vadd.f32 %v1151_v37, %v1133_v38  ;;  %v1116_v44 = vadd.f32 %v1115_v40, %v1097_v41  ;;  %v323_v40 = vld [vmem:[%s3003_s2 + $0x38] sm:$0xff] }
  0xda   : > { %v1134_v45 = vpop.f32.mrf.mxu2  ;;  %v1099_v51 = vpop.f32.mrf.mxu0 }
  0xdb   : > { %v1153_v46 = vpop.f32.mrf.mxu3  ;;  %v1135_v50 = vadd.f32 %v1134_v45, %v1116_v44  ;;  %v1118_v55 = vpop.f32.mrf.mxu1  ;;  %v1100_v56 = vadd.f32 %v1099_v51, %v1081_v54 }
  0xdd   : > { %v2966_v60 = vadd.f32 %v1153_v46, %v1135_v50  ;;  %v1119_v61 = vadd.f32 %v1118_v55, %v1100_v56 }
  0xe2   : > { %v1137_v62 = vpop.f32.mrf.mxu2  ;;  %v1101_v5 = vpop.f32.mrf.mxu0 }
  0xe3   : > { %v1156_v1 = vpop.f32.mrf.mxu3  ;;  %v1138_v4 = vadd.f32 %v1137_v62, %v1119_v61  ;;  %v1120_v6 = vpop.f32.mrf.mxu1  ;;  %v1102_v43 = vadd.f32 %v1101_v5, %v1083_v33 }
  0xe5   : > { %v2968_v47 = vadd.f32 %v1156_v1, %v1138_v4  ;;  %v1121_v9 = vadd.f32 %v1120_v6, %v1102_v43 }
  0xea   : > { %v1139_v49 = vpop.f32.mrf.mxu2  ;;  %v1170_v59 = vpop.f32.mrf.mxu0 }
  0xeb   : > { %v1158_v52 = vpop.f32.mrf.mxu3  ;;  %v1140_v58 = vadd.f32 %v1139_v49, %v1121_v9  ;;  %v1189_v63 = vpop.f32.mrf.mxu1  ;;  %v1171_v15 = vadd.f32 %v1170_v59, %v317_v14 }
  0xed   : > { %v2970_v0 = vadd.f32 %v1158_v52, %v1140_v58  ;;  %v1190_v18 = vadd.f32 %v1189_v63, %v1171_v15 }
  0xf2   : > { %v1208_v2 = vpop.f32.mrf.mxu2  ;;  %v1172_v3 = vpop.f32.mrf.mxu0 }
  0xf3   : > { %v1227_v10 = vpop.f32.mrf.mxu3  ;;  %v1191_v11 = vpop.f32.mrf.mxu1  ;;  %v1209_v22 = vadd.f32 %v1208_v2, %v1190_v18  ;;  %v1173_v23 = vadd.f32 %v1172_v3, %v319_v21 }
  0xf5   : > { %v1228_v53 = vadd.f32 %v1227_v10, %v1209_v22  ;;  %v1192_v54 = vadd.f32 %v1191_v11, %v1173_v23 }
  0xfa   : > { %v1210_v7 = vpop.f32.mrf.mxu2  ;;  %v1175_v13 = vpop.f32.mrf.mxu0 }
  0xfb   : > { %v1229_v12 = vpop.f32.mrf.mxu3  ;;  %v1194_v8 = vpop.f32.mrf.mxu1  ;;  %v1211_v28 = vadd.f32 %v1210_v7, %v1192_v54  ;;  %v1176_v29 = vadd.f32 %v1175_v13, %v321_v27 }
  0xfd   : > { %v1230_v33 = vadd.f32 %v1229_v12, %v1211_v28  ;;  %v1195_v34 = vadd.f32 %v1194_v8, %v1176_v29 }
 0x102   : > { %v1213_v16 = vpop.f32.mrf.mxu2  ;;  %v1177_v19 = vpop.f32.mrf.mxu0 }
 0x103   : > { %v1232_v17 = vpop.f32.mrf.mxu3  ;;  %v1196_v20 = vpop.f32.mrf.mxu1  ;;  %v1214_v41 = vadd.f32 %v1213_v16, %v1195_v34  ;;  %v1178_v45 = vadd.f32 %v1177_v19, %v323_v40 }
 0x105   : > { %v1233_v55 = vadd.f32 %v1232_v17, %v1214_v41  ;;  %v1197_v62 = vadd.f32 %v1196_v20, %v1178_v45 }
 0x10a   : > { %v1215_v24 = vpop.f32.mrf.mxu2  ;;  %v1246_v25 = vpop.f32.mrf.mxu0 }
 0x10b   : > { %v1234_v48 = vpop.f32.mrf.mxu3  ;;  %v1265_v26 = vpop.f32.mrf.mxu1  ;;  %v1247_v57 = vadd.f32 %v1246_v25, %v1228_v53  ;;  %v1216_v6 = vadd.f32 %v1215_v24, %v1197_v62 }
 0x10d   : > { %v1266_v30 = vadd.f32 %v1265_v26, %v1247_v57  ;;  %v1235_v52 = vadd.f32 %v1234_v48, %v1216_v6 }
 0x112   : > { %v1284_v31 = vpop.f32.mrf.mxu2  ;;  %v1248_v36 = vpop.f32.mrf.mxu0 }
 0x113   : > { %v1303_v32 = vpop.f32.mrf.mxu3  ;;  %v1285_v35 = vadd.f32 %v1284_v31, %v1266_v30  ;;  %v1267_v37 = vpop.f32.mrf.mxu1  ;;  %v1249_v39 = vadd.f32 %v1248_v36, %v1230_v33 }
 0x115   : > { %v1304_v38 = vadd.f32 %v1303_v32, %v1285_v35  ;;  %v1268_v46 = vadd.f32 %v1267_v37, %v1249_v39 }
 0x117   : > { %v1313_v44 = vpack.c.bf16 %v1304_v38, %v2964_v42 }
 0x119   : > { %1317 = vst [vmem:[%s2988_s26] sm:$0xff] %v1313_v44 }
 0x11a   : > { %v1286_v50 = vpop.f32.mrf.mxu2  ;;  %v1251_v61 = vpop.f32.mrf.mxu0 }
 0x11b   : > { %v1305_v51 = vpop.f32.mrf.mxu3  ;;  %v1287_v56 = vadd.f32 %v1286_v50, %v1268_v46  ;;  %v1252_v4 = vadd.f32 %v1251_v61, %v1233_v55  ;;  %v1270_v5 = vpop.f32.mrf.mxu1 }
 0x11d   : > { %v1306_v1 = vadd.f32 %v1305_v51, %v1287_v56  ;;  %v1271_v9 = vadd.f32 %v1270_v5, %v1252_v4 }
 0x11f   : > { %v1314_v43 = vpack.c.bf16 %v1306_v1, %v2966_v60 }
 0x121   : > { %1318 = vst [vmem:[%s2988_s26 + $0x8] sm:$0xff] %v1314_v43 }
 0x122   : > { %v1289_v49 = vpop.f32.mrf.mxu2  ;;  %v1253_v59 = vpop.f32.mrf.mxu0 }
 0x123   : > { %v1308_v42 = vpop.f32.mrf.mxu3  ;;  %v1290_v58 = vadd.f32 %v1289_v49, %v1271_v9  ;;  %v1254_v2 = vadd.f32 %v1253_v59, %v1235_v52  ;;  %v1272_v3 = vpop.f32.mrf.mxu1 }
 0x125   : > { %v1309_v63 = vadd.f32 %v1308_v42, %v1290_v58  ;;  %v1273_v11 = vadd.f32 %v1272_v3, %v1254_v2 }
 0x127   : > { %v1315_v10 = vpack.c.bf16 %v1309_v63, %v2968_v47 }
 0x129   : > { %1319 = vst [vmem:[%s2988_s26 + $0x10] sm:$0xff] %v1315_v10 }
 0x12a   : > { %v1291_v7 = vpop.f32.mrf.mxu2 }
 0x12b   : > { %v1292_v12 = vadd.f32 %v1291_v7, %v1273_v11  ;;  %v1310_v13 = vpop.f32.mrf.mxu3 }
 0x12d   : > { %v1311_v8 = vadd.f32 %v1310_v13, %v1292_v12 }
 0x12f   : > { %v1316_v60 = vpack.c.bf16 %v1311_v8, %v2970_v0 }
 0x131   : > { %1320 = vst [vmem:[%s2988_s26 + $0x18] sm:$0xff] %v1316_v60 }
 0x132 PF: > { %s13_s12 = sadd.s32 1, %s2092_s12  }
 0x133   : > { %p10_p4 = scmp.ge.s32.totalorder %s13_s12, 4  }
 0x135   :  { %12 = sbr.rel (!%p10_p4) target bundleno = 1 (0x1), region = 62 }

// kernel: conv_block_forward.9
= control target key start
LH: loop header
LB: loop body
LE: loop exit
PB: predicated region body
PF: predicated region fallthrough
CT: control target
= control target key end

     0   :  { %s307_s6 = smov 0   ;;  %s337_s0 = inlined_call_operand.vmem [shape: bf16[192,128], index: 0, kind: input, shape index: {}]   ;;  %s338_s1 = inlined_call_operand.vmem [shape: f32[2,2,128], index: 1, kind: output, shape index: {}]  }
   0x1 LB: > { %s313_s7 = sadd.s32 4294967295, %s295_s6   ;;  %p247_p0 = scmp.ge.s32.totalorder %s295_s6, 1  ;;  %s295_s6 = sphi %s307_s6, %s11_s6  }
   0x2   : > { %p88_p1 = scmp.lt.s32.totalorder %s295_s6, 3 }
   0x4   : > { %p89_p2 = pnand %p247_p0, %p88_p1 }
   0x5   : > { %s107_s8 = smul.u32 (!%p89_p2), 12, %s313_s7  ;;  %p113_p4 = scmp.lt.s32.totalorder (!%p89_p2), %s313_s7, 1 }
   0x6   : > { %92 = sbr.rel (%p89_p2) target bundleno = 55 (0x37), region = 24 }
   0x7   : > { %p108_p3 = scmp.lt.s32.totalorder (!%p89_p2), %s107_s8, 23 }
   0xb   : > { %s340_s8 = smov (!%p108_p3, %s107_s8), 23  ;;  %s342_s7 = smov (!%p113_p4, %s313_s7), 1  ;;  %vm187_vm0 = vcmask 1040384  }
   0xc   : > { %s248_s9 = sshll.u32 %s340_s8, 2  ;;  %s249_s13 = sshll.u32 %s342_s7, 1 }
   0xd   : > { %s321_s12 = scalar_lea.vmem %s337_s0, %s248_s9  ;;  %s116_s16 = scalar_lea.vmem %s338_s1, %s249_s13 }
   0xe   : > { %v253_v0 = vld [vmem:[%s321_s12] sm:$0xff]   ;;  %v276_v1 = vld [vmem:[%s321_s12 + $0x8] sm:$0xff]   ;;  %v277_v5 = vld [vmem:[%s321_s12 + $0x10] sm:$0xff]  }
   0xf   : > { %v254_v2 = vunpack.c.l.bf16 %v253_v0  ;;  %v255_v3 = vunpack.c.h.bf16 %v253_v0  ;;  %v258_v4 = vunpack.c.l.bf16 %v276_v1  ;;  %v259_v6 = vunpack.c.h.bf16 %v276_v1  ;;  %v278_v12 = vld [vmem:[%s321_s12 + $0x18] sm:$0xff]   ;;  %v279_v21 = vld [vmem:[%s321_s12 + $0x20] sm:$0xff]   ;;  %v280_v30 = vld [vmem:[%s321_s12 + $0x28] sm:$0xff]  }
  0x10   : > { %v262_v10 = vunpack.c.l.bf16 %v277_v5  ;;  %v263_v14 = vunpack.c.h.bf16 %v277_v5  ;;  %v266_v18 = vunpack.c.l.bf16 %v278_v12  ;;  %v267_v23 = vunpack.c.h.bf16 %v278_v12 }
  0x11   : > { %v141_v7 = vadd.f32 %v255_v3, %v254_v2  ;;  %v158_v8 = vmul.f32 %v254_v2, %v254_v2  ;;  %v159_v9 = vmul.f32 %v255_v3, %v255_v3  ;;  %v160_v11 = vmul.f32 %v258_v4, %v258_v4 }
  0x12   : > { %v161_v15 = vmul.f32 %v259_v6, %v259_v6  ;;  %v162_v19 = vmul.f32 %v262_v10, %v262_v10  ;;  %v163_v24 = vmul.f32 %v263_v14, %v263_v14  ;;  %v270_v27 = vunpack.c.l.bf16 %v279_v21 }
  0x13   : > { %v142_v13 = vadd.f32 %v258_v4, %v141_v7  ;;  %v170_v16 = vadd.f32 %v159_v9, %v158_v8  ;;  %v164_v28 = vmul.f32 %v266_v18, %v266_v18  ;;  %v271_v32 = vunpack.c.h.bf16 %v279_v21 }
  0x14   : > { %v165_v33 = vmul.f32 %v267_v23, %v267_v23  ;;  %v274_v36 = vunpack.c.l.bf16 %v280_v30  ;;  %v166_v37 = vmul.f32 %v270_v27, %v270_v27  ;;  %v275_v40 = vunpack.c.h.bf16 %v280_v30 }
  0x15   : > { %v143_v17 = vadd.f32 %v259_v6, %v142_v13  ;;  %v171_v20 = vadd.f32 %v170_v16, %v160_v11  ;;  %v167_v41 = vmul.f32 %v271_v32, %v271_v32 }
  0x16   : > { %v168_v44 = vmul.f32 %v274_v36, %v274_v36  ;;  %v169_v47 = vmul.f32 %v275_v40, %v275_v40 }
  0x17   : > { %v144_v22 = vadd.f32 %v262_v10, %v143_v17  ;;  %v172_v25 = vadd.f32 %v171_v20, %v161_v15 }
  0x19   : > { %v145_v26 = vadd.f32 %v263_v14, %v144_v22  ;;  %v173_v29 = vadd.f32 %v172_v25, %v162_v19 }
  0x1b   : > { %v146_v31 = vadd.f32 %v266_v18, %v145_v26  ;;  %v174_v34 = vadd.f32 %v173_v29, %v163_v24 }
  0x1d   : > { %v147_v35 = vadd.f32 %v267_v23, %v146_v31  ;;  %v175_v38 = vadd.f32 %v174_v34, %v164_v28 }
  0x1f   : > { %v148_v39 = vadd.f32 %v270_v27, %v147_v35  ;;  %v176_v42 = vadd.f32 %v175_v38, %v165_v33 }
  0x21   : > { %v149_v43 = vadd.f32 %v271_v32, %v148_v39  ;;  %v177_v45 = vadd.f32 %v176_v42, %v166_v37 }
  0x23   : > { %v150_v46 = vadd.f32 %v274_v36, %v149_v43  ;;  %v178_v48 = vadd.f32 %v177_v45, %v167_v41 }
  0x25   : > { %v151_v49 = vadd.f32 %v275_v40, %v150_v46  ;;  %v179_v50 = vadd.f32 %v178_v48, %v168_v44 }
  0x27   : > { %v152_v51 = vrot.slane %v151_v49, 4  ;;  %v180_v52 = vadd.f32 %v179_v50, %v169_v47 }
  0x29   : > { %v153_v53 = vadd.f32 %v152_v51, %v151_v49  ;;  %v181_v54 = vrot.slane %v180_v52, 4 }
  0x2b   : > { %v154_v55 = vrot.slane %v153_v53, 2  ;;  %v182_v56 = vadd.f32 %v181_v54, %v180_v52 }
  0x2d   : > { %v155_v57 = vadd.f32 %v154_v55, %v153_v53  ;;  %v183_v58 = vrot.slane %v182_v56, 2 }
  0x2f   : > { %v156_v59 = vrot.slane %v155_v57, 1  ;;  %v184_v60 = vadd.f32 %v183_v58, %v182_v56 }
  0x31   : > { %v157_v61 = vadd.f32 %v156_v59, %v155_v57  ;;  %v185_v62 = vrot.slane %v184_v60, 1 }
  0x33   : > { %v186_v63 = vadd.f32 %v185_v62, %v184_v60 }
  0x35   : > { %v188_v0 = vsel %vm187_vm0, %v157_v61, %v186_v63 }
  0x36   : > { %189 = vst [vmem:[%s116_s16] sm:$0x3] %v188_v0 }
  0x37 PF: > { %s11_s6 = sadd.s32 1, %s295_s6  }
  0x38   : > { %p8_p5 = scmp.ge.s32.totalorder %s11_s6, 4  }
  0x3a   :  { %10 = sbr.rel (!%p8_p5) target bundleno = 1 (0x1), region = 54 }

// kernel: tile.26
= control target key start
LH: loop header
LB: loop body
LE: loop exit
PB: predicated region body
PF: predicated region fallthrough
CT: control target
= control target key end

     0   :  { %s22_s0 = inlined_call_operand.vmem [shape: f32[32], index: 0, kind: input, shape index: {}]   ;;  %s23_s1 = inlined_call_operand.vmem [shape: f32[6,32], index: 1, kind: output, shape index: {}]  }
   0x1   :  { %v4_v0 = vld [vmem:[%s22_s0] ss:$0 sm:$0xff] }
   0x2   :  { %5 = vst [vmem:[%s23_s1] sm:$0xff] %v4_v0 }

// kernel: mul.25
= control target key start
LH: loop header
LB: loop body
LE: loop exit
PB: predicated region body
PF: predicated region fallthrough
CT: control target
= control target key end

     0   :  { %s37_s8 = smov 96   ;;  %s19_s9 = smov 3  ;;  %vm4_vm0 = vcmask 261120   ;;  %vm10_vm1 = vcmask 1048320   ;;  %vm16_vm2 = vcmask 785920   ;;  %vm23_vm3 = vcmask 523520   ;;  %s65_s0 = inlined_call_operand.vmem [shape: f32[6,32], index: 0, kind: input, shape index: {}]   ;;  %s66_s1 = inlined_call_operand.vmem [shape: f32[192], index: 1, kind: output, shape index: {}]  }
   0x1   :  { %v31_v0 = vld [vmem:[%s65_s0 + $0x3] sm:$0x1]   ;;  %v33_v1 = vld [vmem:[%s65_s0 + $0x1] ss:$4 sm:%s19_s9]   ;;  %s38_s12 = smov 32   ;;  %s39_s15 = smov 64  }
   0x2   :  { %8 = vrot.lane.b32.xlu0 %v31_v0, %s37_s8  ;;  %21 = vrot.lane.b32.xlu1 %v33_v1, %s38_s12  ;;  %v32_v2 = vld [vmem:[%s65_s0 + $0x2] sm:$0x1]   ;;  %s2_s16 = smov 3 }
   0x3   :  { %v3_v3 = vld [vmem:[%s65_s0] ss:$4 sm:%s2_s16]  }
   0x4   :  { %5 = vst.msk [vmem:[#allocation0] sm:$0x3] %vm4_vm0, %v3_v3  }
   0xa   :  { %14 = vrot.lane.b32.xlu0 %v32_v2, %s39_s15 }
  0x74   :  { %v9_v4 = vpop.permute.xlu0 %8   ;;  %v22_v5 = vpop.permute.xlu1 %21  }
  0x75   :  { %11 = vst.msk [vmem:[#allocation0] sm:$0x1] %vm10_vm1, %v9_v4  }
  0x7c   :  { %v15_v6 = vpop.permute.xlu0 %14  }
  0x7d   :  { %17 = vst.msk [vmem:[#allocation0] sm:$0x1] %vm16_vm2, %v15_v6  }
  0x7e   :  { %24 = vst.msk [vmem:[#allocation0] sm:$0x3] %vm23_vm3, %v22_v5  }
  0x85   :  { %v27_v7 = vld [vmem:[#allocation0] sm:$0x3] }
  0x86   :  { %30 = vst [vmem:[%s66_s1] sm:$0x3] %v27_v7 }

// kernel: conv_block_forward.10
= control target key start
LH: loop header
LB: loop body
LE: loop exit
PB: predicated region body
PF: predicated region fallthrough
CT: control target
= control target key end

     0   :  { %s623_s12 = smov 0   ;;  %s718_s0 = inlined_call_operand.vmem [shape: bf16[128,192], index: 0, kind: input, shape index: {}]   ;;  %s719_s1 = inlined_call_operand.vmem [shape: bf16[192,128], index: 1, kind: input, shape index: {}]   ;;  %s720_s2 = inlined_call_operand.vmem [shape: f32[1,128], index: 2, kind: input, shape index: {}]   ;;  %s721_s3 = inlined_call_operand.vmem [shape: f32[128,128], index: 3, kind: output, shape index: {}]  }
   0x1 LB: > { %s457_s13 = sadd.s32 4294967295, %s601_s12   ;;  %p461_p0 = scmp.ge.s32.totalorder %s601_s12, 1  ;;  %s601_s12 = sphi %s623_s12, %s13_s12  }
   0x2   : > { %p139_p1 = scmp.lt.s32.totalorder %s601_s12, 3 }
   0x4   : > { %p140_p2 = pnand %p461_p0, %p139_p1 }
   0x5   : > { %s462_s18 = sshll.u32 (!%p140_p2), %s457_s13, 3 }
   0x6   : > { %143 = sbr.rel (%p140_p2) target bundleno = 205 (0xcd), region = 32  ;;  %p165_p3 = scmp.lt.s32.totalorder (!%p140_p2), %s462_s18, 15 }
   0xb   : > { %v569_v0 = vld [vmem:[%s719_s1 + $0x38] sm:$0xff]  ;;  %v568_v2 = vld [vmem:[%s719_s1 + $0x30] sm:$0xff]  ;;  %s723_s18 = smov (!%p165_p3, %s462_s18), 15  ;;  %v567_v4 = vld [vmem:[%s719_s1 + $0x28] sm:$0xff]  ;;  %vm322_vm0 = vcmask 523264  }
   0xc   : > { %v573_v1 = vld [vmem:[%s719_s1 + $0x58] sm:$0xff]  ;;  %335 = vmatpush.bf16.msra.mxu0 %v569_v0  ;;  %574 = vmatpush.bf16.msra.mxu2 %v569_v0  ;;  %v572_v3 = vld [vmem:[%s719_s1 + $0x50] sm:$0xff]  ;;  %s553_s23 = sshll.u32 %s723_s18, 3  ;;  %v571_v5 = vld [vmem:[%s719_s1 + $0x48] sm:$0xff] }
   0xd   : > { %582 = vmatpush.bf16.msra.mxu3 %v573_v1  ;;  %368 = vmatpush.bf16.msra.mxu1 %v573_v1  ;;  %s657_s30 = scalar_lea.vmem %s718_s0, %s553_s23  ;;  %v566_v6 = vld [vmem:[%s719_s1 + $0x20] sm:$0xff]  ;;  %v565_v13 = vld [vmem:[%s719_s1 + $0x18] sm:$0xff]  ;;  %v564_v15 = vld [vmem:[%s719_s1 + $0x10] sm:$0xff]  ;;  %s705_s22 = scalar_lea.vmem %s721_s3, %s553_s23 }
   0xe   : > { %v570_v7 = vld [vmem:[%s719_s1 + $0x40] sm:$0xff]  ;;  %v556_v8 = vld [vmem:[%s657_s30 + $0x14] sm:$0xf]  ;;  %v479_v9 = vld [vmem:[%s657_s30 + $0x18] sm:$0xf0] }
   0xf   : > { %v554_v10 = vld [vmem:[%s657_s30 + $0x4] sm:$0xf]  ;;  %v471_v11 = vld [vmem:[%s657_s30 + $0x8] sm:$0xf0]  ;;  %v482_v12 = vor.u32 %v556_v8, %v479_v9  ;;  %v469_v18 = vld [vmem:[%s657_s30] sm:$0xf] }
  0x10   : > { %336 = vmatpush.bf16.msra.mxu0 %v568_v2  ;;  %575 = vmatpush.bf16.msra.mxu2 %v568_v2  ;;  %v474_v14 = vor.u32 %v554_v10, %v471_v11  ;;  %v563_v16 = vld [vmem:[%s719_s1 + $0x8] sm:$0xff]  ;;  %v562_v17 = vld [vmem:[%s719_s1] sm:$0xff]  ;;  %v477_v27 = vld [vmem:[%s657_s30 + $0x10] sm:$0xf] }
  0x11   : > { %583 = vmatpush.bf16.msra.mxu3 %v572_v3  ;;  %369 = vmatpush.bf16.msra.mxu1 %v572_v3  ;;  %v555_v19 = vld [vmem:[%s657_s30 + $0x4] sm:$0xf0]  ;;  %v485_v20 = vld [vmem:[%s657_s30 + $0x20] sm:$0xf]  ;;  %v558_v22 = vld [vmem:[%s657_s30 + $0x24] sm:$0xf] }
  0x12   : > { %v559_v21 = vld [vmem:[%s657_s30 + $0x24] sm:$0xf0]  ;;  %v487_v23 = vld [vmem:[%s657_s30 + $0x28] sm:$0xf0]  ;;  %v470_v24 = vor.u32 %v555_v19, %v469_v18  ;;  %v557_v28 = vld [vmem:[%s657_s30 + $0x14] sm:$0xf0] }
  0x13   : > { %v486_v25 = vor.u32 %v559_v21, %v485_v20  ;;  %v490_v26 = vor.u32 %v558_v22, %v487_v23  ;;  %v493_v29 = vld [vmem:[%s657_s30 + $0x30] sm:$0xf]  ;;  %v561_v30 = vld [vmem:[%s657_s30 + $0x34] sm:$0xf0]  ;;  %v560_v31 = vld [vmem:[%s657_s30 + $0x34] sm:$0xf]  ;;  %v478_v33 = vor.u32 %v557_v28, %v477_v27 }
  0x14   : > { %337 = vmatpush.bf16.msra.mxu0 %v567_v4  ;;  %576 = vmatpush.bf16.msra.mxu2 %v567_v4  ;;  %v495_v32 = vld [vmem:[%s657_s30 + $0x38] sm:$0xf0]  ;;  %v494_v34 = vor.u32 %v561_v30, %v493_v29  ;;  %v594_v37 = vld [vmem:[%s720_s2] ss:$0 sm:$0xff] }
  0x15   : > { %584 = vmatpush.bf16.msra.mxu3 %v571_v5  ;;  %370 = vmatpush.bf16.msra.mxu1 %v571_v5  ;;  %v498_v35 = vor.u32 %v560_v31, %v495_v32 }
  0x18   : > { %338 = vmatpush.bf16.msra.mxu0 %v566_v6  ;;  %577 = vmatpush.bf16.msra.mxu2 %v566_v6 }
  0x19   : > { %585 = vmatpush.bf16.msra.mxu3 %v570_v7  ;;  %371 = vmatpush.bf16.msra.mxu1 %v570_v7 }
  0x1c   : > { %548 = vmatmul.msk.bf16.vlgmr.msra.gmra.mxu3 %vm322_vm0, %v482_v12  ;;  %339 = vmatpush.bf16.msra.mxu0 %v565_v13 }
  0x1d   : > { %578 = vmatpush.bf16.msra.mxu2 %v565_v13  ;;  %547 = vmatmul.msk.bf16.vlgmr.msra.gmra.mxu1 %vm322_vm0, %v474_v14 }
  0x20   : > { %340 = vmatpush.bf16.msra.mxu0 %v564_v15 }
  0x21   : > { %579 = vmatpush.bf16.msra.mxu2 %v564_v15 }
  0x24   : > { %341 = vmatpush.bf16.msra.mxu0 %v563_v16 }
  0x25   : > { %580 = vmatpush.bf16.msra.mxu2 %v563_v16 }
  0x28   : > { %342 = vmatpush.bf16.msra.mxu0 %v562_v17 }
  0x29   : > { %581 = vmatpush.bf16.msra.mxu2 %v562_v17 }
  0x2b   : > { %343 = vmatmul.bf16.vlgmr.msra.gmra.mxu0 %v470_v24 }
  0x2c   : > { %353 = vmatmul.bf16.vlgmr.msra.gmra.mxu2 %v486_v25  ;;  %549 = vmatmul.msk.bf16.gmra.mxu3 %vm322_vm0, %v490_v26 }
  0x3b   : > { %348 = vmatmul.bf16.gmra.mxu0 %v478_v33 }
  0x3c   : > { %358 = vmatmul.bf16.gmra.mxu2 %v494_v34  ;;  %550 = vmatmul.msk.bf16.gmra.mxu3 %vm322_vm0, %v498_v35 }
  0x9a   : > { %v373_v38 = vpop.f32.mrf.mxu1 }
  0x9f   : > { %v378_v36 = vpop.f32.mrf.mxu3 }
  0xa2   : > { %v375_v47 = vpop.f32.mrf.mxu1 }
  0xa7   : > { %v380_v39 = vpop.f32.mrf.mxu3 }
  0xa8   : > { %v344_v40 = vpop.f32.mrf.mxu0 }
  0xa9   : > { %v345_v41 = vadd.f32 %v594_v37, %v344_v40 }
  0xab   : > { %v374_v42 = vadd.f32 %v373_v38, %v345_v41 }
  0xad   : > { %393 = vst [vmem:[%s705_s22] sm:$0xff] %v374_v42 }
  0xaf   : > { %v354_v43 = vpop.f32.mrf.mxu2  ;;  %v383_v44 = vpop.f32.mrf.mxu3 }
  0xb0   : > { %v355_v45 = vadd.f32 %v594_v37, %v354_v43  ;;  %v346_v46 = vpop.f32.mrf.mxu0 }
  0xb1   : > { %v347_v48 = vadd.f32 %v594_v37, %v346_v46 }
  0xb2   : > { %v384_v49 = vadd.f32 %v383_v44, %v355_v45 }
  0xb3   : > { %v376_v50 = vadd.f32 %v375_v47, %v347_v48 }
  0xb4   : > { %397 = vst [vmem:[%s705_s22 + $0x20] sm:$0xff] %v384_v49 }
  0xb5   : > { %394 = vst [vmem:[%s705_s22 + $0x8] sm:$0xff] %v376_v50 }
  0xb7   : > { %v356_v51 = vpop.f32.mrf.mxu2  ;;  %v385_v52 = vpop.f32.mrf.mxu3 }
  0xb8   : > { %v357_v53 = vadd.f32 %v594_v37, %v356_v51  ;;  %v349_v54 = vpop.f32.mrf.mxu0 }
  0xb9   : > { %v350_v55 = vadd.f32 %v594_v37, %v349_v54 }
  0xba   : > { %v386_v56 = vadd.f32 %v385_v52, %v357_v53 }
  0xbb   : > { %v379_v57 = vadd.f32 %v378_v36, %v350_v55 }
  0xbc   : > { %398 = vst [vmem:[%s705_s22 + $0x28] sm:$0xff] %v386_v56 }
  0xbd   : > { %395 = vst [vmem:[%s705_s22 + $0x10] sm:$0xff] %v379_v57 }
  0xbf   : > { %v359_v58 = vpop.f32.mrf.mxu2  ;;  %v388_v59 = vpop.f32.mrf.mxu3 }
  0xc0   : > { %v360_v60 = vadd.f32 %v594_v37, %v359_v58  ;;  %v351_v61 = vpop.f32.mrf.mxu0 }
  0xc1   : > { %v352_v62 = vadd.f32 %v594_v37, %v351_v61 }
  0xc2   : > { %v389_v63 = vadd.f32 %v388_v59, %v360_v60 }
  0xc3   : > { %v381_v0 = vadd.f32 %v380_v39, %v352_v62 }
  0xc4   : > { %399 = vst [vmem:[%s705_s22 + $0x30] sm:$0xff] %v389_v63 }
  0xc5   : > { %396 = vst [vmem:[%s705_s22 + $0x18] sm:$0xff] %v381_v0 }
  0xc7   : > { %v361_v1 = vpop.f32.mrf.mxu2  ;;  %v390_v3 = vpop.f32.mrf.mxu3 }
  0xc8   : > { %v362_v2 = vadd.f32 %v594_v37, %v361_v1 }
  0xca   : > { %v391_v4 = vadd.f32 %v390_v3, %v362_v2 }
  0xcc   : > { %400 = vst [vmem:[%s705_s22 + $0x38] sm:$0xff] %v391_v4 }
  0xcd PF: > { %s13_s12 = sadd.s32 1, %s601_s12  }
  0xce   : > { %p10_p4 = scmp.ge.s32.totalorder %s13_s12, 4  }
  0xd0   :  { %12 = sbr.rel (!%p10_p4) target bundleno = 1 (0x1), region = 62 }

// kernel: conv_block_forward.11
= control target key start
LH: loop header
LB: loop body
LE: loop exit
PB: predicated region body
PF: predicated region fallthrough
CT: control target
= control target key end

     0   :  { %s1988_s27 = smov 0   ;;  %s2787_s0 = inlined_call_operand.vmem [shape: f32[128,128], index: 0, kind: input, shape index: {}]   ;;  %s2788_s1 = inlined_call_operand.vmem [shape: f32[128,128], index: 1, kind: input, shape index: {}]   ;;  %s2789_s2 = inlined_call_operand.vmem [shape: f32[1,128], index: 2, kind: input, shape index: {}]   ;;  %s2790_s3 = inlined_call_operand.vmem [shape: f32[1,128], index: 3, kind: input, shape index: {}]   ;;  %s2791_s4 = inlined_call_operand.vmem [shape: bf16[128,256], index: 4, kind: input, shape index: {}]   ;;  %s2792_s5 = inlined_call_operand.vmem [shape: f32[1,256], index: 5, kind: input, shape index: {}]   ;;  %s2793_s6 = inlined_call_operand.vmem [shape: bf16[256,128], index: 6, kind: input, shape index: {}]   ;;  %s2794_s7 = inlined_call_operand.vmem [shape: f32[1,128], index: 7, kind: input, shape index: {}]   ;;  %s2795_s8 = inlined_call_operand.vmem [shape: f32[128,128], index: 8, kind: output, shape index: {}]  }
   0x1 LB: > { %s1601_s28 = sadd.s32 4294967295, %s1941_s27   ;;  %p1605_p0 = scmp.ge.s32.totalorder %s1941_s27, 1  ;;  %s1941_s27 = sphi %s1988_s27, %s18_s27  }
   0x2   : > { %p263_p1 = scmp.lt.s32.totalorder %s1941_s27, 3 }
   0x4   : > { %p264_p2 = pnand %p1605_p0, %p263_p1 }
   0x6   : > { %267 = sbr.rel (%p264_p2) target bundleno = 781 (0x30d), region = 52 }
   0xb   : > { %v332_v0 = vld [vmem:[%s2788_s1 + $0x78] sm:$0xff]  ;;  %v331_v1 = vld [vmem:[%s2788_s1 + $0x70] sm:$0xff]  ;;  %v330_v2 = vld [vmem:[%s2788_s1 + $0x68] sm:$0xff]  ;;  %s1606_s23 = sshll.u32 %s1601_s28, 3 }
   0xc   : > { %333 = vmatpush.msra.mxu0 %v332_v0  ;;  %1772 = vmatpush.msra.mxu2 %v332_v0  ;;  %v329_v3 = vld [vmem:[%s2788_s1 + $0x60] sm:$0xff]  ;;  %v328_v4 = vld [vmem:[%s2788_s1 + $0x58] sm:$0xff]  ;;  %v327_v5 = vld [vmem:[%s2788_s1 + $0x50] sm:$0xff]  ;;  %p298_p3 = scmp.lt.s32.totalorder %s1606_s23, 15 }
   0xd   : > { %390 = vmatpush.msra.mxu1 %v332_v0  ;;  %1788 = vmatpush.msra.mxu3 %v332_v0  ;;  %v326_v6 = vld [vmem:[%s2788_s1 + $0x48] sm:$0xff]  ;;  %v325_v7 = vld [vmem:[%s2788_s1 + $0x40] sm:$0xff]  ;;  %v324_v8 = vld [vmem:[%s2788_s1 + $0x38] sm:$0xff] }
   0xe   : > { %334 = vmatpush.msra.mxu0 %v331_v1  ;;  %1773 = vmatpush.msra.mxu2 %v331_v1  ;;  %v323_v9 = vld [vmem:[%s2788_s1 + $0x30] sm:$0xff]  ;;  %v322_v10 = vld [vmem:[%s2788_s1 + $0x28] sm:$0xff]  ;;  %s2817_s23 = smov (!%p298_p3, %s1606_s23), 15  ;;  %v321_v11 = vld [vmem:[%s2788_s1 + $0x20] sm:$0xff] }
   0xf   : > { %391 = vmatpush.msra.mxu1 %v331_v1  ;;  %1789 = vmatpush.msra.mxu3 %v331_v1  ;;  %v320_v12 = vld [vmem:[%s2788_s1 + $0x18] sm:$0xff]  ;;  %s1607_s13 = sshll.u32 %s2817_s23, 3  ;;  %v319_v13 = vld [vmem:[%s2788_s1 + $0x10] sm:$0xff]  ;;  %v318_v14 = vld [vmem:[%s2788_s1 + $0x8] sm:$0xff] }
  0x10   : > { %335 = vmatpush.msra.mxu0 %v330_v2  ;;  %1774 = vmatpush.msra.mxu2 %v330_v2  ;;  %s2051_s20 = scalar_lea.vmem %s2787_s0, %s1607_s13  ;;  %v317_v15 = vld [vmem:[%s2788_s1] sm:$0xff]  ;;  %v1668_v48 = vld [vmem:[%s2791_s4 + $0x70] sm:$0xf]  ;;  %v1755_v49 = vld [vmem:[%s2791_s4 + $0x74] sm:$0xf0]  ;;  %s2710_s21 = scalar_lea.vmem %s2795_s8, %s1607_s13 }
  0x11   : > { %392 = vmatpush.msra.mxu1 %v330_v2  ;;  %1790 = vmatpush.msra.mxu3 %v330_v2  ;;  %v309_v16 = vld [vmem:[%s2051_s20] sm:$0xff]  ;;  %v310_v18 = vld [vmem:[%s2051_s20 + $0x8] sm:$0xff]  ;;  %v311_v20 = vld [vmem:[%s2051_s20 + $0x10] sm:$0xff]  ;;  %v1669_v51 = vor.u32 %v1755_v49, %v1668_v48 }
  0x12   : > { %336 = vmatpush.msra.mxu0 %v329_v3  ;;  %1775 = vmatpush.msra.mxu2 %v329_v3  ;;  %v313_v17 = vld [vmem:[%s2051_s20 + $0x20] sm:$0xff]  ;;  %v314_v19 = vld [vmem:[%s2051_s20 + $0x28] sm:$0xff]  ;;  %v315_v21 = vld [vmem:[%s2051_s20 + $0x30] sm:$0xff] }
  0x13   : > { %393 = vmatpush.msra.mxu1 %v329_v3  ;;  %1791 = vmatpush.msra.mxu3 %v329_v3  ;;  %v312_v22 = vld [vmem:[%s2051_s20 + $0x18] sm:$0xff]  ;;  %v1754_v50 = vld [vmem:[%s2791_s4 + $0x74] sm:$0xf]  ;;  %v1660_v54 = vld [vmem:[%s2791_s4 + $0x60] sm:$0xf] }
  0x14   : > { %337 = vmatpush.msra.mxu0 %v328_v4  ;;  %1776 = vmatpush.msra.mxu2 %v328_v4  ;;  %v316_v23 = vld [vmem:[%s2051_s20 + $0x38] sm:$0xff]  ;;  %v1753_v55 = vld [vmem:[%s2791_s4 + $0x64] sm:$0xf0]  ;;  %v1752_v56 = vld [vmem:[%s2791_s4 + $0x64] sm:$0xf] }
  0x15   : > { %394 = vmatpush.msra.mxu1 %v328_v4  ;;  %1792 = vmatpush.msra.mxu3 %v328_v4  ;;  %v1670_v52 = vld [vmem:[%s2791_s4 + $0x78] sm:$0xf0]  ;;  %v1661_v57 = vor.u32 %v1753_v55, %v1660_v54  ;;  %v1662_v58 = vld [vmem:[%s2791_s4 + $0x68] sm:$0xf0]  ;;  %v1652_v60 = vld [vmem:[%s2791_s4 + $0x50] sm:$0xf] }
  0x16   : > { %338 = vmatpush.msra.mxu0 %v327_v5  ;;  %1777 = vmatpush.msra.mxu2 %v327_v5  ;;  %v1673_v53 = vor.u32 %v1754_v50, %v1670_v52  ;;  %v1665_v59 = vor.u32 %v1752_v56, %v1662_v58  ;;  %v1751_v61 = vld [vmem:[%s2791_s4 + $0x54] sm:$0xf0]  ;;  %v1750_v62 = vld [vmem:[%s2791_s4 + $0x54] sm:$0xf]  ;;  %v1654_v0 = vld [vmem:[%s2791_s4 + $0x58] sm:$0xf0] }
  0x17   : > { %395 = vmatpush.msra.mxu1 %v327_v5  ;;  %1793 = vmatpush.msra.mxu3 %v327_v5  ;;  %v1653_v63 = vor.u32 %v1751_v61, %v1652_v60  ;;  %v1657_v1 = vor.u32 %v1750_v62, %v1654_v0  ;;  %v1644_v2 = vld [vmem:[%s2791_s4 + $0x40] sm:$0xf]  ;;  %v1749_v3 = vld [vmem:[%s2791_s4 + $0x44] sm:$0xf0]  ;;  %v1748_v4 = vld [vmem:[%s2791_s4 + $0x44] sm:$0xf] }
  0x18   : > { %339 = vmatpush.msra.mxu0 %v326_v6  ;;  %1778 = vmatpush.msra.mxu2 %v326_v6  ;;  %v1645_v5 = vor.u32 %v1749_v3, %v1644_v2  ;;  %v2202_v2 = vld [vmem:[%s2789_s2] ss:$0 sm:$0xff] }
  0x19   : > { %396 = vmatpush.msra.mxu1 %v326_v6  ;;  %1794 = vmatpush.msra.mxu3 %v326_v6  ;;  %v1646_v6 = vld [vmem:[%s2791_s4 + $0x48] sm:$0xf0] }
  0x1a   : > { %340 = vmatpush.msra.mxu0 %v325_v7  ;;  %1779 = vmatpush.msra.mxu2 %v325_v7 }
  0x1b   : > { %397 = vmatpush.msra.mxu1 %v325_v7  ;;  %1795 = vmatpush.msra.mxu3 %v325_v7  ;;  %v1649_v7 = vor.u32 %v1748_v4, %v1646_v6 }
  0x1c   : > { %341 = vmatpush.msra.mxu0 %v324_v8  ;;  %1780 = vmatpush.msra.mxu2 %v324_v8 }
  0x1d   : > { %398 = vmatpush.msra.mxu1 %v324_v8  ;;  %1796 = vmatpush.msra.mxu3 %v324_v8  ;;  %v1636_v8 = vld [vmem:[%s2791_s4 + $0x30] sm:$0xf] }
  0x1e   : > { %342 = vmatpush.msra.mxu0 %v323_v9  ;;  %1781 = vmatpush.msra.mxu2 %v323_v9 }
  0x1f   : > { %399 = vmatpush.msra.mxu1 %v323_v9  ;;  %1797 = vmatpush.msra.mxu3 %v323_v9  ;;  %v1747_v9 = vld [vmem:[%s2791_s4 + $0x34] sm:$0xf0] }
  0x20   : > { %343 = vmatpush.msra.mxu0 %v322_v10  ;;  %1782 = vmatpush.msra.mxu2 %v322_v10 }
  0x21   : > { %400 = vmatpush.msra.mxu1 %v322_v10  ;;  %1798 = vmatpush.msra.mxu3 %v322_v10  ;;  %v1746_v10 = vld [vmem:[%s2791_s4 + $0x34] sm:$0xf] }
  0x22   : > { %344 = vmatpush.msra.mxu0 %v321_v11  ;;  %1783 = vmatpush.msra.mxu2 %v321_v11 }
  0x23   : > { %401 = vmatpush.msra.mxu1 %v321_v11  ;;  %1799 = vmatpush.msra.mxu3 %v321_v11  ;;  %v1637_v11 = vor.u32 %v1747_v9, %v1636_v8 }
  0x24   : > { %345 = vmatpush.msra.mxu0 %v320_v12  ;;  %1784 = vmatpush.msra.mxu2 %v320_v12 }
  0x25   : > { %402 = vmatpush.msra.mxu1 %v320_v12  ;;  %1800 = vmatpush.msra.mxu3 %v320_v12  ;;  %v1638_v12 = vld [vmem:[%s2791_s4 + $0x38] sm:$0xf0] }
  0x26   : > { %346 = vmatpush.msra.mxu0 %v319_v13  ;;  %1785 = vmatpush.msra.mxu2 %v319_v13 }
  0x27   : > { %403 = vmatpush.msra.mxu1 %v319_v13  ;;  %1801 = vmatpush.msra.mxu3 %v319_v13  ;;  %v1641_v13 = vor.u32 %v1746_v10, %v1638_v12  ;;  %v2211_v10 = vld [vmem:[%s2790_s3] ss:$0 sm:$0xff] }
  0x28   : > { %347 = vmatpush.msra.mxu0 %v318_v14  ;;  %1786 = vmatpush.msra.mxu2 %v318_v14 }
  0x29   : > { %404 = vmatpush.msra.mxu1 %v318_v14  ;;  %1802 = vmatpush.msra.mxu3 %v318_v14  ;;  %v1628_v14 = vld [vmem:[%s2791_s4 + $0x20] sm:$0xf] }
  0x2a   : > { %348 = vmatpush.msra.mxu0 %v317_v15  ;;  %1787 = vmatpush.msra.mxu2 %v317_v15 }
  0x2b   : > { %349 = vmatmul.f32.vlgmr.msra.gmra.mxu0 %v309_v16  ;;  %361 = vmatmul.f32.vlgmr.msra.gmra.mxu2 %v313_v17 }
  0x2c   : > { %405 = vmatpush.msra.mxu1 %v317_v15  ;;  %1803 = vmatpush.msra.mxu3 %v317_v15  ;;  %v1745_v15 = vld [vmem:[%s2791_s4 + $0x24] sm:$0xf0] }
  0x2d   : > { %649 = vmatpush.bf16.msrb.mxu2 %v1669_v51 }
  0x2e   : > { %678 = vmatpush.bf16.msrb.mxu3 %v1673_v53 }
  0x31   : > { %650 = vmatpush.bf16.msrb.mxu2 %v1661_v57 }
  0x32   : > { %679 = vmatpush.bf16.msrb.mxu3 %v1665_v59 }
  0x33   : > { %352 = vmatmul.f32.gmra.mxu0 %v310_v18  ;;  %364 = vmatmul.f32.gmra.mxu2 %v314_v19 }
  0x35   : > { %651 = vmatpush.bf16.msrb.mxu2 %v1653_v63 }
  0x36   : > { %680 = vmatpush.bf16.msrb.mxu3 %v1657_v1 }
  0x39   : > { %652 = vmatpush.bf16.msrb.mxu2 %v1645_v5 }
  0x3a   : > { %681 = vmatpush.bf16.msrb.mxu3 %v1649_v7 }
  0x3b   : > { %355 = vmatmul.f32.gmra.mxu0 %v311_v20  ;;  %367 = vmatmul.f32.gmra.mxu2 %v315_v21 }
  0x3d   : > { %653 = vmatpush.bf16.msrb.mxu2 %v1637_v11 }
  0x3e   : > { %682 = vmatpush.bf16.msrb.mxu3 %v1641_v13 }
  0x43   : > { %358 = vmatmul.f32.gmra.mxu0 %v312_v22  ;;  %370 = vmatmul.f32.gmra.mxu2 %v316_v23 }
  0xa8   : > { %v350_v24 = vpop.f32.mrf.mxu0 }
  0xa9   : > { %v2064_v25 = vsub.f32 %v309_v16, %v350_v24  ;;  %v1744_v16 = vld [vmem:[%s2791_s4 + $0x24] sm:$0xf]  ;;  %v1622_v24 = vld [vmem:[%s2791_s4 + $0x18] sm:$0xf0] }
  0xab   : > { %v382_v26 = vmul.f32 %v2064_v25, %v2064_v25 }
  0xad   : > { %406 = vmatmul.f32.vlgmr.msra.gmra.mxu1 %v382_v26 }
  0xae   : > { %v362_v27 = vpop.f32.mrf.mxu2 }
  0xaf   : > { %v2068_v28 = vsub.f32 %v313_v17, %v362_v27  ;;  %v1629_v17 = vor.u32 %v1745_v15, %v1628_v14  ;;  %v1612_v27 = vld [vmem:[%s2791_s4] sm:$0xf] }
  0xb0   : > { %v353_v29 = vpop.f32.mrf.mxu0 }
  0xb1   : > { %v2070_v30 = vsub.f32 %v310_v18, %v353_v29  ;;  %v386_v31 = vmul.f32 %v2068_v28, %v2068_v28  ;;  %v1630_v18 = vld [vmem:[%s2791_s4 + $0x28] sm:$0xf0]  ;;  %654 = vmatpush.bf16.msrb.mxu2 %v1629_v17  ;;  %v1741_v29 = vld [vmem:[%s2791_s4 + $0x4] sm:$0xf0] }
  0xb3   : > { %418 = vmatmul.f32.vlgmr.msra.gmra.mxu3 %v386_v31  ;;  %v383_v32 = vmul.f32 %v2070_v30, %v2070_v30  ;;  %v1740_v31 = vld [vmem:[%s2791_s4 + $0x4] sm:$0xf] }
  0xb5   : > { %409 = vmatmul.f32.gmra.mxu1 %v383_v32 }
  0xb6   : > { %v365_v33 = vpop.f32.mrf.mxu2 }
  0xb7   : > { %v2076_v34 = vsub.f32 %v314_v19, %v365_v33  ;;  %v1633_v19 = vor.u32 %v1744_v16, %v1630_v18  ;;  %v1613_v33 = vor.u32 %v1741_v29, %v1612_v27 }
  0xb8   : > { %v356_v35 = vpop.f32.mrf.mxu0 }
  0xb9   : > { %v2078_v36 = vsub.f32 %v311_v20, %v356_v35  ;;  %v387_v37 = vmul.f32 %v2076_v34, %v2076_v34  ;;  %683 = vmatpush.bf16.msrb.mxu3 %v1633_v19  ;;  %v1620_v20 = vld [vmem:[%s2791_s4 + $0x10] sm:$0xf]  ;;  %v1614_v35 = vld [vmem:[%s2791_s4 + $0x8] sm:$0xf0] }
  0xbb   : > { %421 = vmatmul.f32.gmra.mxu3 %v387_v37  ;;  %v384_v38 = vmul.f32 %v2078_v36, %v2078_v36 }
  0xbd   : > { %412 = vmatmul.f32.gmra.mxu1 %v384_v38  ;;  %v1617_v38 = vor.u32 %v1740_v31, %v1614_v35 }
  0xbe   : > { %v368_v39 = vpop.f32.mrf.mxu2 }
  0xbf   : > { %v2084_v40 = vsub.f32 %v315_v21, %v368_v39  ;;  %v1743_v21 = vld [vmem:[%s2791_s4 + $0x14] sm:$0xf0] }
  0xc0   : > { %v359_v41 = vpop.f32.mrf.mxu0 }
  0xc1   : > { %v2086_v42 = vsub.f32 %v312_v22, %v359_v41  ;;  %v388_v43 = vmul.f32 %v2084_v40, %v2084_v40  ;;  %v1742_v22 = vld [vmem:[%s2791_s4 + $0x14] sm:$0xf] }
  0xc2   : > { %v1625_v26 = vor.u32 %v1742_v22, %v1622_v24 }
  0xc3   : > { %424 = vmatmul.f32.gmra.mxu3 %v388_v43  ;;  %v385_v44 = vmul.f32 %v2086_v42, %v2086_v42 }
  0xc4   : > { %684 = vmatpush.bf16.msrb.mxu3 %v1625_v26 }
  0xc5   : > { %415 = vmatmul.f32.gmra.mxu1 %v385_v44 }
  0xc6   : > { %v371_v45 = vpop.f32.mrf.mxu2 }
  0xc7   : > { %v2092_v46 = vsub.f32 %v316_v23, %v371_v45  ;;  %v1621_v23 = vor.u32 %v1743_v21, %v1620_v20 }
  0xc8   : > { %685 = vmatpush.bf16.msrb.mxu3 %v1617_v38 }
  0xc9   : > { %v389_v47 = vmul.f32 %v2092_v46, %v2092_v46  ;;  %655 = vmatpush.bf16.msrb.mxu2 %v1621_v23 }
  0xcb   : > { %427 = vmatmul.f32.gmra.mxu3 %v389_v47 }
  0xcd   : > { %656 = vmatpush.bf16.msrb.mxu2 %v1613_v33 }
 0x12a   : > { %v407_v32 = vpop.f32.mrf.mxu1 }
 0x12b   : > { %v408_v37 = vadd.f32 1e-05, %v407_v32 }
 0x12d   : > { %1815 = vrsqrt.f32 %v408_v37  ;;  %vm437_vm1 = vweird.f32 %v408_v37 }
 0x132   : > { %v410_v39 = vpop.f32.mrf.mxu1 }
 0x133   : > { %v1816_v41 = vpop.eup %1815  ;;  %v411_v43 = vadd.f32 1e-05, %v410_v39 }
 0x134   : > { %v432_v44 = vmul.f32 %v1816_v41, %v408_v37  ;;  %vm438_vm0 = vweird.f32 %v1816_v41 }
 0x135   : > { %1817 = vrsqrt.f32 %v411_v43  ;;  %vm439_vm2 = vmor %vm437_vm1, %vm438_vm0  ;;  %vm447_vm4 = vweird.f32 %v411_v43 }
 0x136   : > { %v433_v45 = vmul.f32 %v1816_v41, %v432_v44  ;;  %v419_v47 = vpop.f32.mrf.mxu3 }
 0x137   : > { %v2192_v57 = vadd.f32 1e-05, %v419_v47 }
 0x138   : > { %v434_v48 = vmul.f32 0.5, %v433_v45 }
 0x139   : > { %vm477_vm14 = vweird.f32 %v2192_v57 }
 0x13a   : > { %v435_v49 = vsub.f32 1.5, %v434_v48  ;;  %v413_v50 = vpop.f32.mrf.mxu1 }
 0x13b   : > { %v1818_v51 = vpop.eup %1817  ;;  %v414_v52 = vadd.f32 1e-05, %v413_v50 }
 0x13c   : > { %v436_v53 = vmul.f32 %v1816_v41, %v435_v49  ;;  %v442_v54 = vmul.f32 %v1818_v51, %v411_v43  ;;  %vm448_vm3 = vweird.f32 %v1818_v51 }
 0x13d   : > { %1819 = vrsqrt.f32 %v414_v52  ;;  %vm449_vm5 = vmor %vm447_vm4, %vm448_vm3  ;;  %vm457_vm7 = vweird.f32 %v414_v52 }
 0x13e   : > { %v443_v55 = vmul.f32 %v1818_v51, %v442_v54  ;;  %v422_v56 = vpop.f32.mrf.mxu3  ;;  %v440_v59 = vsel %vm439_vm2, %v1816_v41, %v436_v53 }
 0x13f   : > { %v2194_v58 = vadd.f32 1e-05, %v422_v56  ;;  %v511_v0 = vmul.f32 %v440_v59, %v2064_v25 }
 0x140   : > { %v444_v60 = vmul.f32 0.5, %v443_v55 }
 0x141   : > { %1821 = vrsqrt.f32 %v2194_v58  ;;  %v523_v9 = vmul.f32 %v2202_v2, %v511_v0  ;;  %vm487_vm12 = vweird.f32 %v2194_v58 }
 0x142   : > { %v445_v61 = vsub.f32 1.5, %v444_v60  ;;  %v416_v62 = vpop.f32.mrf.mxu1  ;;  %1823 = vrsqrt.f32 %v2192_v57 }
 0x143   : > { %v1820_v63 = vpop.eup %1819  ;;  %v417_v1 = vadd.f32 1e-05, %v416_v62  ;;  %v535_v17 = vadd.f32 %v2211_v10, %v523_v9 }
 0x144   : > { %v446_v3 = vmul.f32 %v1818_v51, %v445_v61  ;;  %v452_v4 = vmul.f32 %v1820_v63, %v414_v52  ;;  %vm458_vm6 = vweird.f32 %v1820_v63 }
 0x145   : > { %1825 = vrsqrt.f32 %v417_v1  ;;  %vm459_vm8 = vmor %vm457_vm7, %vm458_vm6  ;;  %vm467_vm10 = vweird.f32 %v417_v1 }
 0x146   : > { %v450_v5 = vsel %vm449_vm5, %v1818_v51, %v446_v3  ;;  %v453_v6 = vmul.f32 %v1820_v63, %v452_v4  ;;  %v425_v7 = vpop.f32.mrf.mxu3 }
 0x147   : > { %v2204_v8 = vpop.eup %1821  ;;  %v512_v25 = vmul.f32 %v450_v5, %v2070_v30  ;;  %v426_v26 = vadd.f32 1e-05, %v425_v7 }
 0x148   : > { %v454_v11 = vmul.f32 0.5, %v453_v6  ;;  %v2213_v12 = vpop.eup %1823  ;;  %v482_v15 = vmul.f32 %v2204_v8, %v2194_v58  ;;  %vm488_vm13 = vweird.f32 %v2204_v8 }
 0x149   : > { %v524_v13 = vmul.f32 %v2202_v2, %v512_v25  ;;  %v472_v18 = vmul.f32 %v2213_v12, %v2192_v57  ;;  %vm478_vm15 = vweird.f32 %v2213_v12  ;;  %vm489_vm0 = vmor %vm487_vm12, %vm488_vm13  ;;  %vm497_vm4 = vweird.f32 %v426_v26 }
 0x14a   : > { %v455_v14 = vsub.f32 1.5, %v454_v11  ;;  %v483_v22 = vmul.f32 %v2204_v8, %v482_v15  ;;  %vm479_vm1 = vmor %vm477_vm14, %vm478_vm15 }
 0x14b   : > { %v1826_v16 = vpop.eup %1825  ;;  %v536_v30 = vadd.f32 %v2211_v10, %v524_v13  ;;  %v473_v29 = vmul.f32 %v2213_v12, %v472_v18 }
 0x14c   : > { %v456_v19 = vmul.f32 %v1820_v63, %v455_v14  ;;  %v462_v20 = vmul.f32 %v1826_v16, %v417_v1  ;;  %v484_v33 = vmul.f32 0.5, %v483_v22  ;;  %vm468_vm9 = vweird.f32 %v1826_v16 }
 0x14d   : > { %v543_v21 = vpack.c.bf16 %v536_v30, %v535_v17  ;;  %v474_v38 = vmul.f32 0.5, %v473_v29  ;;  %vm469_vm11 = vmor %vm467_vm10, %vm468_vm9  ;;  %v563_v17 = vld [vmem:[%s2792_s5] sm:$0x3] }
 0x14e   : > { %v463_v23 = vmul.f32 %v1826_v16, %v462_v20  ;;  %v428_v24 = vpop.f32.mrf.mxu3  ;;  %v460_v31 = vsel %vm459_vm8, %v1820_v63, %v456_v19  ;;  %v485_v41 = vsub.f32 1.5, %v484_v33  ;;  %v2253_v30 = vperm.slane %v563_v17, 0 }
 0x14f   : > { %v429_v27 = vadd.f32 1e-05, %v428_v24  ;;  %657 = vmatmul.bf16.vlgmr.msrb.gmra.mxu2 %v543_v21  ;;  %686 = vmatmul.bf16.vlgmr.msrb.gmra.mxu3 %v543_v21  ;;  %v513_v37 = vmul.f32 %v460_v31, %v2078_v36  ;;  %v475_v48 = vsub.f32 1.5, %v474_v38  ;;  %v1770_v24 = vld [vmem:[%s2793_s6 + $0x70] sm:$0xff] }
 0x150   : > { %v464_v32 = vmul.f32 0.5, %v463_v23  ;;  %v486_v36 = vmul.f32 %v2204_v8, %v485_v41  ;;  %v1762_v23 = vld [vmem:[%s2793_s6 + $0x30] sm:$0xff] }
 0x151   : > { %1827 = vrsqrt.f32 %v429_v27  ;;  %v525_v47 = vmul.f32 %v2202_v2, %v513_v37  ;;  %v476_v53 = vmul.f32 %v2213_v12, %v475_v48  ;;  %vm507_vm2 = vweird.f32 %v429_v27 }
 0x152   : > { %v465_v35 = vsub.f32 1.5, %v464_v32  ;;  %1829 = vrsqrt.f32 %v426_v26  ;;  %v490_v56 = vsel %vm489_vm0, %v2204_v8, %v486_v36 }
 0x153   : > { %v480_v57 = vsel %vm479_vm1, %v2213_v12, %v476_v53  ;;  %v516_v60 = vmul.f32 %v490_v56, %v2076_v34  ;;  %v1768_v53 = vld [vmem:[%s2793_s6 + $0x60] sm:$0xff] }
 0x154   : > { %v466_v39 = vmul.f32 %v1826_v16, %v465_v35  ;;  %v515_v62 = vmul.f32 %v480_v57, %v2068_v28 }
 0x155   : > { %v528_v0 = vmul.f32 %v2202_v2, %v516_v60 }
 0x156   : > { %v470_v43 = vsel %vm469_vm11, %v1826_v16, %v466_v39  ;;  %v527_v3 = vmul.f32 %v2202_v2, %v515_v62 }
 0x157   : > { %v1828_v44 = vpop.eup %1827  ;;  %v514_v45 = vmul.f32 %v470_v43, %v2086_v42  ;;  %v537_v42 = vadd.f32 %v2211_v10, %v525_v47  ;;  %v540_v5 = vadd.f32 %v2211_v10, %v528_v0 }
 0x158   : > { %v1830_v49 = vpop.eup %1829  ;;  %v502_v51 = vmul.f32 %v1828_v44, %v429_v27  ;;  %vm508_vm3 = vweird.f32 %v1828_v44  ;;  %v539_v34 = vadd.f32 %v2211_v10, %v527_v3  ;;  %v1767_v3 = vld [vmem:[%s2793_s6 + $0x58] sm:$0xff] }
 0x159   : > { %v526_v50 = vmul.f32 %v2202_v2, %v514_v45  ;;  %v492_v54 = vmul.f32 %v1830_v49, %v426_v26  ;;  %vm498_vm5 = vweird.f32 %v1830_v49  ;;  %vm509_vm6 = vmor %vm507_vm2, %vm508_vm3  ;;  %v1769_v45 = vld [vmem:[%s2793_s6 + $0x68] sm:$0xff] }
 0x15a   : > { %v503_v58 = vmul.f32 %v1828_v44, %v502_v51  ;;  %vm499_vm7 = vmor %vm497_vm4, %vm498_vm5  ;;  %v545_v28 = vpack.c.bf16 %v540_v5, %v539_v34 }
 0x15b   : > { %v538_v52 = vadd.f32 %v2211_v10, %v526_v50  ;;  %v493_v59 = vmul.f32 %v1830_v49, %v492_v54 }
 0x15c   : > { %v504_v61 = vmul.f32 0.5, %v503_v58 }
 0x15d   : > { %v544_v55 = vpack.c.bf16 %v538_v52, %v537_v42  ;;  %v494_v63 = vmul.f32 0.5, %v493_v59  ;;  %v1760_v52 = vld [vmem:[%s2793_s6 + $0x20] sm:$0xff] }
 0x15e   : > { %v505_v1 = vsub.f32 1.5, %v504_v61 }
 0x15f   : > { %662 = vmatmul.bf16.gmra.mxu2 %v544_v55  ;;  %691 = vmatmul.bf16.gmra.mxu3 %v544_v55  ;;  %v495_v4 = vsub.f32 1.5, %v494_v63 }
 0x160   : > { %v506_v6 = vmul.f32 %v1828_v44, %v505_v1  ;;  %v1759_v1 = vld [vmem:[%s2793_s6 + $0x18] sm:$0xff] }
 0x161   : > { %v496_v7 = vmul.f32 %v1830_v49, %v495_v4 }
 0x162   : > { %v510_v8 = vsel %vm509_vm6, %v1828_v44, %v506_v6  ;;  %v1761_v44 = vld [vmem:[%s2793_s6 + $0x28] sm:$0xff] }
 0x163   : > { %v500_v25 = vsel %vm499_vm7, %v1830_v49, %v496_v7  ;;  %v518_v9 = vmul.f32 %v510_v8, %v2092_v46  ;;  %v2255_v46 = vperm.slane %v563_v17, 1 }
 0x164   : > { %v517_v11 = vmul.f32 %v500_v25, %v2084_v40 }
 0x165   : > { %v530_v12 = vmul.f32 %v2202_v2, %v518_v9 }
 0x166   : > { %v529_v13 = vmul.f32 %v2202_v2, %v517_v11  ;;  %v1763_v2 = vld [vmem:[%s2793_s6 + $0x38] sm:$0xff] }
 0x167   : > { %v542_v14 = vadd.f32 %v2211_v10, %v530_v12  ;;  %1263 = vmatpush.bf16.msrb.mxu0 %v1763_v2  ;;  %v1758_v12 = vld [vmem:[%s2793_s6 + $0x10] sm:$0xff] }
 0x168   : > { %v541_v15 = vadd.f32 %v2211_v10, %v529_v13  ;;  %v1771_v10 = vld [vmem:[%s2793_s6 + $0x78] sm:$0xff]  ;;  %v1766_v13 = vld [vmem:[%s2793_s6 + $0x50] sm:$0xff] }
 0x169   : > { %1292 = vmatpush.bf16.msrb.mxu1 %v1771_v10 }
 0x16a   : > { %v546_v16 = vpack.c.bf16 %v542_v14, %v541_v15 }
 0x16b   : > { %1264 = vmatpush.bf16.msrb.mxu0 %v1762_v23 }
 0x16d   : > { %1293 = vmatpush.bf16.msrb.mxu1 %v1770_v24 }
 0x16f   : > { %667 = vmatmul.bf16.gmra.mxu2 %v545_v28  ;;  %696 = vmatmul.bf16.gmra.mxu3 %v545_v28 }
 0x170   : > { %1265 = vmatpush.bf16.msrb.mxu0 %v1761_v44  ;;  %v1757_v44 = vld [vmem:[%s2793_s6 + $0x8] sm:$0xff] }
 0x171   : > { %1294 = vmatpush.bf16.msrb.mxu1 %v1769_v45  ;;  %v1765_v45 = vld [vmem:[%s2793_s6 + $0x48] sm:$0xff] }
 0x174   : > { %1266 = vmatpush.bf16.msrb.mxu0 %v1760_v52 }
 0x175   : > { %1295 = vmatpush.bf16.msrb.mxu1 %v1768_v53 }
 0x178   : > { %1267 = vmatpush.bf16.msrb.mxu0 %v1759_v1 }
 0x179   : > { %1296 = vmatpush.bf16.msrb.mxu1 %v1767_v3 }
 0x17c   : > { %1268 = vmatpush.bf16.msrb.mxu0 %v1758_v12 }
 0x17d   : > { %1297 = vmatpush.bf16.msrb.mxu1 %v1766_v13 }
 0x17f   : > { %672 = vmatmul.bf16.gmra.mxu2 %v546_v16  ;;  %701 = vmatmul.bf16.gmra.mxu3 %v546_v16 }
 0x180   : > { %1269 = vmatpush.bf16.msrb.mxu0 %v1757_v44 }
 0x181   : > { %1298 = vmatpush.bf16.msrb.mxu1 %v1765_v45 }
 0x1d2   : > { %v658_v40 = vpop.f32.mrf.mxu2  ;;  %v687_v18 = vpop.f32.mrf.mxu3 }
 0x1d3   : > { %v2264_v19 = vadd.f32 %v658_v40, %v2253_v30  ;;  %v2267_v20 = vadd.f32 %v687_v18, %v2255_v46 }
 0x1d5   : > { %v2270_v21 = vmul.f32 0.70710677, %v2264_v19  ;;  %v2273_v22 = vmul.f32 0.70710677, %v2267_v20  ;;  %v2389_v12 = vmul.f32 0.5, %v2267_v20 }
 0x1d7   : > { %v723_v26 = vand.u32 2147483647, %v2270_v21  ;;  %v724_v27 = vand.u32 2147483647, %v2273_v22  ;;  %vm1027_vm8 = vcmp.ge.f32.partialorder %v2270_v21, 0.0  ;;  %vm1028_vm9 = vcmp.ge.f32.partialorder %v2273_v22, 0.0 }
 0x1d9   : > { %v739_v29 = vmul.f32 0.3275911, %v723_v26  ;;  %v740_v31 = vmul.f32 0.3275911, %v724_v27  ;;  %v931_v56 = vsub.f32 0.0, %v723_v26  ;;  %v932_v61 = vsub.f32 0.0, %v724_v27 }
 0x1da   : > { %v660_v32 = vpop.f32.mrf.mxu2  ;;  %v689_v33 = vpop.f32.mrf.mxu3 }
 0x1db   : > { %v755_v35 = vadd.f32 1.0, %v739_v29  ;;  %v756_v37 = vadd.f32 1.0, %v740_v31  ;;  %v2284_v38 = vadd.f32 %v660_v32, %v2253_v30  ;;  %v2287_v39 = vadd.f32 %v689_v33, %v2255_v46 }
 0x1dc   : > { %v947_v0 = vmul.f32 %v931_v56, %v723_v26  ;;  %v948_v7 = vmul.f32 %v932_v61, %v724_v27 }
 0x1dd   : > { %1831 = vrcp.f32 %v755_v35  ;;  %v2290_v41 = vmul.f32 0.70710677, %v2284_v38  ;;  %v2293_v43 = vmul.f32 0.70710677, %v2287_v39  ;;  %v2400_v44 = vmul.f32 0.5, %v2284_v38 }
 0x1de   : > { %1833 = vrcp.f32 %v756_v37  ;;  %v963_v16 = vmul.f32 1.442695, %v947_v0  ;;  %v965_v24 = vmul.f32 1.442695, %v948_v7 }
 0x1df   : > { %v725_v47 = vand.u32 2147483647, %v2290_v41  ;;  %v726_v48 = vand.u32 2147483647, %v2293_v43  ;;  %vm1029_vm10 = vcmp.ge.f32.partialorder %v2290_v41, 0.0  ;;  %vm1030_vm11 = vcmp.ge.f32.partialorder %v2293_v43, 0.0 }
 0x1e1   : > { %v741_v49 = vmul.f32 0.3275911, %v725_v47  ;;  %v742_v50 = vmul.f32 0.3275911, %v726_v48  ;;  %v933_v5 = vsub.f32 0.0, %v725_v47  ;;  %v934_v28 = vsub.f32 0.0, %v726_v48 }
 0x1e2   : > { %v663_v36 = vpop.f32.mrf.mxu2  ;;  %v692_v51 = vpop.f32.mrf.mxu3 }
 0x1e3   : > { %v2303_v42 = vpop.eup %1831  ;;  %v757_v58 = vadd.f32 1.0, %v741_v49  ;;  %v758_v57 = vadd.f32 1.0, %v742_v50  ;;  %v2324_v6 = vadd.f32 %v663_v36, %v2253_v30  ;;  %v2327_v11 = vadd.f32 %v692_v51, %v2255_v46 }
 0x1e4   : > { %v2311_v54 = vpop.eup %1833  ;;  %v787_v55 = vmul.f32 1.0614054, %v2303_v42  ;;  %v949_v2 = vmul.f32 %v933_v5, %v725_v47  ;;  %v950_v27 = vmul.f32 %v934_v28, %v726_v48 }
 0x1e5   : > { %v788_v59 = vmul.f32 1.0614054, %v2311_v54  ;;  %1835 = vrcp.f32 %v757_v58  ;;  %v2343_v10 = vmul.f32 0.70710677, %v2324_v6  ;;  %v2347_v32 = vmul.f32 0.70710677, %v2327_v11 }
 0x1e6   : > { %v803_v60 = vadd.f32 -1.4531521, %v787_v55  ;;  %1837 = vrcp.f32 %v758_v57  ;;  %v967_v49 = vmul.f32 1.442695, %v949_v2  ;;  %v969_v52 = vmul.f32 1.442695, %v950_v27 }
 0x1e7   : > { %v804_v62 = vadd.f32 -1.4531521, %v788_v59  ;;  %1839 = vpow2.f32 %v963_v16  ;;  %v727_v50 = vand.u32 2147483647, %v2343_v10  ;;  %v728_v59 = vand.u32 2147483647, %v2347_v32 }
 0x1e8   : > { %v819_v63 = vmul.f32 %v2303_v42, %v803_v60  ;;  %1841 = vpow2.f32 %v965_v24  ;;  %vm1031_vm12 = vcmp.ge.f32.partialorder %v2343_v10, 0.0  ;;  %vm1032_vm13 = vcmp.ge.f32.partialorder %v2347_v32, 0.0 }
 0x1e9   : > { %v820_v4 = vmul.f32 %v2311_v54, %v804_v62  ;;  %v743_v1 = vmul.f32 0.3275911, %v727_v50  ;;  %1843 = vpow2.f32 %v967_v49 }
 0x1ea   : > { %v835_v34 = vadd.f32 1.4214138, %v819_v63  ;;  %v665_v8 = vpop.f32.mrf.mxu2  ;;  %v694_v25 = vpop.f32.mrf.mxu3  ;;  %v1756_v63 = vld [vmem:[%s2793_s6] sm:$0xff]  ;;  %1845 = vpow2.f32 %v969_v52 }
 0x1eb   : > { %v836_v9 = vadd.f32 1.4214138, %v820_v4  ;;  %v2335_v14 = vpop.eup %1835  ;;  %v2351_v37 = vadd.f32 %v665_v8, %v2253_v30  ;;  %v2364_v53 = vadd.f32 %v694_v25, %v2255_v46  ;;  %v1764_v4 = vld [vmem:[%s2793_s6 + $0x40] sm:$0xff]  ;;  %1270 = vmatpush.bf16.msrb.mxu0 %v1756_v63  ;;  %v935_v25 = vsub.f32 0.0, %v727_v50 }
 0x1ec   : > { %v851_v15 = vmul.f32 %v2303_v42, %v835_v34  ;;  %v2338_v17 = vpop.eup %1837  ;;  %v789_v18 = vmul.f32 1.0614054, %v2335_v14  ;;  %1299 = vmatpush.bf16.msrb.mxu1 %v1764_v4 }
 0x1ed   : > { %v852_v40 = vmul.f32 %v2311_v54, %v836_v9  ;;  %v790_v26 = vmul.f32 1.0614054, %v2338_v17  ;;  %v2371_v62 = vmul.f32 0.70710677, %v2351_v37  ;;  %v2378_v3 = vmul.f32 0.70710677, %v2364_v53  ;;  %v1840_v5 = vpop.eup %1839 }
 0x1ee   : > { %v867_v23 = vadd.f32 -0.28449672, %v851_v15  ;;  %v805_v31 = vadd.f32 -1.4531521, %v789_v18  ;;  %v744_v9 = vmul.f32 0.3275911, %v728_v59 }
 0x1ef   : > { %v868_v29 = vadd.f32 -0.28449672, %v852_v40  ;;  %v806_v35 = vadd.f32 -1.4531521, %v790_v26  ;;  %v729_v15 = vand.u32 2147483647, %v2371_v62 }
 0x1f0   : > { %v883_v33 = vmul.f32 %v2303_v42, %v867_v23  ;;  %v821_v48 = vmul.f32 %v2335_v14, %v805_v31  ;;  %v936_v40 = vsub.f32 0.0, %v728_v59  ;;  %v730_v18 = vand.u32 2147483647, %v2378_v3 }
 0x1f1   : > { %v884_v47 = vmul.f32 %v2311_v54, %v868_v29  ;;  %v822_v51 = vmul.f32 %v2338_v17, %v806_v35  ;;  %v951_v31 = vmul.f32 %v935_v25, %v727_v50  ;;  %vm1033_vm14 = vcmp.ge.f32.partialorder %v2371_v62, 0.0 }
 0x1f2   : > { %v899_v36 = vadd.f32 0.2548296, %v883_v33  ;;  %v668_v55 = vpop.f32.mrf.mxu2  ;;  %v2366_v56 = vpop.f32.mrf.mxu3  ;;  %v837_v57 = vadd.f32 1.4214138, %v821_v48  ;;  %v760_v33 = vadd.f32 1.0, %v744_v9  ;;  %v937_v48 = vsub.f32 0.0, %v729_v15 }
 0x1f3   : > { %v900_v58 = vadd.f32 0.2548296, %v884_v47  ;;  %v838_v61 = vadd.f32 1.4214138, %v822_v51  ;;  %v2397_v24 = vadd.f32 %v668_v55, %v2253_v30  ;;  %v2403_v47 = vmul.f32 0.5, %v2287_v39 }
 0x1f4   : > { %v915_v60 = vmul.f32 %v2303_v42, %v899_v36  ;;  %v853_v0 = vmul.f32 %v2335_v14, %v837_v57  ;;  %v2384_v42 = vmul.f32 0.5, %v2264_v19  ;;  %v1842_v19 = vpop.eup %1841  ;;  %v952_v36 = vmul.f32 %v936_v40, %v728_v59 }
 0x1f5   : > { %v916_v34 = vmul.f32 %v2311_v54, %v900_v58  ;;  %v854_v7 = vmul.f32 %v2338_v17, %v838_v61  ;;  %v759_v54 = vadd.f32 1.0, %v743_v1  ;;  %v1844_v35 = vpop.eup %1843  ;;  %v938_v51 = vsub.f32 0.0, %v730_v18 }
 0x1f6   : > { %v995_v28 = vmul.f32 %v1840_v5, %v915_v60  ;;  %v869_v8 = vadd.f32 -0.28449672, %v853_v0  ;;  %v1846_v52 = vpop.eup %1845  ;;  %v745_v58 = vmul.f32 0.3275911, %v729_v15  ;;  %v2409_v38 = vmul.f32 0.70710677, %v2397_v24 }
 0x1f7   : > { %v870_v13 = vadd.f32 -0.28449672, %v854_v7  ;;  %v996_v2 = vmul.f32 %v1842_v19, %v916_v34  ;;  %1847 = vrcp.f32 %v759_v54  ;;  %v971_v39 = vmul.f32 1.442695, %v951_v31 }
 0x1f8   : > { %v885_v16 = vmul.f32 %v2335_v14, %v869_v8  ;;  %v1011_v27 = vsub.f32 1.0, %v995_v28  ;;  %1849 = vrcp.f32 %v760_v33  ;;  %v953_v63 = vmul.f32 %v937_v48, %v729_v15 }
 0x1f9   : > { %v886_v23 = vmul.f32 %v2338_v17, %v870_v13  ;;  %v1012_v55 = vsub.f32 1.0, %v996_v2  ;;  %v746_v0 = vmul.f32 0.3275911, %v730_v18  ;;  %v973_v59 = vmul.f32 1.442695, %v952_v36 }
 0x1fa   : > { %v670_v20 = vpop.f32.mrf.mxu2  ;;  %v699_v26 = vpop.f32.mrf.mxu3  ;;  %v901_v29 = vadd.f32 0.2548296, %v885_v16  ;;  %v1043_v57 = vsub.f32 0.0, %v1011_v27  ;;  %v954_v1 = vmul.f32 %v938_v51, %v730_v18  ;;  %v761_v34 = vadd.f32 1.0, %v745_v58 }
 0x1fb   : > { %v902_v45 = vadd.f32 0.2548296, %v886_v23  ;;  %v2416_v4 = vadd.f32 %v670_v20, %v2253_v30  ;;  %v1044_v5 = vsub.f32 0.0, %v1012_v55  ;;  %v731_v7 = vand.u32 2147483647, %v2409_v38 }
 0x1fc   : > { %v917_v49 = vmul.f32 %v2335_v14, %v901_v29  ;;  %v2413_v14 = vadd.f32 %v2366_v56, %v2255_v46  ;;  %v1059_v9 = vsel %vm1027_vm8, %v1011_v27, %v1043_v57  ;;  %1851 = vpow2.f32 %v971_v39 }
 0x1fd   : > { %v918_v50 = vmul.f32 %v2338_v17, %v902_v45  ;;  %v2419_v17 = vadd.f32 %v699_v26, %v2255_v46  ;;  %v2427_v25 = vpop.eup %1847  ;;  %v2432_v19 = vmul.f32 0.70710677, %v2416_v4  ;;  %v2435_v16 = vmul.f32 0.5, %v2324_v6 }
 0x1fe   : > { %v997_v60 = vmul.f32 %v1844_v35, %v917_v49  ;;  %v2425_v28 = vmul.f32 0.70710677, %v2413_v14  ;;  %v975_v54 = vmul.f32 1.442695, %v953_v63  ;;  %v762_v40 = vadd.f32 1.0, %v746_v0  ;;  %v2437_v18 = vpop.eup %1849 }
 0x1ff   : > { %v998_v61 = vmul.f32 %v1846_v52, %v918_v50  ;;  %1853 = vpow2.f32 %v973_v59  ;;  %v977_v2 = vmul.f32 1.442695, %v954_v1  ;;  %v733_v23 = vand.u32 2147483647, %v2432_v19 }
 0x200   : > { %v1013_v13 = vsub.f32 1.0, %v997_v60  ;;  %v2441_v21 = vmul.f32 0.70710677, %v2419_v17  ;;  %v1091_v20 = vadd.f32 1.0, %v1059_v9  ;;  %v1060_v26 = vsel %vm1028_vm9, %v1012_v55, %v1044_v5 }
 0x201   : > { %v1014_v15 = vsub.f32 1.0, %v998_v61  ;;  %v939_v27 = vsub.f32 0.0, %v731_v7  ;;  %v732_v29 = vand.u32 2147483647, %v2425_v28  ;;  %1855 = vrcp.f32 %v761_v34 }
 0x202   : > { %v673_v56 = vpop.f32.mrf.mxu2  ;;  %v702_v8 = vpop.f32.mrf.mxu3  ;;  %v1045_v6 = vsub.f32 0.0, %v1013_v13  ;;  %v747_v33 = vmul.f32 0.3275911, %v731_v7  ;;  %v2447_v35 = vmul.f32 0.5, %v2327_v11  ;;  %1857 = vpow2.f32 %v975_v54 }
 0x203   : > { %v1046_v31 = vsub.f32 0.0, %v1014_v15  ;;  %v2450_v45 = vmul.f32 0.5, %v2351_v37  ;;  %v2453_v48 = vmul.f32 0.5, %v2364_v53  ;;  %v1092_v49 = vadd.f32 1.0, %v1060_v26  ;;  %v2456_v51 = vpop.eup %1851 }
 0x204   : > { %1859 = vrcp.f32 %v762_v40  ;;  %v749_v22 = vmul.f32 0.3275911, %v733_v23  ;;  %v734_v36 = vand.u32 2147483647, %v2441_v21  ;;  %v2459_v52 = vmul.f32 %v1091_v20, %v2384_v42 }
 0x205   : > { %1861 = vpow2.f32 %v977_v2  ;;  %v955_v11 = vmul.f32 %v939_v27, %v731_v7  ;;  %v940_v55 = vsub.f32 0.0, %v732_v29  ;;  %v2461_v37 = vpop.eup %1853  ;;  %v1061_v53 = vsel %vm1029_vm10, %v1013_v13, %v1045_v6 }
 0x206   : > { %v1062_v57 = vsel %vm1030_vm11, %v1014_v15, %v1046_v31  ;;  %v763_v60 = vadd.f32 1.0, %v747_v33  ;;  %v2468_v39 = vadd.f32 %v673_v56, %v2253_v30  ;;  %v748_v61 = vmul.f32 0.3275911, %v732_v29 }
 0x207   : > { %v941_v42 = vsub.f32 0.0, %v733_v23  ;;  %v2471_v63 = vadd.f32 %v702_v8, %v2255_v46  ;;  %v2476_v59 = vpop.eup %1855  ;;  %v765_v1 = vadd.f32 1.0, %v749_v22  ;;  %v750_v41 = vmul.f32 0.3275911, %v734_v36 }
 0x208   : > { %2802 = vst [vmem:[#allocation2_spill] sm:$0xff] %v2468_v39  ;;  %v2479_v5 = vmul.f32 0.70710677, %v2468_v39  ;;  %v2484_v34 = vpop.eup %1857  ;;  %v979_v7 = vmul.f32 1.442695, %v955_v11  ;;  %v956_v56 = vmul.f32 %v940_v55, %v732_v29  ;;  %v942_v9 = vsub.f32 0.0, %v734_v36 }
 0x209   : > { %2803 = vst [vmem:[#allocation3_spill] sm:$0xff] %v2471_v63  ;;  %v2487_v8 = vmul.f32 0.70710677, %v2471_v63  ;;  %v1093_v13 = vadd.f32 1.0, %v1061_v53  ;;  %1863 = vrcp.f32 %v763_v60  ;;  %v1094_v40 = vadd.f32 1.0, %v1062_v57 }
 0x20a   : > { %v675_v50 = vpop.f32.mrf.mxu2  ;;  %v704_v58 = vpop.f32.mrf.mxu3  ;;  %v2492_v15 = vand.u32 2147483647, %v2479_v5  ;;  %v764_v2 = vadd.f32 1.0, %v748_v61  ;;  %1865 = vrcp.f32 %v765_v1  ;;  %v957_v27 = vmul.f32 %v941_v42, %v733_v23 }
 0x20b   : > { %v2474_v0 = vadd.f32 %v675_v50, %v2253_v30  ;;  %v2482_v43 = vadd.f32 %v704_v58, %v2255_v46  ;;  %2806 = vst [vmem:[#allocation6_spill] sm:$0xff] %v2487_v8  ;;  %v2489_v30 = vpop.eup %1859  ;;  %v2500_v20 = vand.u32 2147483647, %v2487_v8  ;;  %v766_v29 = vadd.f32 1.0, %v750_v41 }
 0x20c   : > { %v2497_v46 = vpop.eup %1861  ;;  %v1108_v31 = vmul.f32 %v1092_v49, %v2389_v12  ;;  %v2510_v33 = vmul.f32 0.5, %v2397_v24  ;;  %v981_v22 = vmul.f32 1.442695, %v956_v56  ;;  %v958_v11 = vmul.f32 %v942_v9, %v734_v36 }
 0x20d   : > { %2804 = vst [vmem:[#allocation4_spill] sm:$0xff] %v2474_v0  ;;  %v2495_v54 = vmul.f32 0.70710677, %v2474_v0  ;;  %v2503_v26 = vmul.f32 0.70710677, %v2482_v43  ;;  %v1109_v55 = vmul.f32 %v1093_v13, %v2400_v44  ;;  %1867 = vpow2.f32 %v979_v7 }
 0x20e   : > { %2805 = vst [vmem:[#allocation5_spill] sm:$0xff] %v2482_v43  ;;  %v751_v50 = vmul.f32 0.3275911, %v2492_v15  ;;  %v752_v58 = vmul.f32 0.3275911, %v2500_v20  ;;  %v1110_v23 = vmul.f32 %v1094_v40, %v2403_v47  ;;  %1869 = vrcp.f32 %v764_v2 }
 0x20f   : > { %2807 = vst [vmem:[#allocation7_spill] sm:$0xff] %v2503_v26  ;;  %v2506_v6 = vand.u32 2147483647, %v2495_v54  ;;  %v2518_v57 = vand.u32 2147483647, %v2503_v26  ;;  %v2520_v12 = vpop.eup %1863  ;;  %v2523_v24 = vmul.f32 0.5, %v2413_v14  ;;  %1871 = vrcp.f32 %v766_v29 }
 0x210   : > { %v983_v49 = vmul.f32 1.442695, %v957_v27  ;;  %v2526_v44 = vmul.f32 0.5, %v2416_v4  ;;  %1873 = vpow2.f32 %v981_v22  ;;  %v985_v36 = vmul.f32 1.442695, %v958_v11  ;;  %v2532_v61 = vpop.eup %1865 }
 0x211   : > { %v753_v53 = vmul.f32 0.3275911, %v2506_v6  ;;  %v2529_v47 = vmul.f32 0.5, %v2419_v17  ;;  %v767_v42 = vadd.f32 1.0, %v751_v50  ;;  %v768_v1 = vadd.f32 1.0, %v752_v58 }
 0x212   : > { %v1123_v14 = vpack.c.bf16 %v1109_v55, %v2459_v52  ;;  %v754_v4 = vmul.f32 0.3275911, %v2518_v57  ;;  %v1124_v56 = vpack.c.bf16 %v1110_v23, %v1108_v31  ;;  %v791_v9 = vmul.f32 1.0614054, %v2427_v25 }
 0x213   : > { %v2536_v7 = vadd.f32 1.0, %v753_v53  ;;  %v2540_v13 = vpop.eup %1867  ;;  %1875 = vpow2.f32 %v983_v49  ;;  %v793_v17 = vmul.f32 1.0614054, %v2476_v59  ;;  %v792_v40 = vmul.f32 1.0614054, %v2437_v18 }
 0x214   : > { %1271 = vmatmul.bf16.vlgmr.msrb.gmra.mxu0 %v1123_v14  ;;  %v794_v2 = vmul.f32 1.0614054, %v2489_v30  ;;  %v2545_v27 = vpop.eup %1869  ;;  %1877 = vpow2.f32 %v985_v36  ;;  %1300 = vmatmul.bf16.vlgmr.msrb.gmra.mxu1 %v1124_v56  ;;  %v807_v52 = vadd.f32 -1.4531521, %v791_v9  ;;  %v795_v29 = vmul.f32 1.0614054, %v2520_v12 }
 0x215   : > { %v797_v31 = vmul.f32 1.0614054, %v2532_v61  ;;  %v2549_v22 = vpop.eup %1871  ;;  %1879 = vrcp.f32 %v767_v42  ;;  %v809_v11 = vadd.f32 -1.4531521, %v793_v17  ;;  %v808_v55 = vadd.f32 -1.4531521, %v792_v40 }
 0x216   : > { %v810_v50 = vadd.f32 -1.4531521, %v794_v2  ;;  %v2551_v58 = vpop.eup %1873  ;;  %v2553_v23 = vadd.f32 1.0, %v754_v4  ;;  %v823_v53 = vmul.f32 %v2427_v25, %v807_v52  ;;  %v811_v49 = vadd.f32 -1.4531521, %v795_v29 }
 0x217   : > { %v813_v36 = vadd.f32 -1.4531521, %v797_v31  ;;  %v825_v14 = vmul.f32 %v2476_v59, %v809_v11  ;;  %v824_v56 = vmul.f32 %v2437_v18, %v808_v55  ;;  %v796_v41 = vmul.f32 1.0614054, %v2545_v27 }
 0x218   : > { %v826_v9 = vmul.f32 %v2489_v30, %v810_v50  ;;  %v839_v42 = vadd.f32 1.4214138, %v823_v53  ;;  %v827_v17 = vmul.f32 %v2520_v12, %v811_v49  ;;  %v798_v4 = vmul.f32 1.0614054, %v2549_v22 }
 0x219   : > { %v829_v40 = vmul.f32 %v2532_v61, %v813_v36  ;;  %v1876_v2 = vpop.eup %1875  ;;  %1881 = vrcp.f32 %v768_v1  ;;  %v841_v52 = vadd.f32 1.4214138, %v825_v14  ;;  %v840_v29 = vadd.f32 1.4214138, %v824_v56 }
 0x21a   : > { %v842_v31 = vadd.f32 1.4214138, %v826_v9  ;;  %v2563_v60 = vpop.eup %1877  ;;  %v855_v11 = vmul.f32 %v2427_v25, %v839_v42  ;;  %v843_v55 = vadd.f32 1.4214138, %v827_v17  ;;  %v812_v43 = vadd.f32 -1.4531521, %v796_v41 }
 0x21b   : > { %v845_v50 = vadd.f32 1.4214138, %v829_v40  ;;  %v2566_v63 = vpop.eup %1879  ;;  %v857_v53 = vmul.f32 %v2476_v59, %v841_v52  ;;  %v856_v49 = vmul.f32 %v2437_v18, %v840_v29  ;;  %v814_v39 = vadd.f32 -1.4531521, %v798_v4 }
 0x21c   : > { %v858_v36 = vmul.f32 %v2489_v30, %v842_v31  ;;  %v871_v1 = vadd.f32 -0.28449672, %v855_v11  ;;  %v859_v14 = vmul.f32 %v2520_v12, %v843_v55  ;;  %v828_v9 = vmul.f32 %v2545_v27, %v812_v43 }
 0x21d   : > { %v861_v56 = vmul.f32 %v2532_v61, %v845_v50  ;;  %v873_v42 = vadd.f32 -0.28449672, %v857_v53  ;;  %v872_v17 = vadd.f32 -0.28449672, %v856_v49  ;;  %v830_v41 = vmul.f32 %v2549_v22, %v814_v39 }
 0x21e   : > { %v874_v40 = vadd.f32 -0.28449672, %v858_v36  ;;  %v887_v26 = vmul.f32 %v2427_v25, %v871_v1  ;;  %v875_v52 = vadd.f32 -0.28449672, %v859_v14  ;;  %v844_v29 = vadd.f32 1.4214138, %v828_v9 }
 0x21f   : > { %v877_v0 = vadd.f32 -0.28449672, %v861_v56  ;;  %v2576_v8 = vpop.eup %1881  ;;  %v889_v4 = vmul.f32 %v2476_v59, %v873_v42  ;;  %v888_v31 = vmul.f32 %v2437_v18, %v872_v17  ;;  %v846_v55 = vadd.f32 1.4214138, %v830_v41 }
 0x220   : > { %v890_v11 = vmul.f32 %v2489_v30, %v874_v40  ;;  %v903_v43 = vadd.f32 0.2548296, %v887_v26  ;;  %v891_v50 = vmul.f32 %v2520_v12, %v875_v52  ;;  %v860_v39 = vmul.f32 %v2545_v27, %v844_v29 }
 0x221   : > { %v893_v53 = vmul.f32 %v2532_v61, %v877_v0  ;;  %v905_v49 = vadd.f32 0.2548296, %v889_v4  ;;  %v904_v36 = vadd.f32 0.2548296, %v888_v31  ;;  %v862_v14 = vmul.f32 %v2549_v22, %v846_v55 }
 0x222   : > { %v906_v1 = vadd.f32 0.2548296, %v890_v11  ;;  %vm1034_vm15 = vcmp.ge.f32.partialorder %v2378_v3, 0.0  ;;  %v919_v26 = vmul.f32 %v2427_v25, %v903_v43  ;;  %v907_v56 = vadd.f32 0.2548296, %v891_v50 }
 0x223   : > { %v909_v9 = vadd.f32 0.2548296, %v893_v53  ;;  %v876_v0 = vadd.f32 -0.28449672, %v860_v39  ;;  %v921_v42 = vmul.f32 %v2476_v59, %v905_v49  ;;  %v920_v17 = vmul.f32 %v2437_v18, %v904_v36 }
 0x224   : > { %v922_v40 = vmul.f32 %v2489_v30, %v906_v1  ;;  %v878_v41 = vadd.f32 -0.28449672, %v862_v14  ;;  %v999_v52 = vmul.f32 %v2456_v51, %v919_v26  ;;  %v923_v29 = vmul.f32 %v2520_v12, %v907_v56 }
 0x225   : > { %v925_v4 = vmul.f32 %v2532_v61, %v909_v9  ;;  %v892_v31 = vmul.f32 %v2545_v27, %v876_v0  ;;  %v1001_v25 = vmul.f32 %v2484_v34, %v921_v42  ;;  %v1000_v11 = vmul.f32 %v2461_v37, %v920_v17 }
 0x226   : > { %v1002_v55 = vmul.f32 %v2497_v46, %v922_v40  ;;  %v894_v59 = vmul.f32 %v2549_v22, %v878_v41  ;;  %1883 = vrcp.f32 %v2536_v7  ;;  %v1015_v18 = vsub.f32 1.0, %v999_v52 }
 0x227   : > { %v1005_v30 = vmul.f32 %v1876_v2, %v925_v4  ;;  %v908_v43 = vadd.f32 0.2548296, %v892_v31  ;;  %v1017_v51 = vsub.f32 1.0, %v1001_v25  ;;  %v1016_v50 = vsub.f32 1.0, %v1000_v11 }
 0x228   : > { %v1018_v12 = vsub.f32 1.0, %v1002_v55  ;;  %v910_v53 = vadd.f32 0.2548296, %v894_v59  ;;  %1885 = vrcp.f32 %v2553_v23  ;;  %v1047_v61 = vsub.f32 0.0, %v1015_v18 }
 0x229   : > { %v1003_v34 = vmul.f32 %v2540_v13, %v923_v29  ;;  %v924_v37 = vmul.f32 %v2545_v27, %v908_v43  ;;  %v1049_v39 = vsub.f32 0.0, %v1017_v51  ;;  %v1048_v46 = vsub.f32 0.0, %v1016_v50 }
 0x22a   : > { %v1050_v49 = vsub.f32 0.0, %v1018_v12  ;;  %v926_v36 = vmul.f32 %v2549_v22, %v910_v53  ;;  %vm1037_vm0 = vcmp.ge.f32.partialorder %v2432_v19, 0.0  ;;  %vm1038_vm1 = vcmp.ge.f32.partialorder %v2441_v21, 0.0 }
 0x22b   : > { %v2808_v7 = vsub.f32 0.0, %v2492_v15  ;;  %v1063_v23 = vsel %vm1031_vm12, %v1015_v18, %v1047_v61  ;;  %v1021_v1 = vsub.f32 1.0, %v1005_v30  ;;  %v1004_v13 = vmul.f32 %v2551_v58, %v924_v37 }
 0x22c   : > { %v1065_v27 = vsel %vm1033_vm14, %v1017_v51, %v1049_v39  ;;  %v1095_v14 = vadd.f32 1.0, %v1063_v23  ;;  %v1064_v22 = vsel %vm1032_vm13, %v1016_v50, %v1048_v46  ;;  %v1066_v26 = vsel %vm1034_vm15, %v1018_v12, %v1050_v49  ;;  %v2620_v56 = vpop.eup %1883 }
 0x22d   : > { %v959_v2 = vmul.f32 %v2808_v7, %v2492_v15  ;;  %vm1035_vm2 = vcmp.ge.f32.partialorder %v2409_v38, 0.0  ;;  %vm1036_vm3 = vcmp.ge.f32.partialorder %v2425_v28, 0.0  ;;  %v1097_v10 = vadd.f32 1.0, %v1065_v27 }
 0x22e   : > { %v1096_v15 = vadd.f32 1.0, %v1064_v22  ;;  %v1098_v9 = vadd.f32 1.0, %v1066_v26  ;;  %v1019_v58 = vsub.f32 1.0, %v1003_v34  ;;  %v2809_v62 = vsub.f32 0.0, %v2500_v20  ;;  %v2630_v17 = vpop.eup %1885 }
 0x22f   : > { %v945_v32 = vsub.f32 0.0, %v2506_v6  ;;  %v946_v42 = vsub.f32 0.0, %v2518_v57  ;;  %v1006_v3 = vmul.f32 %v2563_v60, %v926_v36  ;;  %v1111_v40 = vmul.f32 %v1095_v14, %v2435_v16 }
 0x230   : > { %v960_v0 = vmul.f32 %v2809_v62, %v2500_v20  ;;  %v1113_v41 = vmul.f32 %v1097_v10, %v2450_v45  ;;  %v1112_v52 = vmul.f32 %v1096_v15, %v2447_v35  ;;  %v1114_v29 = vmul.f32 %v1098_v9, %v2453_v48 }
 0x231   : > { %v1053_v4 = vsub.f32 0.0, %v1021_v1  ;;  %v1020_v31 = vsub.f32 1.0, %v1004_v13  ;;  %v1022_v25 = vsub.f32 1.0, %v1006_v3  ;;  %v799_v20 = vmul.f32 1.0614054, %v2566_v63 }
 0x232   : > { %v1125_v11 = vpack.c.bf16 %v1113_v41, %v1111_v40  ;;  %v1126_v55 = vpack.c.bf16 %v1114_v29, %v1112_v52  ;;  %v1051_v59 = vsub.f32 0.0, %v1019_v58  ;;  %v801_v60 = vmul.f32 1.0614054, %v2620_v56 }
 0x233   : > { %v1052_v18 = vsub.f32 0.0, %v1020_v31  ;;  %v1054_v30 = vsub.f32 0.0, %v1022_v25  ;;  %v815_v43 = vadd.f32 -1.4531521, %v799_v20  ;;  %v800_v16 = vmul.f32 1.0614054, %v2576_v8 }
 0x234   : > { %v987_v45 = vmul.f32 1.442695, %v959_v2  ;;  %v961_v35 = vmul.f32 %v945_v32, %v2506_v6  ;;  %1276 = vmatmul.bf16.gmra.mxu0 %v1125_v11  ;;  %1305 = vmatmul.bf16.gmra.mxu1 %v1126_v55  ;;  %v817_v48 = vadd.f32 -1.4531521, %v801_v60  ;;  %v802_v51 = vmul.f32 1.0614054, %v2630_v17 }
 0x235   : > { %v1069_v50 = vsel %vm1037_vm0, %v1021_v1, %v1053_v4  ;;  %v1070_v12 = vsel %vm1038_vm1, %v1022_v25, %v1054_v30  ;;  %v831_v53 = vmul.f32 %v2566_v63, %v815_v43  ;;  %v816_v61 = vadd.f32 -1.4531521, %v800_v16 }
 0x236   : > { %v989_v34 = vmul.f32 1.442695, %v960_v0  ;;  %v962_v37 = vmul.f32 %v946_v42, %v2518_v57  ;;  %v833_v39 = vmul.f32 %v2620_v56, %v817_v48  ;;  %v818_v6 = vadd.f32 -1.4531521, %v802_v51 }
 0x237   : > { %v1067_v46 = vsel %vm1035_vm2, %v1019_v58, %v1051_v59  ;;  %v1068_v49 = vsel %vm1036_vm3, %v1020_v31, %v1052_v18  ;;  %v847_v19 = vadd.f32 1.4214138, %v831_v53  ;;  %v832_v36 = vmul.f32 %v2576_v8, %v816_v61  ;;  %v2810_v61 = vld [vmem:[#allocation6_spill] sm:$0xff] }
 0x238   : > { %v1101_v21 = vadd.f32 1.0, %v1069_v50  ;;  %v1102_v7 = vadd.f32 1.0, %v1070_v12  ;;  %v849_v2 = vadd.f32 1.4214138, %v833_v39  ;;  %v834_v23 = vmul.f32 %v2630_v17, %v818_v6  ;;  %v2811_v39 = vld [vmem:[#allocation4_spill] sm:$0xff] }
 0x239   : > { %1887 = vpow2.f32 %v987_v45  ;;  %v991_v1 = vmul.f32 1.442695, %v961_v35  ;;  %v863_v57 = vmul.f32 %v2566_v63, %v847_v19  ;;  %v848_v13 = vadd.f32 1.4214138, %v832_v36  ;;  %v2813_v36 = vld [vmem:[#allocation2_spill] sm:$0xff] }
 0x23a   : > { %v1099_v27 = vadd.f32 1.0, %v1067_v46  ;;  %v1100_v14 = vadd.f32 1.0, %v1068_v49  ;;  %v865_v38 = vmul.f32 %v2620_v56, %v849_v2  ;;  %v850_v22 = vadd.f32 1.4214138, %v834_v23  ;;  %v2812_v46 = vld [vmem:[#allocation7_spill] sm:$0xff] }
 0x23b   : > { %1889 = vpow2.f32 %v989_v34  ;;  %v993_v28 = vmul.f32 1.442695, %v962_v37  ;;  %v879_v26 = vadd.f32 -0.28449672, %v863_v57  ;;  %v864_v10 = vmul.f32 %v2576_v8, %v848_v13  ;;  %v2814_v2 = vld [vmem:[#allocation3_spill] sm:$0xff] }
 0x23c   : > { %v1117_v15 = vmul.f32 %v1101_v21, %v2526_v44  ;;  %v1118_v9 = vmul.f32 %v1102_v7, %v2529_v47  ;;  %v881_v58 = vadd.f32 -0.28449672, %v865_v38  ;;  %v866_v62 = vmul.f32 %v2630_v17, %v850_v22 }
 0x23d   : > { %1891 = vpow2.f32 %v991_v1  ;;  %v895_v0 = vmul.f32 %v2566_v63, %v879_v26  ;;  %v880_v32 = vadd.f32 -0.28449672, %v864_v10  ;;  %v1115_v42 = vmul.f32 %v1099_v27, %v2510_v33  ;;  %v2681_v26 = vld [vmem:[%s2794_s7] ss:$0 sm:$0xff] }
 0x23e   : > { %v1116_v3 = vmul.f32 %v1100_v14, %v2523_v24  ;;  %v897_v40 = vmul.f32 %v2620_v56, %v881_v58  ;;  %v882_v41 = vadd.f32 -0.28449672, %v866_v62  ;;  %1893 = vpow2.f32 %v993_v28 }
 0x23f   : > { %v1888_v52 = vpop.eup %1887  ;;  %v911_v29 = vadd.f32 0.2548296, %v895_v0  ;;  %v896_v44 = vmul.f32 %v2576_v8, %v880_v32  ;;  %v1127_v47 = vpack.c.bf16 %v1117_v15, %v1115_v42  ;;  %vm1039_vm4 = vcmp.ge.f32.partialorder %v2479_v5, 0.0 }
 0x240   : > { %v1128_v4 = vpack.c.bf16 %v1118_v9, %v1116_v3  ;;  %v913_v31 = vadd.f32 0.2548296, %v897_v40  ;;  %v898_v25 = vmul.f32 %v2630_v17, %v882_v41  ;;  %vm1041_vm5 = vcmp.ge.f32.partialorder %v2495_v54, 0.0  ;;  %v2815_v54 = vld [vmem:[#allocation5_spill] sm:$0xff] }
 0x241   : > { %v1890_v20 = vpop.eup %1889  ;;  %v927_v11 = vmul.f32 %v2566_v63, %v911_v29  ;;  %v912_v55 = vadd.f32 0.2548296, %v896_v44  ;;  %vm1040_vm6 = vcmp.ge.f32.partialorder %v2810_v61, 0.0  ;;  %v1089_v6 = vmul.f32 0.5, %v2811_v39 }
 0x242   : > { %v929_v33 = vmul.f32 %v2620_v56, %v913_v31  ;;  %v914_v24 = vadd.f32 0.2548296, %v898_v25  ;;  %vm1042_vm7 = vcmp.ge.f32.partialorder %v2812_v46, 0.0  ;;  %v1087_v21 = vmul.f32 0.5, %v2813_v36 }
 0x243   : > { %v1892_v59 = vpop.eup %1891  ;;  %v1007_v60 = vmul.f32 %v1888_v52, %v927_v11  ;;  %v928_v18 = vmul.f32 %v2576_v8, %v912_v55  ;;  %v1088_v23 = vmul.f32 0.5, %v2814_v2  ;;  %v1090_v1 = vmul.f32 0.5, %v2815_v54 }
 0x244   : > { %1281 = vmatmul.bf16.gmra.mxu0 %v1127_v47  ;;  %1310 = vmatmul.bf16.gmra.mxu1 %v1128_v4  ;;  %v1009_v30 = vmul.f32 %v1892_v59, %v929_v33  ;;  %v930_v43 = vmul.f32 %v2630_v17, %v914_v24  ;;  %v1894_v16 = vpop.eup %1893 }
 0x245   : > { %v1023_v45 = vsub.f32 1.0, %v1007_v60  ;;  %v1008_v35 = vmul.f32 %v1890_v20, %v928_v18 }
 0x246   : > { %v1025_v48 = vsub.f32 1.0, %v1009_v30  ;;  %v1010_v51 = vmul.f32 %v1894_v16, %v930_v43 }
 0x247   : > { %v1055_v50 = vsub.f32 0.0, %v1023_v45  ;;  %v1024_v63 = vsub.f32 1.0, %v1008_v35 }
 0x248   : > { %v1057_v56 = vsub.f32 0.0, %v1025_v48  ;;  %v1026_v12 = vsub.f32 1.0, %v1010_v51 }
 0x249   : > { %v1071_v53 = vsel %vm1039_vm4, %v1023_v45, %v1055_v50  ;;  %v1056_v8 = vsub.f32 0.0, %v1024_v63 }
 0x24a   : > { %v1073_v34 = vsel %vm1041_vm5, %v1025_v48, %v1057_v56  ;;  %v1103_v37 = vadd.f32 1.0, %v1071_v53  ;;  %v1058_v17 = vsub.f32 0.0, %v1026_v12 }
 0x24b   : > { %v1105_v49 = vadd.f32 1.0, %v1073_v34  ;;  %v1072_v19 = vsel %vm1040_vm6, %v1024_v63, %v1056_v8 }
 0x24c   : > { %v1074_v5 = vsel %vm1042_vm7, %v1026_v12, %v1058_v17  ;;  %v1104_v7 = vadd.f32 1.0, %v1072_v19  ;;  %v1119_v27 = vmul.f32 %v1103_v37, %v1087_v21 }
 0x24d   : > { %v1121_v57 = vmul.f32 %v1105_v49, %v1089_v6  ;;  %v1106_v13 = vadd.f32 1.0, %v1074_v5 }
 0x24e   : > { %v1120_v14 = vmul.f32 %v1104_v7, %v1088_v23 }
 0x24f   : > { %v1122_v38 = vmul.f32 %v1106_v13, %v1090_v1  ;;  %v1129_v22 = vpack.c.bf16 %v1121_v57, %v1119_v27 }
 0x251   : > { %v1130_v28 = vpack.c.bf16 %v1122_v38, %v1120_v14 }
 0x254   : > { %1286 = vmatmul.bf16.gmra.mxu0 %v1129_v22  ;;  %1315 = vmatmul.bf16.gmra.mxu1 %v1130_v28 }
 0x291   : > { %v1272_v10 = vpop.f32.mrf.mxu0  ;;  %v1301_v9 = vpop.f32.mrf.mxu1 }
 0x292   : > { %v1273_v15 = vadd.f32 %v2681_v26, %v1272_v10 }
 0x294   : > { %v1302_v58 = vadd.f32 %v1301_v9, %v1273_v15 }
 0x296   : > { %v1321_v62 = vmul.f32 0.70710677, %v1302_v58  ;;  %v1505_v38 = vmul.f32 0.5, %v1302_v58 }
 0x298   : > { %v1329_v0 = vand.u32 2147483647, %v1321_v62  ;;  %vm1481_vm8 = vcmp.ge.f32.partialorder %v1321_v62, 0.0 }
 0x299   : > { %v1274_v32 = vpop.f32.mrf.mxu0  ;;  %v1303_v40 = vpop.f32.mrf.mxu1 }
 0x29a   : > { %v1337_v42 = vmul.f32 0.3275911, %v1329_v0  ;;  %v1275_v3 = vadd.f32 %v2681_v26, %v1274_v32  ;;  %v1433_v31 = vsub.f32 0.0, %v1329_v0 }
 0x29c   : > { %v1345_v41 = vadd.f32 1.0, %v1337_v42  ;;  %v2685_v52 = vadd.f32 %v1303_v40, %v1275_v3  ;;  %v1441_v55 = vmul.f32 %v1433_v31, %v1329_v0  ;;  %v1927_v42 = vld [vmem:[%s2051_s20] sm:$0xff] }
 0x29e   : > { %1895 = vrcp.f32 %v1345_v41  ;;  %v2688_v29 = vmul.f32 0.70710677, %v2685_v52  ;;  %v1449_v60 = vmul.f32 1.442695, %v1441_v55  ;;  %v1506_v55 = vmul.f32 0.5, %v2685_v52 }
 0x2a0   : > { %v1330_v44 = vand.u32 2147483647, %v2688_v29  ;;  %vm1482_vm9 = vcmp.ge.f32.partialorder %v2688_v29, 0.0 }
 0x2a2   : > { %v1338_v47 = vmul.f32 0.3275911, %v1330_v44  ;;  %v1434_v18 = vsub.f32 0.0, %v1330_v44 }
 0x2a4   : > { %v1896_v4 = vpop.eup %1895  ;;  %v1346_v25 = vadd.f32 1.0, %v1338_v47  ;;  %v1442_v35 = vmul.f32 %v1434_v18, %v1330_v44 }
 0x2a5   : > { %v1361_v20 = vmul.f32 1.0614054, %v1896_v4 }
 0x2a6   : > { %1897 = vrcp.f32 %v1346_v25  ;;  %v1451_v61 = vmul.f32 1.442695, %v1442_v35  ;;  %v1928_v35 = vld [vmem:[%s2051_s20 + $0x8] sm:$0xff] }
 0x2a7   : > { %v1369_v11 = vadd.f32 -1.4531521, %v1361_v20  ;;  %1899 = vpow2.f32 %v1449_v60 }
 0x2a8   : > { %1901 = vpow2.f32 %v1451_v61 }
 0x2a9   : > { %v1377_v33 = vmul.f32 %v1896_v4, %v1369_v11 }
 0x2ab   : > { %v1385_v24 = vadd.f32 1.4214138, %v1377_v33 }
 0x2ac   : > { %v1898_v59 = vpop.eup %1897 }
 0x2ad   : > { %v1393_v30 = vmul.f32 %v1896_v4, %v1385_v24  ;;  %v1362_v43 = vmul.f32 1.0614054, %v1898_v59  ;;  %v1900_v39 = vpop.eup %1899 }
 0x2ae   : > { %v1902_v14 = vpop.eup %1901 }
 0x2af   : > { %v1401_v16 = vadd.f32 -0.28449672, %v1393_v30  ;;  %v1370_v45 = vadd.f32 -1.4531521, %v1362_v43 }
 0x2b1   : > { %v1277_v48 = vpop.f32.mrf.mxu0  ;;  %v1306_v51 = vpop.f32.mrf.mxu1  ;;  %v1409_v50 = vmul.f32 %v1896_v4, %v1401_v16  ;;  %v1378_v63 = vmul.f32 %v1898_v59, %v1370_v45 }
 0x2b2   : > { %v1278_v56 = vadd.f32 %v2681_v26, %v1277_v48 }
 0x2b3   : > { %v1417_v12 = vadd.f32 0.2548296, %v1409_v50  ;;  %v1386_v53 = vadd.f32 1.4214138, %v1378_v63 }
 0x2b4   : > { %v2692_v8 = vadd.f32 %v1306_v51, %v1278_v56 }
 0x2b5   : > { %v1425_v34 = vmul.f32 %v1896_v4, %v1417_v12  ;;  %v1394_v37 = vmul.f32 %v1898_v59, %v1386_v53 }
 0x2b6   : > { %v2695_v17 = vmul.f32 0.70710677, %v2692_v8 }
 0x2b7   : > { %v1465_v6 = vmul.f32 %v1900_v39, %v1425_v34  ;;  %v1402_v46 = vadd.f32 -0.28449672, %v1394_v37 }
 0x2b8   : > { %v1331_v49 = vand.u32 2147483647, %v2695_v17  ;;  %vm1483_vm10 = vcmp.ge.f32.partialorder %v2695_v17, 0.0 }
 0x2b9   : > { %v1279_v19 = vpop.f32.mrf.mxu0  ;;  %v1308_v36 = vpop.f32.mrf.mxu1  ;;  %v1473_v21 = vsub.f32 1.0, %v1465_v6  ;;  %v1410_v5 = vmul.f32 %v1898_v59, %v1402_v46 }
 0x2ba   : > { %v1339_v7 = vmul.f32 0.3275911, %v1331_v49  ;;  %v1280_v2 = vadd.f32 %v2681_v26, %v1279_v19  ;;  %v1435_v47 = vsub.f32 0.0, %v1331_v49 }
 0x2bb   : > { %v1489_v23 = vsub.f32 0.0, %v1473_v21  ;;  %v1418_v54 = vadd.f32 0.2548296, %v1410_v5 }
 0x2bc   : > { %v1347_v1 = vadd.f32 1.0, %v1339_v7  ;;  %v2699_v57 = vadd.f32 %v1308_v36, %v1280_v2 }
 0x2bd   : > { %v1497_v13 = vsel %vm1481_vm8, %v1473_v21, %v1489_v23  ;;  %v1426_v27 = vmul.f32 %v1898_v59, %v1418_v54  ;;  %v1443_v59 = vmul.f32 %v1435_v47, %v1331_v49 }
 0x2be   : > { %1903 = vrcp.f32 %v1347_v1  ;;  %v1513_v22 = vadd.f32 1.0, %v1497_v13  ;;  %v2702_v28 = vmul.f32 0.70710677, %v2699_v57 }
 0x2bf   : > { %v1466_v10 = vmul.f32 %v1902_v14, %v1426_v27  ;;  %v1453_v50 = vmul.f32 1.442695, %v1443_v59 }
 0x2c0   : > { %v1521_v15 = vmul.f32 %v1513_v22, %v1505_v38  ;;  %v1332_v9 = vand.u32 2147483647, %v2702_v28  ;;  %vm1484_vm11 = vcmp.ge.f32.partialorder %v2702_v28, 0.0 }
 0x2c1   : > { %v1282_v0 = vpop.f32.mrf.mxu0  ;;  %v1311_v32 = vpop.f32.mrf.mxu1  ;;  %v1474_v62 = vsub.f32 1.0, %v1466_v10 }
 0x2c2   : > { %v1283_v58 = vadd.f32 %v2681_v26, %v1282_v0  ;;  %v1529_v3 = vadd.f32 %v1927_v42, %v1521_v15  ;;  %v1340_v40 = vmul.f32 0.3275911, %v1332_v9  ;;  %v1436_v53 = vsub.f32 0.0, %v1332_v9 }
 0x2c3   : > { %v1490_v44 = vsub.f32 0.0, %v1474_v62 }
 0x2c4   : > { %v1904_v41 = vpop.eup %1903  ;;  %v2714_v4 = vadd.f32 %v1311_v32, %v1283_v58  ;;  %1537 = vst [vmem:[%s2710_s21] sm:$0xff] %v1529_v3  ;;  %v1348_v25 = vadd.f32 1.0, %v1340_v40  ;;  %v1444_v49 = vmul.f32 %v1436_v53, %v1332_v9 }
 0x2c5   : > { %v1363_v31 = vmul.f32 1.0614054, %v1904_v41  ;;  %v1498_v20 = vsel %vm1482_vm9, %v1474_v62, %v1490_v44 }
 0x2c6   : > { %v2719_v11 = vmul.f32 0.70710677, %v2714_v4  ;;  %v1514_v33 = vadd.f32 1.0, %v1498_v20  ;;  %1905 = vrcp.f32 %v1348_v25  ;;  %v1455_v38 = vmul.f32 1.442695, %v1444_v49 }
 0x2c7   : > { %v1371_v24 = vadd.f32 -1.4531521, %v1363_v31 }
 0x2c8   : > { %v1333_v60 = vand.u32 2147483647, %v2719_v11  ;;  %v1522_v18 = vmul.f32 %v1514_v33, %v1506_v55  ;;  %vm1485_vm12 = vcmp.ge.f32.partialorder %v2719_v11, 0.0 }
 0x2c9   : > { %v1379_v30 = vmul.f32 %v1904_v41, %v1371_v24  ;;  %v1284_v43 = vpop.f32.mrf.mxu0  ;;  %v1313_v29 = vpop.f32.mrf.mxu1 }
 0x2ca   : > { %v1341_v16 = vmul.f32 0.3275911, %v1333_v60  ;;  %v1285_v45 = vadd.f32 %v2681_v26, %v1284_v43  ;;  %v1530_v48 = vadd.f32 %v1928_v35, %v1522_v18  ;;  %v1437_v1 = vsub.f32 0.0, %v1333_v60 }
 0x2cb   : > { %v1387_v51 = vadd.f32 1.4214138, %v1379_v30 }
 0x2cc   : > { %v1349_v63 = vadd.f32 1.0, %v1341_v16  ;;  %v2725_v52 = vadd.f32 %v1313_v29, %v1285_v45  ;;  %v1906_v56 = vpop.eup %1905  ;;  %1538 = vst [vmem:[%s2710_s21 + $0x8] sm:$0xff] %v1530_v48  ;;  %v1445_v58 = vmul.f32 %v1437_v1, %v1333_v60  ;;  %v1507_v29 = vmul.f32 0.5, %v2692_v8 }
 0x2cd   : > { %v1395_v12 = vmul.f32 %v1904_v41, %v1387_v51  ;;  %v1364_v61 = vmul.f32 1.0614054, %v1906_v56 }
 0x2ce   : > { %1907 = vrcp.f32 %v1349_v63  ;;  %v2729_v34 = vmul.f32 0.70710677, %v2725_v52  ;;  %v1457_v60 = vmul.f32 1.442695, %v1445_v58 }
 0x2cf   : > { %v1403_v37 = vadd.f32 -0.28449672, %v1395_v12  ;;  %1909 = vpow2.f32 %v1453_v50  ;;  %v1372_v39 = vadd.f32 -1.4531521, %v1364_v61 }
 0x2d0   : > { %v1334_v6 = vand.u32 2147483647, %v2729_v34  ;;  %vm1486_vm13 = vcmp.ge.f32.partialorder %v2729_v34, 0.0 }
 0x2d1   : > { %v1411_v46 = vmul.f32 %v1904_v41, %v1403_v37  ;;  %v1287_v19 = vpop.f32.mrf.mxu0  ;;  %v1316_v36 = vpop.f32.mrf.mxu1  ;;  %v1380_v21 = vmul.f32 %v1906_v56, %v1372_v39  ;;  %v1929_v39 = vld [vmem:[%s2051_s20 + $0x10] sm:$0xff] }
 0x2d2   : > { %v1342_v5 = vmul.f32 0.3275911, %v1334_v6  ;;  %v1288_v7 = vadd.f32 %v2681_v26, %v1287_v19  ;;  %v1438_v47 = vsub.f32 0.0, %v1334_v6 }
 0x2d3   : > { %v1419_v2 = vadd.f32 0.2548296, %v1411_v46  ;;  %v1388_v54 = vadd.f32 1.4214138, %v1380_v21 }
 0x2d4   : > { %v2733_v23 = vpop.eup %1907  ;;  %v1350_v13 = vadd.f32 1.0, %v1342_v5  ;;  %v2735_v27 = vadd.f32 %v1316_v36, %v1288_v7  ;;  %v1446_v35 = vmul.f32 %v1438_v47, %v1334_v6 }
 0x2d5   : > { %v1427_v14 = vmul.f32 %v1904_v41, %v1419_v2  ;;  %v1365_v22 = vmul.f32 1.0614054, %v2733_v23  ;;  %v1910_v10 = vpop.eup %1909  ;;  %v1396_v15 = vmul.f32 %v1906_v56, %v1388_v54 }
 0x2d6   : > { %1911 = vrcp.f32 %v1350_v13  ;;  %v2739_v9 = vmul.f32 0.70710677, %v2735_v27  ;;  %v1459_v46 = vmul.f32 1.442695, %v1446_v35  ;;  %v1931_v35 = vld [vmem:[%s2051_s20 + $0x20] sm:$0xff] }
 0x2d7   : > { %v1467_v0 = vmul.f32 %v1910_v10, %v1427_v14  ;;  %v1373_v32 = vadd.f32 -1.4531521, %v1365_v22  ;;  %v1404_v62 = vadd.f32 -0.28449672, %v1396_v15  ;;  %1913 = vpow2.f32 %v1455_v38 }
 0x2d8   : > { %v1335_v42 = vand.u32 2147483647, %v2739_v9  ;;  %v1508_v22 = vmul.f32 0.5, %v2699_v57  ;;  %vm1487_vm14 = vcmp.ge.f32.partialorder %v2739_v9, 0.0 }
 0x2d9   : > { %v1475_v3 = vsub.f32 1.0, %v1467_v0  ;;  %v1381_v40 = vmul.f32 %v2733_v23, %v1373_v32  ;;  %v1289_v41 = vpop.f32.mrf.mxu0  ;;  %v1412_v44 = vmul.f32 %v1906_v56, %v1404_v62  ;;  %v1318_v33 = vpop.f32.mrf.mxu1 }
 0x2da   : > { %v1343_v31 = vmul.f32 0.3275911, %v1335_v42  ;;  %v1290_v25 = vadd.f32 %v2681_v26, %v1289_v41  ;;  %v1439_v7 = vsub.f32 0.0, %v1335_v42 }
 0x2db   : > { %v1491_v20 = vsub.f32 0.0, %v1475_v3  ;;  %v1389_v55 = vadd.f32 1.4214138, %v1381_v40  ;;  %v1420_v59 = vadd.f32 0.2548296, %v1412_v44  ;;  %v1930_v40 = vld [vmem:[%s2051_s20 + $0x18] sm:$0xff] }
 0x2dc   : > { %v2745_v24 = vpop.eup %1911  ;;  %v1351_v18 = vadd.f32 1.0, %v1343_v31  ;;  %v2747_v30 = vadd.f32 %v1318_v33, %v1290_v25  ;;  %v1447_v28 = vmul.f32 %v1439_v7, %v1335_v42 }
 0x2dd   : > { %v1499_v43 = vsel %vm1483_vm10, %v1475_v3, %v1491_v20  ;;  %v1397_v16 = vmul.f32 %v2733_v23, %v1389_v55  ;;  %v1366_v26 = vmul.f32 1.0614054, %v2745_v24  ;;  %v1428_v17 = vmul.f32 %v1906_v56, %v1420_v59  ;;  %v1914_v48 = vpop.eup %1913 }
 0x2de   : > { %v1515_v45 = vadd.f32 1.0, %v1499_v43  ;;  %1915 = vrcp.f32 %v1351_v18  ;;  %v2753_v63 = vmul.f32 0.70710677, %v2747_v30  ;;  %v1461_v57 = vmul.f32 1.442695, %v1447_v28 }
 0x2df   : > { %v1405_v51 = vadd.f32 -0.28449672, %v1397_v16  ;;  %v1374_v50 = vadd.f32 -1.4531521, %v1366_v26  ;;  %v1468_v53 = vmul.f32 %v1914_v48, %v1428_v17  ;;  %1917 = vpow2.f32 %v1457_v60 }
 0x2e0   : > { %v1523_v12 = vmul.f32 %v1515_v45, %v1507_v29  ;;  %v1336_v37 = vand.u32 2147483647, %v2753_v63  ;;  %1919 = vpow2.f32 %v1459_v46  ;;  %v1509_v59 = vmul.f32 0.5, %v2714_v4 }
 0x2e1   : > { %v1413_v8 = vmul.f32 %v2733_v23, %v1405_v51  ;;  %v1382_v61 = vmul.f32 %v2745_v24, %v1374_v50  ;;  %v1476_v6 = vsub.f32 1.0, %v1468_v53  ;;  %vm1488_vm15 = vcmp.ge.f32.partialorder %v2753_v63, 0.0 }
 0x2e2   : > { %v1531_v56 = vadd.f32 %v1929_v39, %v1523_v12  ;;  %v1344_v36 = vmul.f32 0.3275911, %v1336_v37  ;;  %v1440_v18 = vsub.f32 0.0, %v1336_v37  ;;  %v1510_v39 = vmul.f32 0.5, %v2725_v52 }
 0x2e3   : > { %v1421_v49 = vadd.f32 0.2548296, %v1413_v8  ;;  %v1390_v19 = vadd.f32 1.4214138, %v1382_v61  ;;  %v1492_v5 = vsub.f32 0.0, %v1476_v6  ;;  %v1511_v52 = vmul.f32 0.5, %v2735_v27 }
 0x2e4   : > { %v1916_v21 = vpop.eup %1915  ;;  %1539 = vst [vmem:[%s2710_s21 + $0x10] sm:$0xff] %v1531_v56  ;;  %v1352_v13 = vadd.f32 1.0, %v1344_v36  ;;  %v1448_v51 = vmul.f32 %v1440_v18, %v1336_v37  ;;  %v1512_v9 = vmul.f32 0.5, %v2747_v30  ;;  %v1934_v27 = vld [vmem:[%s2051_s20 + $0x38] sm:$0xff] }
 0x2e5   : > { %v1429_v2 = vmul.f32 %v2733_v23, %v1421_v49  ;;  %v1398_v54 = vmul.f32 %v2745_v24, %v1390_v19  ;;  %v1367_v1 = vmul.f32 1.0614054, %v1916_v21  ;;  %v1918_v14 = vpop.eup %1917  ;;  %v1500_v38 = vsel %vm1484_vm11, %v1476_v6, %v1492_v5  ;;  %v1932_v5 = vld [vmem:[%s2051_s20 + $0x28] sm:$0xff] }
 0x2e6   : > { %v1516_v10 = vadd.f32 1.0, %v1500_v38  ;;  %1921 = vrcp.f32 %v1352_v13  ;;  %v1920_v25 = vpop.eup %1919  ;;  %v1463_v6 = vmul.f32 1.442695, %v1448_v51 }
 0x2e7   : > { %v1469_v15 = vmul.f32 %v1918_v14, %v1429_v2  ;;  %v1406_v0 = vadd.f32 -0.28449672, %v1398_v54  ;;  %v1375_v32 = vadd.f32 -1.4531521, %v1367_v1  ;;  %1923 = vpow2.f32 %v1461_v57 }
 0x2e8   : > { %v1524_v62 = vmul.f32 %v1516_v10, %v1508_v22  ;;  %1925 = vpow2.f32 %v1463_v6  ;;  %v1933_v10 = vld [vmem:[%s2051_s20 + $0x30] sm:$0xff] }
 0x2e9   : > { %v1477_v58 = vsub.f32 1.0, %v1469_v15  ;;  %v1414_v23 = vmul.f32 %v2745_v24, %v1406_v0  ;;  %v1383_v3 = vmul.f32 %v1916_v21, %v1375_v32 }
 0x2ea   : > { %v1532_v41 = vadd.f32 %v1930_v40, %v1524_v62 }
 0x2eb   : > { %v1493_v44 = vsub.f32 0.0, %v1477_v58  ;;  %v1422_v47 = vadd.f32 0.2548296, %v1414_v23  ;;  %v1391_v31 = vadd.f32 1.4214138, %v1383_v3 }
 0x2ec   : > { %1540 = vst [vmem:[%s2710_s21 + $0x18] sm:$0xff] %v1532_v41  ;;  %v1922_v33 = vpop.eup %1921 }
 0x2ed   : > { %v1501_v20 = vsel %vm1485_vm12, %v1477_v58, %v1493_v44  ;;  %v1430_v42 = vmul.f32 %v2745_v24, %v1422_v47  ;;  %v1399_v55 = vmul.f32 %v1916_v21, %v1391_v31  ;;  %v1368_v16 = vmul.f32 1.0614054, %v1922_v33  ;;  %v1924_v61 = vpop.eup %1923 }
 0x2ee   : > { %v1517_v60 = vadd.f32 1.0, %v1501_v20  ;;  %v1926_v14 = vpop.eup %1925 }
 0x2ef   : > { %v1470_v43 = vmul.f32 %v1920_v25, %v1430_v42  ;;  %v1407_v29 = vadd.f32 -0.28449672, %v1399_v55  ;;  %v1376_v17 = vadd.f32 -1.4531521, %v1368_v16 }
 0x2f0   : > { %v1525_v26 = vmul.f32 %v1517_v60, %v1509_v59 }
 0x2f1   : > { %v1478_v45 = vsub.f32 1.0, %v1470_v43  ;;  %v1415_v11 = vmul.f32 %v1916_v21, %v1407_v29  ;;  %v1384_v12 = vmul.f32 %v1922_v33, %v1376_v17 }
 0x2f2   : > { %v1533_v48 = vadd.f32 %v1931_v35, %v1525_v26 }
 0x2f3   : > { %v1494_v50 = vsub.f32 0.0, %v1478_v45  ;;  %v1423_v24 = vadd.f32 0.2548296, %v1415_v11  ;;  %v1392_v8 = vadd.f32 1.4214138, %v1384_v12 }
 0x2f4   : > { %1541 = vst [vmem:[%s2710_s21 + $0x20] sm:$0xff] %v1533_v48 }
 0x2f5   : > { %v1502_v4 = vsel %vm1486_vm13, %v1478_v45, %v1494_v50  ;;  %v1431_v53 = vmul.f32 %v1916_v21, %v1423_v24  ;;  %v1400_v49 = vmul.f32 %v1922_v33, %v1392_v8 }
 0x2f6   : > { %v1518_v56 = vadd.f32 1.0, %v1502_v4 }
 0x2f7   : > { %v1471_v46 = vmul.f32 %v1924_v61, %v1431_v53  ;;  %v1408_v36 = vadd.f32 -0.28449672, %v1400_v49 }
 0x2f8   : > { %v1526_v19 = vmul.f32 %v1518_v56, %v1510_v39 }
 0x2f9   : > { %v1479_v37 = vsub.f32 1.0, %v1471_v46  ;;  %v1416_v2 = vmul.f32 %v1922_v33, %v1408_v36 }
 0x2fa   : > { %v1534_v7 = vadd.f32 %v1932_v5, %v1526_v19 }
 0x2fb   : > { %v1495_v34 = vsub.f32 0.0, %v1479_v37  ;;  %v1424_v54 = vadd.f32 0.2548296, %v1416_v2 }
 0x2fc   : > { %1542 = vst [vmem:[%s2710_s21 + $0x28] sm:$0xff] %v1534_v7 }
 0x2fd   : > { %v1503_v21 = vsel %vm1487_vm14, %v1479_v37, %v1495_v34  ;;  %v1432_v13 = vmul.f32 %v1922_v33, %v1424_v54 }
 0x2fe   : > { %v1519_v1 = vadd.f32 1.0, %v1503_v21 }
 0x2ff   : > { %v1472_v22 = vmul.f32 %v1926_v14, %v1432_v13 }
 0x300   : > { %v1527_v38 = vmul.f32 %v1519_v1, %v1511_v52 }
 0x301   : > { %v1480_v0 = vsub.f32 1.0, %v1472_v22 }
 0x302   : > { %v1535_v15 = vadd.f32 %v1933_v10, %v1527_v38 }
 0x303   : > { %v1496_v32 = vsub.f32 0.0, %v1480_v0 }
 0x304   : > { %1543 = vst [vmem:[%s2710_s21 + $0x30] sm:$0xff] %v1535_v15 }
 0x305   : > { %v1504_v28 = vsel %vm1488_vm15, %v1480_v0, %v1496_v32 }
 0x306   : > { %v1520_v62 = vadd.f32 1.0, %v1504_v28 }
 0x308   : > { %v1528_v58 = vmul.f32 %v1520_v62, %v1512_v9 }
 0x30a   : > { %v1536_v23 = vadd.f32 %v1934_v27, %v1528_v58 }
 0x30c   : > { %1544 = vst [vmem:[%s2710_s21 + $0x38] sm:$0xff] %v1536_v23 }
 0x30d PF: > { %s18_s27 = sadd.s32 1, %s1941_s27  }
 0x30e   : > { %p15_p4 = scmp.ge.s32.totalorder %s18_s27, 4  }
 0x310   :  { %17 = sbr.rel (!%p15_p4) target bundleno = 1 (0x1), region = 82 }

</bundles_post_ra>
